<compile_context>
chip_gen: v6e
topology: v6e:2x2x1
jax: 0.10.0
libtpu: 0.0.40
codegen_flags: <defaults>
</compile_context>

<pallas_src>
import math
from functools import partial

import jax
import jax.numpy as jnp
from jax.experimental import pallas as pl
from jax.experimental.pallas import tpu as pltpu


# ----------------------------- configuration --------------------------------
CONFIG = dict(
    patch_size=(2, 2, 2),
    hidden_size=32,
    mlp_dim=64,
    num_heads=4,
    num_layers=2,
    encoder_channels=(4, 8, 16),
    down_factor=2,
    down_num=2,
    pool_num=1,
    dropout_rate=0.0,            # dropout -> identity (eval / rate 0)
    attention_dropout_rate=0.0,  # dropout -> identity
)
IMG_SIZE = (16, 16, 16)
VIS = False  # attention weights not collected (matches vis=False)


# ------------------------------ shared helpers -------------------------------
def _layer_norm(v, p, eps=1e-6):
    # p: (2, D) = [gamma; beta].  eps=1e-6 matches LayerNorm(..., eps=1e-06).
    g = p[0:1, :]
    b = p[1:2, :]
    mu = jnp.mean(v, axis=-1, keepdims=True)
    var = jnp.mean(jnp.square(v - mu), axis=-1, keepdims=True)
    return (v - mu) * jax.lax.rsqrt(var + eps) * g + b


# --------------------------- conv (lane-dense) kernel -------------------------
def _conv_mm_kernel(col_ref, w_ref, b_ref, o_ref, *, act):
    # col_ref: (1, K, TM)   w_ref: (Cout, K)   b_ref: (Cout, 1)
    # output tile (Cout, TM): lane axis = TM (>=128 or full), lane-dense stores.
    y = jnp.dot(w_ref[...], col_ref[0],
                preferred_element_type=jnp.float32) + b_ref[...]
    if act == "relu":
        y = jnp.maximum(y, 0.0)
    o_ref[0] = y.astype(o_ref.dtype)


def conv3d_3x3(x, w, b, act="relu"):
    """Conv3d(kernel=3, padding=1, stride=1) + optional ReLU.

    im2col is laid out (B, Cin*27, D*H*W) (channels-first K, spatial-last M) so
    the Pallas matmul writes the NCDHW-flat (Cout, M) result directly.
    """
    B, Cin, D, H, W = x.shape
    Cout = w.shape[0]
    M = D * H * W
    K = Cin * 27

    xp = jnp.pad(x, ((0, 0), (0, 0), (1, 1), (1, 1), (1, 1)))
    cols = [xp[:, :, dz:dz + D, dy:dy + H, dx:dx + W]
            for dz in range(3) for dy in range(3) for dx in range(3)]
    col = jnp.stack(cols, axis=2).reshape(B, K, M)   # no transposes
    # TODO(synk): build the 27 shifted columns inside the kernel to avoid the
    # 27x-amplified im2col write/read in HBM (and fuse DoubleConv pairs).

    wm = w.reshape(Cout, K)
    bm = b.reshape(Cout, 1)

    tm = M if M <= 1024 else 1024
    if M % tm:
        tm = M

    y = pl.pallas_call(
        partial(_conv_mm_kernel, act=act),
        grid=(B, M // tm),
        in_specs=[pl.BlockSpec((1, K, tm), lambda bb, mm: (bb, 0, mm)),
                  pl.BlockSpec((Cout, K), lambda bb, mm: (0, 0)),
                  pl.BlockSpec((Cout, 1), lambda bb, mm: (0, 0))],
        out_specs=pl.BlockSpec((1, Cout, tm), lambda bb, mm: (bb, 0, mm)),
        out_shape=jax.ShapeDtypeStruct((B, Cout, M), jnp.float32),
        compiler_params=pltpu.CompilerParams(
            dimension_semantics=("parallel", "parallel"),
            vmem_limit_bytes=32 * 1024 * 1024),
    )(col, wm, bm)
    return y.reshape(B, Cout, D, H, W)


# ------------------------------- maxpool --------------------------------------
def maxpool3d_2(x):
    """MaxPool3d(kernel=2, stride=2) on NCDHW via plain-JAX strided maxima
    (Pallas kernel dropped per perf review: lane-sparse + glue dominated)."""
    x = jnp.maximum(x[:, :, 0::2], x[:, :, 1::2])
    x = jnp.maximum(x[:, :, :, 0::2], x[:, :, :, 1::2])
    x = jnp.maximum(x[:, :, :, :, 0::2], x[:, :, :, :, 1::2])
    return x


# ------------------------- fused transformer encoder --------------------------
def _encoder_kernel(patch_ref, pew_ref, peb_ref, pos_ref,
                    ln1_ref, ln2_ref, wqkv_ref, bqkv_ref, wo_ref, bo_ref,
                    w1_ref, b1_ref, w2_ref, b2_ref, encn_ref, o_ref,
                    *, num_layers, num_heads, head_size, batch, seq):
    D = num_heads * head_size
    scale = 1.0 / math.sqrt(head_size)
    inv_sqrt2 = jnp.float32(1.0 / math.sqrt(2.0))

    # patch embedding (Conv3d k=stride=patch as matmul) + position embeddings
    x = jnp.dot(patch_ref[...], pew_ref[...], preferred_element_type=jnp.float32)
    x = x + peb_ref[...] + pos_ref[...]                      # (B*S, D)

    for l in range(num_layers):                              # static unroll
        # -------- attention --------
        h = x
        xn = _layer_norm(x, ln1_ref[l])
        qkv = jnp.dot(xn, wqkv_ref[l],
                      preferred_element_type=jnp.float32) + bqkv_ref[l]
        q3 = qkv[:, 0:D].reshape(batch, seq, D)
        k3 = qkv[:, D:2 * D].reshape(batch, seq, D)
        v3 = qkv[:, 2 * D:3 * D].reshape(batch, seq, D)
        wo = wo_ref[l]
        attn = None
        for hh in range(num_heads):
            lo = hh * head_size
            qh = q3[:, :, lo:lo + head_size]                 # (B, S, hd)
            kh = k3[:, :, lo:lo + head_size]
            vh = v3[:, :, lo:lo + head_size]
            s = jnp.einsum('bqd,bkd->bqk', qh, kh,
                           preferred_element_type=jnp.float32) * scale
            s = s - jnp.max(s, axis=-1, keepdims=True)
            e = jnp.exp(s)
            p = e * pl.reciprocal(jnp.sum(e, axis=-1, keepdims=True), approx=True)
            ctx = jnp.einsum('bqk,bkd->bqd', p, vh,
                             preferred_element_type=jnp.float32)   # (B, S, hd)
            # distribute the output projection over heads -> no head concat
            contrib = jnp.dot(ctx.reshape(batch * seq, head_size),
                              wo[lo:lo + head_size, :],
                              preferred_element_type=jnp.float32)  # (B*S, D)
            attn = contrib if attn is None else attn + contrib
        x = attn + bo_ref[l] + h

        # -------- MLP --------
        h = x
        xn = _layer_norm(x, ln2_ref[l])
        y = jnp.dot(xn, w1_ref[l], preferred_element_type=jnp.float32) + b1_ref[l]
        # exact (erf) GELU, matching torch.nn.functional.gelu default
        y = 0.5 * y * (1.0 + jax.lax.erf(y * inv_sqrt2))
        y = jnp.dot(y, w2_ref[l], preferred_element_type=jnp.float32) + b2_ref[l]
        x = y + h

    o_ref[...] = _layer_norm(x, encn_ref[...]).astype(o_ref.dtype)


def encoder_forward(patches, params, cfg, batch, seq):
    """patches: (B*S, C*p^3) -> encoded (B, S, hidden). Single fused pallas_call."""
    hid = cfg["hidden_size"]
    st = params["stacked"]
    pos = jnp.broadcast_to(params["pos_emb"], (batch, seq, hid)).reshape(batch * seq, hid)
    pe_w = params["pe_w"].reshape(hid, -1).T          # (C*p^3, hidden)
    pe_b = params["pe_b"].reshape(1, hid)
    out = pl.pallas_call(
        partial(_encoder_kernel,
                num_layers=cfg["num_layers"], num_heads=cfg["num_heads"],
                head_size=hid // cfg["num_heads"], batch=batch, seq=seq),
        out_shape=jax.ShapeDtypeStruct((batch * seq, hid), jnp.float32),
    )(patches, pe_w, pe_b, pos,
      st["ln1"], st["ln2"], st["wqkv"], st["bqkv"], st["wo"], st["bo"],
      st["w1"], st["b1"], st["w2"], st["b2"], params["enc_norm"])
    return out.reshape(batch, seq, hid)


# --------------------------- patch extraction glue ----------------------------
def _patch_matrix(feats, p):
    """Conv3d(kernel=stride=p) input -> (B*n_patches, C*p^3) patch rows."""
    B, C, D, H, W = feats.shape
    d2, h2, w2 = D // p, H // p, W // p
    xr = feats.reshape(B, C, d2, p, h2, p, w2, p)
    xr = jnp.transpose(xr, (0, 2, 4, 6, 1, 3, 5, 7))
    return xr.reshape(B * d2 * h2 * w2, C * p ** 3)


# ------------------------------ parameters ------------------------------------
def _w(key, shape, scale=0.05):
    return (scale * jax.random.normal(key, shape)).astype(jnp.float32)


def init_params(key, cfg, img_size):
    ec = cfg["encoder_channels"]
    hid, mlp, p = cfg["hidden_size"], cfg["mlp_dim"], cfg["patch_size"][0]
    L = cfg["num_layers"]
    n_patches = int((img_size[0] // cfg["down_factor"] ** cfg["down_num"] // p)
                    * (img_size[1] // cfg["down_factor"] ** cfg["down_num"] // p)
                    * (img_size[2] // cfg["down_factor"] ** cfg["down_num"] // p))
    ks = iter(jax.random.split(key, 64))
    P = {}
    # CNN encoder (DoubleConv + 2x Down, each = 2 conv3d k=3 p=1 + ReLU)
    P["inc_w1"], P["inc_b1"] = _w(next(ks), (ec[0], 2, 3, 3, 3)), jnp.zeros((ec[0],), jnp.float32)
    P["inc_w2"], P["inc_b2"] = _w(next(ks), (ec[0], ec[0], 3, 3, 3)), jnp.zeros((ec[0],), jnp.float32)
    P["d1_w1"], P["d1_b1"] = _w(next(ks), (ec[1], ec[0], 3, 3, 3)), jnp.zeros((ec[1],), jnp.float32)
    P["d1_w2"], P["d1_b2"] = _w(next(ks), (ec[1], ec[1], 3, 3, 3)), jnp.zeros((ec[1],), jnp.float32)
    P["d2_w1"], P["d2_b1"] = _w(next(ks), (ec[2], ec[1], 3, 3, 3)), jnp.zeros((ec[2],), jnp.float32)
    P["d2_w2"], P["d2_b2"] = _w(next(ks), (ec[2], ec[2], 3, 3, 3)), jnp.zeros((ec[2],), jnp.float32)
    # patch embedding + position embeddings (torch init: zeros)
    P["pe_w"] = _w(next(ks), (hid, ec[-1], p, p, p))
    P["pe_b"] = jnp.zeros((hid,), jnp.float32)
    P["pos_emb"] = jnp.zeros((1, n_patches, hid), jnp.float32)
    # transformer blocks, stacked along a leading layer axis for the fused kernel
    ln_unit = jnp.stack([jnp.ones((hid,), jnp.float32), jnp.zeros((hid,), jnp.float32)])
    P["stacked"] = dict(
        ln1=jnp.stack([ln_unit] * L),
        ln2=jnp.stack([ln_unit] * L),
        wqkv=jnp.stack([_w(next(ks), (hid, 3 * hid)) for _ in range(L)]),
        bqkv=jnp.zeros((L, 1, 3 * hid), jnp.float32),
        wo=jnp.stack([_w(next(ks), (hid, hid)) for _ in range(L)]),
        bo=jnp.zeros((L, 1, hid), jnp.float32),
        w1=jnp.stack([_w(next(ks), (hid, mlp)) for _ in range(L)]),
        b1=1e-6 * jnp.ones((L, 1, mlp), jnp.float32),
        w2=jnp.stack([_w(next(ks), (mlp, hid)) for _ in range(L)]),
        b2=1e-6 * jnp.ones((L, 1, hid), jnp.float32),
    )
    P["enc_norm"] = ln_unit
    return P


# ------------------------------- forward --------------------------------------
def transformer_forward(x, params, cfg):
    # ---- CNNEncoder ----
    feats_list = []
    y = conv3d_3x3(x, params["inc_w1"], params["inc_b1"], act="relu")
    y = conv3d_3x3(y, params["inc_w2"], params["inc_b2"], act="relu")
    feats_list.append(y)
    y = maxpool3d_2(y)
    y = conv3d_3x3(y, params["d1_w1"], params["d1_b1"], act="relu")
    y = conv3d_3x3(y, params["d1_w2"], params["d1_b2"], act="relu")
    feats_list.append(y)
    feats = y
    if cfg["down_num"] == 2:
        y = maxpool3d_2(y)
        y = conv3d_3x3(y, params["d2_w1"], params["d2_b1"], act="relu")
        y = conv3d_3x3(y, params["d2_w2"], params["d2_b2"], act="relu")
        feats_list.append(y)
        feats = y
    feats_down = feats
    for _ in range(cfg["pool_num"]):
        feats_down = maxpool3d_2(feats_down)
        feats_list.append(feats_down)
    features = feats_list[::-1]

    # ---- Embeddings + Encoder (single fused Pallas kernel) ----
    B = x.shape[0]
    p = cfg["patch_size"][0]
    patches = _patch_matrix(feats, p)              # (B*S, C*p^3)
    S = patches.shape[0] // B
    encoded = encoder_forward(patches, params, cfg, B, S)
    attn_weights = []                              # vis=False
    return encoded, attn_weights, features


# --------------------------------- main ----------------------------------------
if __name__ == "__main__":
    key = jax.random.PRNGKey(0)
    kx, kp = jax.random.split(key)
    # input_ids: (B=2, C=2, D=16, H=16, W=16)  (NCDHW, as the PyTorch module)
    x = jax.random.normal(kx, (2, 2) + IMG_SIZE, dtype=jnp.float32)
    params = init_params(kp, CONFIG, IMG_SIZE)

    fwd = jax.jit(partial(transformer_forward, cfg=CONFIG))
    encoded, attn_weights, features = fwd(x, params)
    jax.block_until_ready(encoded)
    for f in features:
        jax.block_until_ready(f)

    assert encoded.shape == (2, 8, CONFIG["hidden_size"])
    print("KERNEL_OK")
</pallas_src>

<mosaic_0001>
module attributes {stable_mosaic.version = 11 : i64} {
  func.func @_conv_mm_kernel(%arg0: i32, %arg1: i32, %arg2: memref<1x54x1024xf32, #tpu.memory_space<vmem>>, %arg3: memref<4x54xf32, #tpu.memory_space<vmem>>, %arg4: memref<4x1xf32, #tpu.memory_space<vmem>>, %arg5: memref<1x4x1024xf32, #tpu.memory_space<vmem>>) attributes {dimension_semantics = [#tpu.dimension_semantics<parallel>, #tpu.dimension_semantics<parallel>], iteration_bounds = array<i64: 2, 4>, scalar_prefetch = 0 : i64, scratch_operands = 0 : i64, tpu.core_type = #tpu.core_type<tc>, window_params = [{transform_indices = @transform_0, window_bounds = array<i64: 1, 54, 1024>}, {pipeline_mode = #tpu.pipeline_mode<synchronous>, transform_indices = @transform_1, window_bounds = array<i64: 4, 54>}, {pipeline_mode = #tpu.pipeline_mode<synchronous>, transform_indices = @transform_2, window_bounds = array<i64: 4, 1>}, {transform_indices = @transform_3, window_bounds = array<i64: 1, 4, 1024>}]} {
    %c0 = arith.constant 0 : index
    %c0_0 = arith.constant 0 : index
    %0 = vector.load %arg3[%c0, %c0_0] : memref<4x54xf32, #tpu.memory_space<vmem>>, vector<4x54xf32>
    %c0_1 = arith.constant 0 : index
    %c0_2 = arith.constant 0 : index
    %c0_3 = arith.constant 0 : index
    %1 = vector.load %arg2[%c0_1, %c0_2, %c0_3] : memref<1x54x1024xf32, #tpu.memory_space<vmem>>, vector<1x54x1024xf32>
    %2 = vector.shape_cast %1 : vector<1x54x1024xf32> to vector<54x1024xf32>
    %cst = arith.constant dense<0.000000e+00> : vector<4x1024xf32>
    %3 = tpu.matmul %0, %2, %cst {dimension_numbers = #tpu.dot_dimension_numbers<[1], [0], [0], [1], [0, 0, 1, 1], [], []>} : vector<4x54xf32>, vector<54x1024xf32>, vector<4x1024xf32> -> vector<4x1024xf32>
    %c0_4 = arith.constant 0 : index
    %c0_5 = arith.constant 0 : index
    %4 = vector.load %arg4[%c0_4, %c0_5] : memref<4x1xf32, #tpu.memory_space<vmem>>, vector<4x1xf32>
    %5 = vector.broadcast %4 : vector<4x1xf32> to vector<4x1024xf32>
    %6 = arith.addf %3, %5 : vector<4x1024xf32>
    %cst_6 = arith.constant 0.000000e+00 : f32
    %7 = vector.broadcast %cst_6 : f32 to vector<4x1024xf32>
    %8 = arith.maximumf %6, %7 : vector<4x1024xf32>
    %c0_7 = arith.constant 0 : index
    %c0_8 = arith.constant 0 : index
    %c0_9 = arith.constant 0 : index
    %9 = vector.load %arg5[%c0_7, %c0_8, %c0_9] : memref<1x4x1024xf32, #tpu.memory_space<vmem>>, vector<1x4x1024xf32>
    %10 = vector.shape_cast %9 : vector<1x4x1024xf32> to vector<4x1024xf32>
    %11 = vector.shape_cast %8 : vector<4x1024xf32> to vector<1x4x1024xf32>
    tpu.vector_store %arg5[%c0_7, %c0_8, %c0_9], %11 {strides = array<i32>} : memref<1x4x1024xf32, #tpu.memory_space<vmem>>, vector<1x4x1024xf32>,
    return
  }
  func.func @transform_0(%arg0: i32, %arg1: i32) -> (i32, i32, i32) {
    %c0_i32 = arith.constant 0 : i32
    %c0_i32_0 = arith.constant 0 : i32
    return %arg0, %c0_i32, %arg1 : i32, i32, i32
  }
  func.func @transform_1(%arg0: i32, %arg1: i32) -> (i32, i32) {
    %c0_i32 = arith.constant 0 : i32
    %c0_i32_0 = arith.constant 0 : i32
    %c0_i32_1 = arith.constant 0 : i32
    return %c0_i32, %c0_i32_0 : i32, i32
  }
  func.func @transform_2(%arg0: i32, %arg1: i32) -> (i32, i32) {
    %c0_i32 = arith.constant 0 : i32
    %c0_i32_0 = arith.constant 0 : i32
    %c0_i32_1 = arith.constant 0 : i32
    return %c0_i32, %c0_i32_0 : i32, i32
  }
  func.func @transform_3(%arg0: i32, %arg1: i32) -> (i32, i32, i32) {
    %c0_i32 = arith.constant 0 : i32
    %c0_i32_0 = arith.constant 0 : i32
    return %arg0, %c0_i32, %arg1 : i32, i32, i32
  }
}

module attributes {stable_mosaic.version = 11 : i64} {
  func.func @_conv_mm_kernel(%arg0: i32, %arg1: i32, %arg2: memref<1x108x1024xf32, #tpu.memory_space<vmem>>, %arg3: memref<4x108xf32, #tpu.memory_space<vmem>>, %arg4: memref<4x1xf32, #tpu.memory_space<vmem>>, %arg5: memref<1x4x1024xf32, #tpu.memory_space<vmem>>) attributes {dimension_semantics = [#tpu.dimension_semantics<parallel>, #tpu.dimension_semantics<parallel>], iteration_bounds = array<i64: 2, 4>, scalar_prefetch = 0 : i64, scratch_operands = 0 : i64, tpu.core_type = #tpu.core_type<tc>, window_params = [{transform_indices = @transform_0, window_bounds = array<i64: 1, 108, 1024>}, {pipeline_mode = #tpu.pipeline_mode<synchronous>, transform_indices = @transform_1, window_bounds = array<i64: 4, 108>}, {pipeline_mode = #tpu.pipeline_mode<synchronous>, transform_indices = @transform_2, window_bounds = array<i64: 4, 1>}, {transform_indices = @transform_3, window_bounds = array<i64: 1, 4, 1024>}]} {
    %c0 = arith.constant 0 : index
    %c0_0 = arith.constant 0 : index
    %0 = vector.load %arg3[%c0, %c0_0] : memref<4x108xf32, #tpu.memory_space<vmem>>, vector<4x108xf32>
    %c0_1 = arith.constant 0 : index
    %c0_2 = arith.constant 0 : index
    %c0_3 = arith.constant 0 : index
    %1 = vector.load %arg2[%c0_1, %c0_2, %c0_3] : memref<1x108x1024xf32, #tpu.memory_space<vmem>>, vector<1x108x1024xf32>
    %2 = vector.shape_cast %1 : vector<1x108x1024xf32> to vector<108x1024xf32>
    %cst = arith.constant dense<0.000000e+00> : vector<4x1024xf32>
    %3 = tpu.matmul %0, %2, %cst {dimension_numbers = #tpu.dot_dimension_numbers<[1], [0], [0], [1], [0, 0, 1, 1], [], []>} : vector<4x108xf32>, vector<108x1024xf32>, vector<4x1024xf32> -> vector<4x1024xf32>
    %c0_4 = arith.constant 0 : index
    %c0_5 = arith.constant 0 : index
    %4 = vector.load %arg4[%c0_4, %c0_5] : memref<4x1xf32, #tpu.memory_space<vmem>>, vector<4x1xf32>
    %5 = vector.broadcast %4 : vector<4x1xf32> to vector<4x1024xf32>
    %6 = arith.addf %3, %5 : vector<4x1024xf32>
    %cst_6 = arith.constant 0.000000e+00 : f32
    %7 = vector.broadcast %cst_6 : f32 to vector<4x1024xf32>
    %8 = arith.maximumf %6, %7 : vector<4x1024xf32>
    %c0_7 = arith.constant 0 : index
    %c0_8 = arith.constant 0 : index
    %c0_9 = arith.constant 0 : index
    %9 = vector.load %arg5[%c0_7, %c0_8, %c0_9] : memref<1x4x1024xf32, #tpu.memory_space<vmem>>, vector<1x4x1024xf32>
    %10 = vector.shape_cast %9 : vector<1x4x1024xf32> to vector<4x1024xf32>
    %11 = vector.shape_cast %8 : vector<4x1024xf32> to vector<1x4x1024xf32>
    tpu.vector_store %arg5[%c0_7, %c0_8, %c0_9], %11 {strides = array<i32>} : memref<1x4x1024xf32, #tpu.memory_space<vmem>>, vector<1x4x1024xf32>,
    return
  }
  func.func @transform_0(%arg0: i32, %arg1: i32) -> (i32, i32, i32) {
    %c0_i32 = arith.constant 0 : i32
    %c0_i32_0 = arith.constant 0 : i32
    return %arg0, %c0_i32, %arg1 : i32, i32, i32
  }
  func.func @transform_1(%arg0: i32, %arg1: i32) -> (i32, i32) {
    %c0_i32 = arith.constant 0 : i32
    %c0_i32_0 = arith.constant 0 : i32
    %c0_i32_1 = arith.constant 0 : i32
    return %c0_i32, %c0_i32_0 : i32, i32
  }
  func.func @transform_2(%arg0: i32, %arg1: i32) -> (i32, i32) {
    %c0_i32 = arith.constant 0 : i32
    %c0_i32_0 = arith.constant 0 : i32
    %c0_i32_1 = arith.constant 0 : i32
    return %c0_i32, %c0_i32_0 : i32, i32
  }
  func.func @transform_3(%arg0: i32, %arg1: i32) -> (i32, i32, i32) {
    %c0_i32 = arith.constant 0 : i32
    %c0_i32_0 = arith.constant 0 : i32
    return %arg0, %c0_i32, %arg1 : i32, i32, i32
  }
}

module attributes {stable_mosaic.version = 11 : i64} {
  func.func @_conv_mm_kernel(%arg0: i32, %arg1: i32, %arg2: memref<1x108x512xf32, #tpu.memory_space<vmem>>, %arg3: memref<8x108xf32, #tpu.memory_space<vmem>>, %arg4: memref<8x1xf32, #tpu.memory_space<vmem>>, %arg5: memref<1x8x512xf32, #tpu.memory_space<vmem>>) attributes {dimension_semantics = [#tpu.dimension_semantics<parallel>, #tpu.dimension_semantics<parallel>], iteration_bounds = array<i64: 2, 1>, scalar_prefetch = 0 : i64, scratch_operands = 0 : i64, tpu.core_type = #tpu.core_type<tc>, window_params = [{transform_indices = @transform_0, window_bounds = array<i64: 1, 108, 512>}, {pipeline_mode = #tpu.pipeline_mode<synchronous>, transform_indices = @transform_1, window_bounds = array<i64: 8, 108>}, {pipeline_mode = #tpu.pipeline_mode<synchronous>, transform_indices = @transform_2, window_bounds = array<i64: 8, 1>}, {transform_indices = @transform_3, window_bounds = array<i64: 1, 8, 512>}]} {
    %c0 = arith.constant 0 : index
    %c0_0 = arith.constant 0 : index
    %0 = vector.load %arg3[%c0, %c0_0] : memref<8x108xf32, #tpu.memory_space<vmem>>, vector<8x108xf32>
    %c0_1 = arith.constant 0 : index
    %c0_2 = arith.constant 0 : index
    %c0_3 = arith.constant 0 : index
    %1 = vector.load %arg2[%c0_1, %c0_2, %c0_3] : memref<1x108x512xf32, #tpu.memory_space<vmem>>, vector<1x108x512xf32>
    %2 = vector.shape_cast %1 : vector<1x108x512xf32> to vector<108x512xf32>
    %cst = arith.constant dense<0.000000e+00> : vector<8x512xf32>
    %3 = tpu.matmul %0, %2, %cst {dimension_numbers = #tpu.dot_dimension_numbers<[1], [0], [0], [1], [0, 0, 1, 1], [], []>} : vector<8x108xf32>, vector<108x512xf32>, vector<8x512xf32> -> vector<8x512xf32>
    %c0_4 = arith.constant 0 : index
    %c0_5 = arith.constant 0 : index
    %4 = vector.load %arg4[%c0_4, %c0_5] : memref<8x1xf32, #tpu.memory_space<vmem>>, vector<8x1xf32>
    %5 = vector.broadcast %4 : vector<8x1xf32> to vector<8x512xf32>
    %6 = arith.addf %3, %5 : vector<8x512xf32>
    %cst_6 = arith.constant 0.000000e+00 : f32
    %7 = vector.broadcast %cst_6 : f32 to vector<8x512xf32>
    %8 = arith.maximumf %6, %7 : vector<8x512xf32>
    %c0_7 = arith.constant 0 : index
    %c0_8 = arith.constant 0 : index
    %c0_9 = arith.constant 0 : index
    %9 = vector.load %arg5[%c0_7, %c0_8, %c0_9] : memref<1x8x512xf32, #tpu.memory_space<vmem>>, vector<1x8x512xf32>
    %10 = vector.shape_cast %9 : vector<1x8x512xf32> to vector<8x512xf32>
    %11 = vector.shape_cast %8 : vector<8x512xf32> to vector<1x8x512xf32>
    tpu.vector_store %arg5[%c0_7, %c0_8, %c0_9], %11 {strides = array<i32>} : memref<1x8x512xf32, #tpu.memory_space<vmem>>, vector<1x8x512xf32>,
    return
  }
  func.func @transform_0(%arg0: i32, %arg1: i32) -> (i32, i32, i32) {
    %c0_i32 = arith.constant 0 : i32
    %c0_i32_0 = arith.constant 0 : i32
    return %arg0, %c0_i32, %arg1 : i32, i32, i32
  }
  func.func @transform_1(%arg0: i32, %arg1: i32) -> (i32, i32) {
    %c0_i32 = arith.constant 0 : i32
    %c0_i32_0 = arith.constant 0 : i32
    %c0_i32_1 = arith.constant 0 : i32
    return %c0_i32, %c0_i32_0 : i32, i32
  }
  func.func @transform_2(%arg0: i32, %arg1: i32) -> (i32, i32) {
    %c0_i32 = arith.constant 0 : i32
    %c0_i32_0 = arith.constant 0 : i32
    %c0_i32_1 = arith.constant 0 : i32
    return %c0_i32, %c0_i32_0 : i32, i32
  }
  func.func @transform_3(%arg0: i32, %arg1: i32) -> (i32, i32, i32) {
    %c0_i32 = arith.constant 0 : i32
    %c0_i32_0 = arith.constant 0 : i32
    return %arg0, %c0_i32, %arg1 : i32, i32, i32
  }
}

module attributes {stable_mosaic.version = 11 : i64} {
  func.func @_conv_mm_kernel(%arg0: i32, %arg1: i32, %arg2: memref<1x216x512xf32, #tpu.memory_space<vmem>>, %arg3: memref<8x216xf32, #tpu.memory_space<vmem>>, %arg4: memref<8x1xf32, #tpu.memory_space<vmem>>, %arg5: memref<1x8x512xf32, #tpu.memory_space<vmem>>) attributes {dimension_semantics = [#tpu.dimension_semantics<parallel>, #tpu.dimension_semantics<parallel>], iteration_bounds = array<i64: 2, 1>, scalar_prefetch = 0 : i64, scratch_operands = 0 : i64, tpu.core_type = #tpu.core_type<tc>, window_params = [{transform_indices = @transform_0, window_bounds = array<i64: 1, 216, 512>}, {pipeline_mode = #tpu.pipeline_mode<synchronous>, transform_indices = @transform_1, window_bounds = array<i64: 8, 216>}, {pipeline_mode = #tpu.pipeline_mode<synchronous>, transform_indices = @transform_2, window_bounds = array<i64: 8, 1>}, {transform_indices = @transform_3, window_bounds = array<i64: 1, 8, 512>}]} {
    %c0 = arith.constant 0 : index
    %c0_0 = arith.constant 0 : index
    %0 = vector.load %arg3[%c0, %c0_0] : memref<8x216xf32, #tpu.memory_space<vmem>>, vector<8x216xf32>
    %c0_1 = arith.constant 0 : index
    %c0_2 = arith.constant 0 : index
    %c0_3 = arith.constant 0 : index
    %1 = vector.load %arg2[%c0_1, %c0_2, %c0_3] : memref<1x216x512xf32, #tpu.memory_space<vmem>>, vector<1x216x512xf32>
    %2 = vector.shape_cast %1 : vector<1x216x512xf32> to vector<216x512xf32>
    %cst = arith.constant dense<0.000000e+00> : vector<8x512xf32>
    %3 = tpu.matmul %0, %2, %cst {dimension_numbers = #tpu.dot_dimension_numbers<[1], [0], [0], [1], [0, 0, 1, 1], [], []>} : vector<8x216xf32>, vector<216x512xf32>, vector<8x512xf32> -> vector<8x512xf32>
    %c0_4 = arith.constant 0 : index
    %c0_5 = arith.constant 0 : index
    %4 = vector.load %arg4[%c0_4, %c0_5] : memref<8x1xf32, #tpu.memory_space<vmem>>, vector<8x1xf32>
    %5 = vector.broadcast %4 : vector<8x1xf32> to vector<8x512xf32>
    %6 = arith.addf %3, %5 : vector<8x512xf32>
    %cst_6 = arith.constant 0.000000e+00 : f32
    %7 = vector.broadcast %cst_6 : f32 to vector<8x512xf32>
    %8 = arith.maximumf %6, %7 : vector<8x512xf32>
    %c0_7 = arith.constant 0 : index
    %c0_8 = arith.constant 0 : index
    %c0_9 = arith.constant 0 : index
    %9 = vector.load %arg5[%c0_7, %c0_8, %c0_9] : memref<1x8x512xf32, #tpu.memory_space<vmem>>, vector<1x8x512xf32>
    %10 = vector.shape_cast %9 : vector<1x8x512xf32> to vector<8x512xf32>
    %11 = vector.shape_cast %8 : vector<8x512xf32> to vector<1x8x512xf32>
    tpu.vector_store %arg5[%c0_7, %c0_8, %c0_9], %11 {strides = array<i32>} : memref<1x8x512xf32, #tpu.memory_space<vmem>>, vector<1x8x512xf32>,
    return
  }
  func.func @transform_0(%arg0: i32, %arg1: i32) -> (i32, i32, i32) {
    %c0_i32 = arith.constant 0 : i32
    %c0_i32_0 = arith.constant 0 : i32
    return %arg0, %c0_i32, %arg1 : i32, i32, i32
  }
  func.func @transform_1(%arg0: i32, %arg1: i32) -> (i32, i32) {
    %c0_i32 = arith.constant 0 : i32
    %c0_i32_0 = arith.constant 0 : i32
    %c0_i32_1 = arith.constant 0 : i32
    return %c0_i32, %c0_i32_0 : i32, i32
  }
  func.func @transform_2(%arg0: i32, %arg1: i32) -> (i32, i32) {
    %c0_i32 = arith.constant 0 : i32
    %c0_i32_0 = arith.constant 0 : i32
    %c0_i32_1 = arith.constant 0 : i32
    return %c0_i32, %c0_i32_0 : i32, i32
  }
  func.func @transform_3(%arg0: i32, %arg1: i32) -> (i32, i32, i32) {
    %c0_i32 = arith.constant 0 : i32
    %c0_i32_0 = arith.constant 0 : i32
    return %arg0, %c0_i32, %arg1 : i32, i32, i32
  }
}

module attributes {stable_mosaic.version = 11 : i64} {
  func.func @_conv_mm_kernel(%arg0: i32, %arg1: i32, %arg2: memref<1x216x64xf32, #tpu.memory_space<vmem>>, %arg3: memref<16x216xf32, #tpu.memory_space<vmem>>, %arg4: memref<16x1xf32, #tpu.memory_space<vmem>>, %arg5: memref<1x16x64xf32, #tpu.memory_space<vmem>>) attributes {dimension_semantics = [#tpu.dimension_semantics<parallel>, #tpu.dimension_semantics<parallel>], iteration_bounds = array<i64: 2, 1>, scalar_prefetch = 0 : i64, scratch_operands = 0 : i64, tpu.core_type = #tpu.core_type<tc>, window_params = [{transform_indices = @transform_0, window_bounds = array<i64: 1, 216, 64>}, {pipeline_mode = #tpu.pipeline_mode<synchronous>, transform_indices = @transform_1, window_bounds = array<i64: 16, 216>}, {pipeline_mode = #tpu.pipeline_mode<synchronous>, transform_indices = @transform_2, window_bounds = array<i64: 16, 1>}, {transform_indices = @transform_3, window_bounds = array<i64: 1, 16, 64>}]} {
    %c0 = arith.constant 0 : index
    %c0_0 = arith.constant 0 : index
    %0 = vector.load %arg3[%c0, %c0_0] : memref<16x216xf32, #tpu.memory_space<vmem>>, vector<16x216xf32>
    %c0_1 = arith.constant 0 : index
    %c0_2 = arith.constant 0 : index
    %c0_3 = arith.constant 0 : index
    %1 = vector.load %arg2[%c0_1, %c0_2, %c0_3] : memref<1x216x64xf32, #tpu.memory_space<vmem>>, vector<1x216x64xf32>
    %2 = vector.shape_cast %1 : vector<1x216x64xf32> to vector<216x64xf32>
    %cst = arith.constant dense<0.000000e+00> : vector<16x64xf32>
    %3 = tpu.matmul %0, %2, %cst {dimension_numbers = #tpu.dot_dimension_numbers<[1], [0], [0], [1], [0, 0, 1, 1], [], []>} : vector<16x216xf32>, vector<216x64xf32>, vector<16x64xf32> -> vector<16x64xf32>
    %c0_4 = arith.constant 0 : index
    %c0_5 = arith.constant 0 : index
    %4 = vector.load %arg4[%c0_4, %c0_5] : memref<16x1xf32, #tpu.memory_space<vmem>>, vector<16x1xf32>
    %5 = vector.broadcast %4 : vector<16x1xf32> to vector<16x64xf32>
    %6 = arith.addf %3, %5 : vector<16x64xf32>
    %cst_6 = arith.constant 0.000000e+00 : f32
    %7 = vector.broadcast %cst_6 : f32 to vector<16x64xf32>
    %8 = arith.maximumf %6, %7 : vector<16x64xf32>
    %c0_7 = arith.constant 0 : index
    %c0_8 = arith.constant 0 : index
    %c0_9 = arith.constant 0 : index
    %9 = vector.load %arg5[%c0_7, %c0_8, %c0_9] : memref<1x16x64xf32, #tpu.memory_space<vmem>>, vector<1x16x64xf32>
    %10 = vector.shape_cast %9 : vector<1x16x64xf32> to vector<16x64xf32>
    %11 = vector.shape_cast %8 : vector<16x64xf32> to vector<1x16x64xf32>
    tpu.vector_store %arg5[%c0_7, %c0_8, %c0_9], %11 {strides = array<i32>} : memref<1x16x64xf32, #tpu.memory_space<vmem>>, vector<1x16x64xf32>,
    return
  }
  func.func @transform_0(%arg0: i32, %arg1: i32) -> (i32, i32, i32) {
    %c0_i32 = arith.constant 0 : i32
    %c0_i32_0 = arith.constant 0 : i32
    return %arg0, %c0_i32, %arg1 : i32, i32, i32
  }
  func.func @transform_1(%arg0: i32, %arg1: i32) -> (i32, i32) {
    %c0_i32 = arith.constant 0 : i32
    %c0_i32_0 = arith.constant 0 : i32
    %c0_i32_1 = arith.constant 0 : i32
    return %c0_i32, %c0_i32_0 : i32, i32
  }
  func.func @transform_2(%arg0: i32, %arg1: i32) -> (i32, i32) {
    %c0_i32 = arith.constant 0 : i32
    %c0_i32_0 = arith.constant 0 : i32
    %c0_i32_1 = arith.constant 0 : i32
    return %c0_i32, %c0_i32_0 : i32, i32
  }
  func.func @transform_3(%arg0: i32, %arg1: i32) -> (i32, i32, i32) {
    %c0_i32 = arith.constant 0 : i32
    %c0_i32_0 = arith.constant 0 : i32
    return %arg0, %c0_i32, %arg1 : i32, i32, i32
  }
}

module attributes {stable_mosaic.version = 11 : i64} {
  func.func @_conv_mm_kernel(%arg0: i32, %arg1: i32, %arg2: memref<1x432x64xf32, #tpu.memory_space<vmem>>, %arg3: memref<16x432xf32, #tpu.memory_space<vmem>>, %arg4: memref<16x1xf32, #tpu.memory_space<vmem>>, %arg5: memref<1x16x64xf32, #tpu.memory_space<vmem>>) attributes {dimension_semantics = [#tpu.dimension_semantics<parallel>, #tpu.dimension_semantics<parallel>], iteration_bounds = array<i64: 2, 1>, scalar_prefetch = 0 : i64, scratch_operands = 0 : i64, tpu.core_type = #tpu.core_type<tc>, window_params = [{transform_indices = @transform_0, window_bounds = array<i64: 1, 432, 64>}, {pipeline_mode = #tpu.pipeline_mode<synchronous>, transform_indices = @transform_1, window_bounds = array<i64: 16, 432>}, {pipeline_mode = #tpu.pipeline_mode<synchronous>, transform_indices = @transform_2, window_bounds = array<i64: 16, 1>}, {transform_indices = @transform_3, window_bounds = array<i64: 1, 16, 64>}]} {
    %c0 = arith.constant 0 : index
    %c0_0 = arith.constant 0 : index
    %0 = vector.load %arg3[%c0, %c0_0] : memref<16x432xf32, #tpu.memory_space<vmem>>, vector<16x432xf32>
    %c0_1 = arith.constant 0 : index
    %c0_2 = arith.constant 0 : index
    %c0_3 = arith.constant 0 : index
    %1 = vector.load %arg2[%c0_1, %c0_2, %c0_3] : memref<1x432x64xf32, #tpu.memory_space<vmem>>, vector<1x432x64xf32>
    %2 = vector.shape_cast %1 : vector<1x432x64xf32> to vector<432x64xf32>
    %cst = arith.constant dense<0.000000e+00> : vector<16x64xf32>
    %3 = tpu.matmul %0, %2, %cst {dimension_numbers = #tpu.dot_dimension_numbers<[1], [0], [0], [1], [0, 0, 1, 1], [], []>} : vector<16x432xf32>, vector<432x64xf32>, vector<16x64xf32> -> vector<16x64xf32>
    %c0_4 = arith.constant 0 : index
    %c0_5 = arith.constant 0 : index
    %4 = vector.load %arg4[%c0_4, %c0_5] : memref<16x1xf32, #tpu.memory_space<vmem>>, vector<16x1xf32>
    %5 = vector.broadcast %4 : vector<16x1xf32> to vector<16x64xf32>
    %6 = arith.addf %3, %5 : vector<16x64xf32>
    %cst_6 = arith.constant 0.000000e+00 : f32
    %7 = vector.broadcast %cst_6 : f32 to vector<16x64xf32>
    %8 = arith.maximumf %6, %7 : vector<16x64xf32>
    %c0_7 = arith.constant 0 : index
    %c0_8 = arith.constant 0 : index
    %c0_9 = arith.constant 0 : index
    %9 = vector.load %arg5[%c0_7, %c0_8, %c0_9] : memref<1x16x64xf32, #tpu.memory_space<vmem>>, vector<1x16x64xf32>
    %10 = vector.shape_cast %9 : vector<1x16x64xf32> to vector<16x64xf32>
    %11 = vector.shape_cast %8 : vector<16x64xf32> to vector<1x16x64xf32>
    tpu.vector_store %arg5[%c0_7, %c0_8, %c0_9], %11 {strides = array<i32>} : memref<1x16x64xf32, #tpu.memory_space<vmem>>, vector<1x16x64xf32>,
    return
  }
  func.func @transform_0(%arg0: i32, %arg1: i32) -> (i32, i32, i32) {
    %c0_i32 = arith.constant 0 : i32
    %c0_i32_0 = arith.constant 0 : i32
    return %arg0, %c0_i32, %arg1 : i32, i32, i32
  }
  func.func @transform_1(%arg0: i32, %arg1: i32) -> (i32, i32) {
    %c0_i32 = arith.constant 0 : i32
    %c0_i32_0 = arith.constant 0 : i32
    %c0_i32_1 = arith.constant 0 : i32
    return %c0_i32, %c0_i32_0 : i32, i32
  }
  func.func @transform_2(%arg0: i32, %arg1: i32) -> (i32, i32) {
    %c0_i32 = arith.constant 0 : i32
    %c0_i32_0 = arith.constant 0 : i32
    %c0_i32_1 = arith.constant 0 : i32
    return %c0_i32, %c0_i32_0 : i32, i32
  }
  func.func @transform_3(%arg0: i32, %arg1: i32) -> (i32, i32, i32) {
    %c0_i32 = arith.constant 0 : i32
    %c0_i32_0 = arith.constant 0 : i32
    return %arg0, %c0_i32, %arg1 : i32, i32, i32
  }
}

module attributes {stable_mosaic.version = 11 : i64} {
  func.func @_encoder_kernel(%arg0: memref<16x128xf32, #tpu.memory_space<vmem>>, %arg1: memref<128x32xf32, #tpu.memory_space<vmem>>, %arg2: memref<1x32xf32, #tpu.memory_space<vmem>>, %arg3: memref<16x32xf32, #tpu.memory_space<vmem>>, %arg4: memref<2x2x32xf32, #tpu.memory_space<vmem>>, %arg5: memref<2x2x32xf32, #tpu.memory_space<vmem>>, %arg6: memref<2x32x96xf32, #tpu.memory_space<vmem>>, %arg7: memref<2x1x96xf32, #tpu.memory_space<vmem>>, %arg8: memref<2x32x32xf32, #tpu.memory_space<vmem>>, %arg9: memref<2x1x32xf32, #tpu.memory_space<vmem>>, %arg10: memref<2x32x64xf32, #tpu.memory_space<vmem>>, %arg11: memref<2x1x64xf32, #tpu.memory_space<vmem>>, %arg12: memref<2x64x32xf32, #tpu.memory_space<vmem>>, %arg13: memref<2x1x32xf32, #tpu.memory_space<vmem>>, %arg14: memref<2x32xf32, #tpu.memory_space<vmem>>, %arg15: memref<16x32xf32, #tpu.memory_space<vmem>>) attributes {dimension_semantics = [], scalar_prefetch = 0 : i64, scratch_operands = 0 : i64, tpu.core_type = #tpu.core_type<tc>} {
    %c0 = arith.constant 0 : index
    %c0_0 = arith.constant 0 : index
    %0 = vector.load %arg0[%c0, %c0_0] : memref<16x128xf32, #tpu.memory_space<vmem>>, vector<16x128xf32>
    %c0_1 = arith.constant 0 : index
    %c0_2 = arith.constant 0 : index
    %1 = vector.load %arg1[%c0_1, %c0_2] : memref<128x32xf32, #tpu.memory_space<vmem>>, vector<128x32xf32>
    %cst = arith.constant dense<0.000000e+00> : vector<16x32xf32>
    %2 = tpu.matmul %0, %1, %cst {dimension_numbers = #tpu.dot_dimension_numbers<[1], [0], [0], [1], [0, 0, 1, 1], [], []>} : vector<16x128xf32>, vector<128x32xf32>, vector<16x32xf32> -> vector<16x32xf32>
    %c0_3 = arith.constant 0 : index
    %c0_4 = arith.constant 0 : index
    %3 = vector.load %arg2[%c0_3, %c0_4] : memref<1x32xf32, #tpu.memory_space<vmem>>, vector<1x32xf32>
    %4 = vector.broadcast %3 : vector<1x32xf32> to vector<16x32xf32>
    %5 = arith.addf %2, %4 : vector<16x32xf32>
    %c0_5 = arith.constant 0 : index
    %c0_6 = arith.constant 0 : index
    %6 = vector.load %arg3[%c0_5, %c0_6] : memref<16x32xf32, #tpu.memory_space<vmem>>, vector<16x32xf32>
    %7 = arith.addf %5, %6 : vector<16x32xf32>
    %c0_7 = arith.constant 0 : index
    %c0_8 = arith.constant 0 : index
    %c0_9 = arith.constant 0 : index
    %8 = vector.load %arg4[%c0_7, %c0_8, %c0_9] : memref<2x2x32xf32, #tpu.memory_space<vmem>>, vector<1x2x32xf32>
    %9 = vector.shape_cast %8 : vector<1x2x32xf32> to vector<2x32xf32>
    %10 = vector.extract_strided_slice %9 {offsets = [0, 0], sizes = [1, 32], strides = [1, 1]} : vector<2x32xf32> to vector<1x32xf32>
    %11 = vector.extract_strided_slice %9 {offsets = [1, 0], sizes = [1, 32], strides = [1, 1]} : vector<2x32xf32> to vector<1x32xf32>
    %cst_10 = arith.constant dense<0.000000e+00> : vector<16xf32>
    %12 = vector.multi_reduction <add>, %7, %cst_10 [1] : vector<16x32xf32> to vector<16xf32>
    %13 = vector.shape_cast %12 : vector<16xf32> to vector<16x1xf32>
    %cst_11 = arith.constant 3.200000e+01 : f32
    %14 = vector.broadcast %cst_11 : f32 to vector<16x1xf32>
    %15 = arith.divf %13, %14 : vector<16x1xf32>
    %16 = vector.broadcast %15 : vector<16x1xf32> to vector<16x32xf32>
    %17 = arith.subf %7, %16 : vector<16x32xf32>
    %18 = arith.mulf %17, %17 : vector<16x32xf32>
    %cst_12 = arith.constant dense<0.000000e+00> : vector<16xf32>
    %19 = vector.multi_reduction <add>, %18, %cst_12 [1] : vector<16x32xf32> to vector<16xf32>
    %20 = vector.shape_cast %19 : vector<16xf32> to vector<16x1xf32>
    %cst_13 = arith.constant 3.200000e+01 : f32
    %21 = vector.broadcast %cst_13 : f32 to vector<16x1xf32>
    %22 = arith.divf %20, %21 : vector<16x1xf32>
    %23 = vector.broadcast %15 : vector<16x1xf32> to vector<16x32xf32>
    %24 = arith.subf %7, %23 : vector<16x32xf32>
    %cst_14 = arith.constant 9.99999997E-7 : f32
    %25 = vector.broadcast %cst_14 : f32 to vector<16x1xf32>
    %26 = arith.addf %22, %25 : vector<16x1xf32>
    %27 = math.rsqrt %26 : vector<16x1xf32>
    %28 = vector.broadcast %27 : vector<16x1xf32> to vector<16x32xf32>
    %29 = arith.mulf %24, %28 : vector<16x32xf32>
    %30 = vector.broadcast %10 : vector<1x32xf32> to vector<16x32xf32>
    %31 = arith.mulf %29, %30 : vector<16x32xf32>
    %32 = vector.broadcast %11 : vector<1x32xf32> to vector<16x32xf32>
    %33 = arith.addf %31, %32 : vector<16x32xf32>
    %c0_15 = arith.constant 0 : index
    %c0_16 = arith.constant 0 : index
    %c0_17 = arith.constant 0 : index
    %34 = vector.load %arg6[%c0_15, %c0_16, %c0_17] : memref<2x32x96xf32, #tpu.memory_space<vmem>>, vector<1x32x96xf32>
    %35 = vector.shape_cast %34 : vector<1x32x96xf32> to vector<32x96xf32>
    %cst_18 = arith.constant dense<0.000000e+00> : vector<16x96xf32>
    %36 = tpu.matmul %33, %35, %cst_18 {dimension_numbers = #tpu.dot_dimension_numbers<[1], [0], [0], [1], [0, 0, 1, 1], [], []>} : vector<16x32xf32>, vector<32x96xf32>, vector<16x96xf32> -> vector<16x96xf32>
    %c0_19 = arith.constant 0 : index
    %c0_20 = arith.constant 0 : index
    %c0_21 = arith.constant 0 : index
    %37 = vector.load %arg7[%c0_19, %c0_20, %c0_21] : memref<2x1x96xf32, #tpu.memory_space<vmem>>, vector<1x1x96xf32>
    %38 = vector.shape_cast %37 : vector<1x1x96xf32> to vector<1x96xf32>
    %39 = vector.broadcast %38 : vector<1x96xf32> to vector<16x96xf32>
    %40 = arith.addf %36, %39 : vector<16x96xf32>
    %41 = vector.extract_strided_slice %40 {offsets = [0, 0], sizes = [16, 32], strides = [1, 1]} : vector<16x96xf32> to vector<16x32xf32>
    %42 = vector.shape_cast %41 : vector<16x32xf32> to vector<2x8x32xf32>
    %43 = vector.extract_strided_slice %40 {offsets = [0, 32], sizes = [16, 32], strides = [1, 1]} : vector<16x96xf32> to vector<16x32xf32>
    %44 = vector.shape_cast %43 : vector<16x32xf32> to vector<2x8x32xf32>
    %45 = vector.extract_strided_slice %40 {offsets = [0, 64], sizes = [16, 32], strides = [1, 1]} : vector<16x96xf32> to vector<16x32xf32>
    %46 = vector.shape_cast %45 : vector<16x32xf32> to vector<2x8x32xf32>
    %c0_22 = arith.constant 0 : index
    %c0_23 = arith.constant 0 : index
    %c0_24 = arith.constant 0 : index
    %47 = vector.load %arg8[%c0_22, %c0_23, %c0_24] : memref<2x32x32xf32, #tpu.memory_space<vmem>>, vector<1x32x32xf32>
    %48 = vector.shape_cast %47 : vector<1x32x32xf32> to vector<32x32xf32>
    %49 = vector.extract_strided_slice %42 {offsets = [0, 0, 0], sizes = [2, 8, 8], strides = [1, 1, 1]} : vector<2x8x32xf32> to vector<2x8x8xf32>
    %50 = vector.extract_strided_slice %44 {offsets = [0, 0, 0], sizes = [2, 8, 8], strides = [1, 1, 1]} : vector<2x8x32xf32> to vector<2x8x8xf32>
    %51 = vector.extract_strided_slice %46 {offsets = [0, 0, 0], sizes = [2, 8, 8], strides = [1, 1, 1]} : vector<2x8x32xf32> to vector<2x8x8xf32>
    "tpu.trace_start"() <{level = 10 : i32, message = "bqd,bkd->bqk"}> : () -> ()
    %cst_25 = arith.constant dense<0.000000e+00> : vector<2x8x8xf32>
    %52 = tpu.matmul %49, %50, %cst_25 {dimension_numbers = #tpu.dot_dimension_numbers<[2], [2], [1], [1], [0, 0, 0, 1, 1, 1], [0], [0]>} : vector<2x8x8xf32>, vector<2x8x8xf32>, vector<2x8x8xf32> -> vector<2x8x8xf32>
    "tpu.trace_stop"() : () -> ()
    %cst_26 = arith.constant 0.353553385 : f32
    %53 = vector.broadcast %cst_26 : f32 to vector<2x8x8xf32>
    %54 = arith.mulf %52, %53 : vector<2x8x8xf32>
    %cst_27 = arith.constant dense<0xFF800000> : vector<2x8xf32>
    %55 = vector.multi_reduction <maximumf>, %54, %cst_27 [2] : vector<2x8x8xf32> to vector<2x8xf32>
    %56 = vector.shape_cast %55 : vector<2x8xf32> to vector<2x8x1xf32>
    %57 = vector.broadcast %56 : vector<2x8x1xf32> to vector<2x8x8xf32>
    %58 = arith.subf %54, %57 : vector<2x8x8xf32>
    %59 = math.exp %58 : vector<2x8x8xf32>
    %cst_28 = arith.constant dense<0.000000e+00> : vector<2x8xf32>
    %60 = vector.multi_reduction <add>, %59, %cst_28 [2] : vector<2x8x8xf32> to vector<2x8xf32>
    %61 = vector.shape_cast %60 : vector<2x8xf32> to vector<2x8x1xf32>
    %62 = tpu.reciprocal %61 {approx = true} : vector<2x8x1xf32> -> vector<2x8x1xf32>
    %63 = vector.broadcast %62 : vector<2x8x1xf32> to vector<2x8x8xf32>
    %64 = arith.mulf %59, %63 : vector<2x8x8xf32>
    "tpu.trace_start"() <{level = 10 : i32, message = "bqk,bkd->bqd"}> : () -> ()
    %cst_29 = arith.constant dense<0.000000e+00> : vector<2x8x8xf32>
    %65 = tpu.matmul %64, %51, %cst_29 {dimension_numbers = #tpu.dot_dimension_numbers<[2], [1], [1], [2], [0, 0, 0, 1, 1, 2], [0], [0]>} : vector<2x8x8xf32>, vector<2x8x8xf32>, vector<2x8x8xf32> -> vector<2x8x8xf32>
    "tpu.trace_stop"() : () -> ()
    %66 = vector.shape_cast %65 : vector<2x8x8xf32> to vector<16x8xf32>
    %67 = vector.extract_strided_slice %48 {offsets = [0, 0], sizes = [8, 32], strides = [1, 1]} : vector<32x32xf32> to vector<8x32xf32>
    %cst_30 = arith.constant dense<0.000000e+00> : vector<16x32xf32>
    %68 = tpu.matmul %66, %67, %cst_30 {dimension_numbers = #tpu.dot_dimension_numbers<[1], [0], [0], [1], [0, 0, 1, 1], [], []>} : vector<16x8xf32>, vector<8x32xf32>, vector<16x32xf32> -> vector<16x32xf32>
    %69 = vector.extract_strided_slice %42 {offsets = [0, 0, 8], sizes = [2, 8, 8], strides = [1, 1, 1]} : vector<2x8x32xf32> to vector<2x8x8xf32>
    %70 = vector.extract_strided_slice %44 {offsets = [0, 0, 8], sizes = [2, 8, 8], strides = [1, 1, 1]} : vector<2x8x32xf32> to vector<2x8x8xf32>
    %71 = vector.extract_strided_slice %46 {offsets = [0, 0, 8], sizes = [2, 8, 8], strides = [1, 1, 1]} : vector<2x8x32xf32> to vector<2x8x8xf32>
    "tpu.trace_start"() <{level = 10 : i32, message = "bqd,bkd->bqk"}> : () -> ()
    %cst_31 = arith.constant dense<0.000000e+00> : vector<2x8x8xf32>
    %72 = tpu.matmul %69, %70, %cst_31 {dimension_numbers = #tpu.dot_dimension_numbers<[2], [2], [1], [1], [0, 0, 0, 1, 1, 1], [0], [0]>} : vector<2x8x8xf32>, vector<2x8x8xf32>, vector<2x8x8xf32> -> vector<2x8x8xf32>
    "tpu.trace_stop"() : () -> ()
    %cst_32 = arith.constant 0.353553385 : f32
    %73 = vector.broadcast %cst_32 : f32 to vector<2x8x8xf32>
    %74 = arith.mulf %72, %73 : vector<2x8x8xf32>
    %cst_33 = arith.constant dense<0xFF800000> : vector<2x8xf32>
    %75 = vector.multi_reduction <maximumf>, %74, %cst_33 [2] : vector<2x8x8xf32> to vector<2x8xf32>
    %76 = vector.shape_cast %75 : vector<2x8xf32> to vector<2x8x1xf32>
    %77 = vector.broadcast %76 : vector<2x8x1xf32> to vector<2x8x8xf32>
    %78 = arith.subf %74, %77 : vector<2x8x8xf32>
    %79 = math.exp %78 : vector<2x8x8xf32>
    %cst_34 = arith.constant dense<0.000000e+00> : vector<2x8xf32>
    %80 = vector.multi_reduction <add>, %79, %cst_34 [2] : vector<2x8x8xf32> to vector<2x8xf32>
    %81 = vector.shape_cast %80 : vector<2x8xf32> to vector<2x8x1xf32>
    %82 = tpu.reciprocal %81 {approx = true} : vector<2x8x1xf32> -> vector<2x8x1xf32>
    %83 = vector.broadcast %82 : vector<2x8x1xf32> to vector<2x8x8xf32>
    %84 = arith.mulf %79, %83 : vector<2x8x8xf32>
    "tpu.trace_start"() <{level = 10 : i32, message = "bqk,bkd->bqd"}> : () -> ()
    %cst_35 = arith.constant dense<0.000000e+00> : vector<2x8x8xf32>
    %85 = tpu.matmul %84, %71, %cst_35 {dimension_numbers = #tpu.dot_dimension_numbers<[2], [1], [1], [2], [0, 0, 0, 1, 1, 2], [0], [0]>} : vector<2x8x8xf32>, vector<2x8x8xf32>, vector<2x8x8xf32> -> vector<2x8x8xf32>
    "tpu.trace_stop"() : () -> ()
    %86 = vector.shape_cast %85 : vector<2x8x8xf32> to vector<16x8xf32>
    %87 = vector.extract_strided_slice %48 {offsets = [8, 0], sizes = [8, 32], strides = [1, 1]} : vector<32x32xf32> to vector<8x32xf32>
    %cst_36 = arith.constant dense<0.000000e+00> : vector<16x32xf32>
    %88 = tpu.matmul %86, %87, %cst_36 {dimension_numbers = #tpu.dot_dimension_numbers<[1], [0], [0], [1], [0, 0, 1, 1], [], []>} : vector<16x8xf32>, vector<8x32xf32>, vector<16x32xf32> -> vector<16x32xf32>
    %89 = arith.addf %68, %88 : vector<16x32xf32>
    %90 = vector.extract_strided_slice %42 {offsets = [0, 0, 16], sizes = [2, 8, 8], strides = [1, 1, 1]} : vector<2x8x32xf32> to vector<2x8x8xf32>
    %91 = vector.extract_strided_slice %44 {offsets = [0, 0, 16], sizes = [2, 8, 8], strides = [1, 1, 1]} : vector<2x8x32xf32> to vector<2x8x8xf32>
    %92 = vector.extract_strided_slice %46 {offsets = [0, 0, 16], sizes = [2, 8, 8], strides = [1, 1, 1]} : vector<2x8x32xf32> to vector<2x8x8xf32>
    "tpu.trace_start"() <{level = 10 : i32, message = "bqd,bkd->bqk"}> : () -> ()
    %cst_37 = arith.constant dense<0.000000e+00> : vector<2x8x8xf32>
    %93 = tpu.matmul %90, %91, %cst_37 {dimension_numbers = #tpu.dot_dimension_numbers<[2], [2], [1], [1], [0, 0, 0, 1, 1, 1], [0], [0]>} : vector<2x8x8xf32>, vector<2x8x8xf32>, vector<2x8x8xf32> -> vector<2x8x8xf32>
    "tpu.trace_stop"() : () -> ()
    %cst_38 = arith.constant 0.353553385 : f32
    %94 = vector.broadcast %cst_38 : f32 to vector<2x8x8xf32>
    %95 = arith.mulf %93, %94 : vector<2x8x8xf32>
    %cst_39 = arith.constant dense<0xFF800000> : vector<2x8xf32>
    %96 = vector.multi_reduction <maximumf>, %95, %cst_39 [2] : vector<2x8x8xf32> to vector<2x8xf32>
    %97 = vector.shape_cast %96 : vector<2x8xf32> to vector<2x8x1xf32>
    %98 = vector.broadcast %97 : vector<2x8x1xf32> to vector<2x8x8xf32>
    %99 = arith.subf %95, %98 : vector<2x8x8xf32>
    %100 = math.exp %99 : vector<2x8x8xf32>
    %cst_40 = arith.constant dense<0.000000e+00> : vector<2x8xf32>
    %101 = vector.multi_reduction <add>, %100, %cst_40 [2] : vector<2x8x8xf32> to vector<2x8xf32>
    %102 = vector.shape_cast %101 : vector<2x8xf32> to vector<2x8x1xf32>
    %103 = tpu.reciprocal %102 {approx = true} : vector<2x8x1xf32> -> vector<2x8x1xf32>
    %104 = vector.broadcast %103 : vector<2x8x1xf32> to vector<2x8x8xf32>
    %105 = arith.mulf %100, %104 : vector<2x8x8xf32>
    "tpu.trace_start"() <{level = 10 : i32, message = "bqk,bkd->bqd"}> : () -> ()
    %cst_41 = arith.constant dense<0.000000e+00> : vector<2x8x8xf32>
    %106 = tpu.matmul %105, %92, %cst_41 {dimension_numbers = #tpu.dot_dimension_numbers<[2], [1], [1], [2], [0, 0, 0, 1, 1, 2], [0], [0]>} : vector<2x8x8xf32>, vector<2x8x8xf32>, vector<2x8x8xf32> -> vector<2x8x8xf32>
    "tpu.trace_stop"() : () -> ()
    %107 = vector.shape_cast %106 : vector<2x8x8xf32> to vector<16x8xf32>
    %108 = vector.extract_strided_slice %48 {offsets = [16, 0], sizes = [8, 32], strides = [1, 1]} : vector<32x32xf32> to vector<8x32xf32>
    %cst_42 = arith.constant dense<0.000000e+00> : vector<16x32xf32>
    %109 = tpu.matmul %107, %108, %cst_42 {dimension_numbers = #tpu.dot_dimension_numbers<[1], [0], [0], [1], [0, 0, 1, 1], [], []>} : vector<16x8xf32>, vector<8x32xf32>, vector<16x32xf32> -> vector<16x32xf32>
    %110 = arith.addf %89, %109 : vector<16x32xf32>
    %111 = vector.extract_strided_slice %42 {offsets = [0, 0, 24], sizes = [2, 8, 8], strides = [1, 1, 1]} : vector<2x8x32xf32> to vector<2x8x8xf32>
    %112 = vector.extract_strided_slice %44 {offsets = [0, 0, 24], sizes = [2, 8, 8], strides = [1, 1, 1]} : vector<2x8x32xf32> to vector<2x8x8xf32>
    %113 = vector.extract_strided_slice %46 {offsets = [0, 0, 24], sizes = [2, 8, 8], strides = [1, 1, 1]} : vector<2x8x32xf32> to vector<2x8x8xf32>
    "tpu.trace_start"() <{level = 10 : i32, message = "bqd,bkd->bqk"}> : () -> ()
    %cst_43 = arith.constant dense<0.000000e+00> : vector<2x8x8xf32>
    %114 = tpu.matmul %111, %112, %cst_43 {dimension_numbers = #tpu.dot_dimension_numbers<[2], [2], [1], [1], [0, 0, 0, 1, 1, 1], [0], [0]>} : vector<2x8x8xf32>, vector<2x8x8xf32>, vector<2x8x8xf32> -> vector<2x8x8xf32>
    "tpu.trace_stop"() : () -> ()
    %cst_44 = arith.constant 0.353553385 : f32
    %115 = vector.broadcast %cst_44 : f32 to vector<2x8x8xf32>
    %116 = arith.mulf %114, %115 : vector<2x8x8xf32>
    %cst_45 = arith.constant dense<0xFF800000> : vector<2x8xf32>
    %117 = vector.multi_reduction <maximumf>, %116, %cst_45 [2] : vector<2x8x8xf32> to vector<2x8xf32>
    %118 = vector.shape_cast %117 : vector<2x8xf32> to vector<2x8x1xf32>
    %119 = vector.broadcast %118 : vector<2x8x1xf32> to vector<2x8x8xf32>
    %120 = arith.subf %116, %119 : vector<2x8x8xf32>
    %121 = math.exp %120 : vector<2x8x8xf32>
    %cst_46 = arith.constant dense<0.000000e+00> : vector<2x8xf32>
    %122 = vector.multi_reduction <add>, %121, %cst_46 [2] : vector<2x8x8xf32> to vector<2x8xf32>
    %123 = vector.shape_cast %122 : vector<2x8xf32> to vector<2x8x1xf32>
    %124 = tpu.reciprocal %123 {approx = true} : vector<2x8x1xf32> -> vector<2x8x1xf32>
    %125 = vector.broadcast %124 : vector<2x8x1xf32> to vector<2x8x8xf32>
    %126 = arith.mulf %121, %125 : vector<2x8x8xf32>
    "tpu.trace_start"() <{level = 10 : i32, message = "bqk,bkd->bqd"}> : () -> ()
    %cst_47 = arith.constant dense<0.000000e+00> : vector<2x8x8xf32>
    %127 = tpu.matmul %126, %113, %cst_47 {dimension_numbers = #tpu.dot_dimension_numbers<[2], [1], [1], [2], [0, 0, 0, 1, 1, 2], [0], [0]>} : vector<2x8x8xf32>, vector<2x8x8xf32>, vector<2x8x8xf32> -> vector<2x8x8xf32>
    "tpu.trace_stop"() : () -> ()
    %128 = vector.shape_cast %127 : vector<2x8x8xf32> to vector<16x8xf32>
    %129 = vector.extract_strided_slice %48 {offsets = [24, 0], sizes = [8, 32], strides = [1, 1]} : vector<32x32xf32> to vector<8x32xf32>
    %cst_48 = arith.constant dense<0.000000e+00> : vector<16x32xf32>
    %130 = tpu.matmul %128, %129, %cst_48 {dimension_numbers = #tpu.dot_dimension_numbers<[1], [0], [0], [1], [0, 0, 1, 1], [], []>} : vector<16x8xf32>, vector<8x32xf32>, vector<16x32xf32> -> vector<16x32xf32>
    %131 = arith.addf %110, %130 : vector<16x32xf32>
    %c0_49 = arith.constant 0 : index
    %c0_50 = arith.constant 0 : index
    %c0_51 = arith.constant 0 : index
    %132 = vector.load %arg9[%c0_49, %c0_50, %c0_51] : memref<2x1x32xf32, #tpu.memory_space<vmem>>, vector<1x1x32xf32>
    %133 = vector.shape_cast %132 : vector<1x1x32xf32> to vector<1x32xf32>
    %134 = vector.broadcast %133 : vector<1x32xf32> to vector<16x32xf32>
    %135 = arith.addf %131, %134 : vector<16x32xf32>
    %136 = arith.addf %135, %7 : vector<16x32xf32>
    %c0_52 = arith.constant 0 : index
    %c0_53 = arith.constant 0 : index
    %c0_54 = arith.constant 0 : index
    %137 = vector.load %arg5[%c0_52, %c0_53, %c0_54] : memref<2x2x32xf32, #tpu.memory_space<vmem>>, vector<1x2x32xf32>
    %138 = vector.shape_cast %137 : vector<1x2x32xf32> to vector<2x32xf32>
    %139 = vector.extract_strided_slice %138 {offsets = [0, 0], sizes = [1, 32], strides = [1, 1]} : vector<2x32xf32> to vector<1x32xf32>
    %140 = vector.extract_strided_slice %138 {offsets = [1, 0], sizes = [1, 32], strides = [1, 1]} : vector<2x32xf32> to vector<1x32xf32>
    %cst_55 = arith.constant dense<0.000000e+00> : vector<16xf32>
    %141 = vector.multi_reduction <add>, %136, %cst_55 [1] : vector<16x32xf32> to vector<16xf32>
    %142 = vector.shape_cast %141 : vector<16xf32> to vector<16x1xf32>
    %cst_56 = arith.constant 3.200000e+01 : f32
    %143 = vector.broadcast %cst_56 : f32 to vector<16x1xf32>
    %144 = arith.divf %142, %143 : vector<16x1xf32>
    %145 = vector.broadcast %144 : vector<16x1xf32> to vector<16x32xf32>
    %146 = arith.subf %136, %145 : vector<16x32xf32>
    %147 = arith.mulf %146, %146 : vector<16x32xf32>
    %cst_57 = arith.constant dense<0.000000e+00> : vector<16xf32>
    %148 = vector.multi_reduction <add>, %147, %cst_57 [1] : vector<16x32xf32> to vector<16xf32>
    %149 = vector.shape_cast %148 : vector<16xf32> to vector<16x1xf32>
    %cst_58 = arith.constant 3.200000e+01 : f32
    %150 = vector.broadcast %cst_58 : f32 to vector<16x1xf32>
    %151 = arith.divf %149, %150 : vector<16x1xf32>
    %152 = vector.broadcast %144 : vector<16x1xf32> to vector<16x32xf32>
    %153 = arith.subf %136, %152 : vector<16x32xf32>
    %cst_59 = arith.constant 9.99999997E-7 : f32
    %154 = vector.broadcast %cst_59 : f32 to vector<16x1xf32>
    %155 = arith.addf %151, %154 : vector<16x1xf32>
    %156 = math.rsqrt %155 : vector<16x1xf32>
    %157 = vector.broadcast %156 : vector<16x1xf32> to vector<16x32xf32>
    %158 = arith.mulf %153, %157 : vector<16x32xf32>
    %159 = vector.broadcast %139 : vector<1x32xf32> to vector<16x32xf32>
    %160 = arith.mulf %158, %159 : vector<16x32xf32>
    %161 = vector.broadcast %140 : vector<1x32xf32> to vector<16x32xf32>
    %162 = arith.addf %160, %161 : vector<16x32xf32>
    %c0_60 = arith.constant 0 : index
    %c0_61 = arith.constant 0 : index
    %c0_62 = arith.constant 0 : index
    %163 = vector.load %arg10[%c0_60, %c0_61, %c0_62] : memref<2x32x64xf32, #tpu.memory_space<vmem>>, vector<1x32x64xf32>
    %164 = vector.shape_cast %163 : vector<1x32x64xf32> to vector<32x64xf32>
    %cst_63 = arith.constant dense<0.000000e+00> : vector<16x64xf32>
    %165 = tpu.matmul %162, %164, %cst_63 {dimension_numbers = #tpu.dot_dimension_numbers<[1], [0], [0], [1], [0, 0, 1, 1], [], []>} : vector<16x32xf32>, vector<32x64xf32>, vector<16x64xf32> -> vector<16x64xf32>
    %c0_64 = arith.constant 0 : index
    %c0_65 = arith.constant 0 : index
    %c0_66 = arith.constant 0 : index
    %166 = vector.load %arg11[%c0_64, %c0_65, %c0_66] : memref<2x1x64xf32, #tpu.memory_space<vmem>>, vector<1x1x64xf32>
    %167 = vector.shape_cast %166 : vector<1x1x64xf32> to vector<1x64xf32>
    %168 = vector.broadcast %167 : vector<1x64xf32> to vector<16x64xf32>
    %169 = arith.addf %165, %168 : vector<16x64xf32>
    %cst_67 = arith.constant 5.000000e-01 : f32
    %170 = vector.broadcast %cst_67 : f32 to vector<16x64xf32>
    %171 = arith.mulf %170, %169 : vector<16x64xf32>
    %cst_68 = arith.constant 0.707106769 : f32
    %172 = vector.broadcast %cst_68 : f32 to vector<16x64xf32>
    %173 = arith.mulf %169, %172 : vector<16x64xf32>
    %174 = math.erf %173 : vector<16x64xf32>
    %cst_69 = arith.constant 1.000000e+00 : f32
    %175 = vector.broadcast %cst_69 : f32 to vector<16x64xf32>
    %176 = arith.addf %175, %174 : vector<16x64xf32>
    %177 = arith.mulf %171, %176 : vector<16x64xf32>
    %c0_70 = arith.constant 0 : index
    %c0_71 = arith.constant 0 : index
    %c0_72 = arith.constant 0 : index
    %178 = vector.load %arg12[%c0_70, %c0_71, %c0_72] : memref<2x64x32xf32, #tpu.memory_space<vmem>>, vector<1x64x32xf32>
    %179 = vector.shape_cast %178 : vector<1x64x32xf32> to vector<64x32xf32>
    %cst_73 = arith.constant dense<0.000000e+00> : vector<16x32xf32>
    %180 = tpu.matmul %177, %179, %cst_73 {dimension_numbers = #tpu.dot_dimension_numbers<[1], [0], [0], [1], [0, 0, 1, 1], [], []>} : vector<16x64xf32>, vector<64x32xf32>, vector<16x32xf32> -> vector<16x32xf32>
    %c0_74 = arith.constant 0 : index
    %c0_75 = arith.constant 0 : index
    %c0_76 = arith.constant 0 : index
    %181 = vector.load %arg13[%c0_74, %c0_75, %c0_76] : memref<2x1x32xf32, #tpu.memory_space<vmem>>, vector<1x1x32xf32>
    %182 = vector.shape_cast %181 : vector<1x1x32xf32> to vector<1x32xf32>
    %183 = vector.broadcast %182 : vector<1x32xf32> to vector<16x32xf32>
    %184 = arith.addf %180, %183 : vector<16x32xf32>
    %185 = arith.addf %184, %136 : vector<16x32xf32>
    %c1 = arith.constant 1 : index
    %c0_77 = arith.constant 0 : index
    %c0_78 = arith.constant 0 : index
    %186 = vector.load %arg4[%c1, %c0_77, %c0_78] : memref<2x2x32xf32, #tpu.memory_space<vmem>>, vector<1x2x32xf32>
    %187 = vector.shape_cast %186 : vector<1x2x32xf32> to vector<2x32xf32>
    %188 = vector.extract_strided_slice %187 {offsets = [0, 0], sizes = [1, 32], strides = [1, 1]} : vector<2x32xf32> to vector<1x32xf32>
    %189 = vector.extract_strided_slice %187 {offsets = [1, 0], sizes = [1, 32], strides = [1, 1]} : vector<2x32xf32> to vector<1x32xf32>
    %cst_79 = arith.constant dense<0.000000e+00> : vector<16xf32>
    %190 = vector.multi_reduction <add>, %185, %cst_79 [1] : vector<16x32xf32> to vector<16xf32>
    %191 = vector.shape_cast %190 : vector<16xf32> to vector<16x1xf32>
    %cst_80 = arith.constant 3.200000e+01 : f32
    %192 = vector.broadcast %cst_80 : f32 to vector<16x1xf32>
    %193 = arith.divf %191, %192 : vector<16x1xf32>
    %194 = vector.broadcast %193 : vector<16x1xf32> to vector<16x32xf32>
    %195 = arith.subf %185, %194 : vector<16x32xf32>
    %196 = arith.mulf %195, %195 : vector<16x32xf32>
    %cst_81 = arith.constant dense<0.000000e+00> : vector<16xf32>
    %197 = vector.multi_reduction <add>, %196, %cst_81 [1] : vector<16x32xf32> to vector<16xf32>
    %198 = vector.shape_cast %197 : vector<16xf32> to vector<16x1xf32>
    %cst_82 = arith.constant 3.200000e+01 : f32
    %199 = vector.broadcast %cst_82 : f32 to vector<16x1xf32>
    %200 = arith.divf %198, %199 : vector<16x1xf32>
    %201 = vector.broadcast %193 : vector<16x1xf32> to vector<16x32xf32>
    %202 = arith.subf %185, %201 : vector<16x32xf32>
    %cst_83 = arith.constant 9.99999997E-7 : f32
    %203 = vector.broadcast %cst_83 : f32 to vector<16x1xf32>
    %204 = arith.addf %200, %203 : vector<16x1xf32>
    %205 = math.rsqrt %204 : vector<16x1xf32>
    %206 = vector.broadcast %205 : vector<16x1xf32> to vector<16x32xf32>
    %207 = arith.mulf %202, %206 : vector<16x32xf32>
    %208 = vector.broadcast %188 : vector<1x32xf32> to vector<16x32xf32>
    %209 = arith.mulf %207, %208 : vector<16x32xf32>
    %210 = vector.broadcast %189 : vector<1x32xf32> to vector<16x32xf32>
    %211 = arith.addf %209, %210 : vector<16x32xf32>
    %c1_84 = arith.constant 1 : index
    %c0_85 = arith.constant 0 : index
    %c0_86 = arith.constant 0 : index
    %212 = vector.load %arg6[%c1_84, %c0_85, %c0_86] : memref<2x32x96xf32, #tpu.memory_space<vmem>>, vector<1x32x96xf32>
    %213 = vector.shape_cast %212 : vector<1x32x96xf32> to vector<32x96xf32>
    %cst_87 = arith.constant dense<0.000000e+00> : vector<16x96xf32>
    %214 = tpu.matmul %211, %213, %cst_87 {dimension_numbers = #tpu.dot_dimension_numbers<[1], [0], [0], [1], [0, 0, 1, 1], [], []>} : vector<16x32xf32>, vector<32x96xf32>, vector<16x96xf32> -> vector<16x96xf32>
    %c1_88 = arith.constant 1 : index
    %c0_89 = arith.constant 0 : index
    %c0_90 = arith.constant 0 : index
    %215 = vector.load %arg7[%c1_88, %c0_89, %c0_90] : memref<2x1x96xf32, #tpu.memory_space<vmem>>, vector<1x1x96xf32>
    %216 = vector.shape_cast %215 : vector<1x1x96xf32> to vector<1x96xf32>
    %217 = vector.broadcast %216 : vector<1x96xf32> to vector<16x96xf32>
    %218 = arith.addf %214, %217 : vector<16x96xf32>
    %219 = vector.extract_strided_slice %218 {offsets = [0, 0], sizes = [16, 32], strides = [1, 1]} : vector<16x96xf32> to vector<16x32xf32>
    %220 = vector.shape_cast %219 : vector<16x32xf32> to vector<2x8x32xf32>
    %221 = vector.extract_strided_slice %218 {offsets = [0, 32], sizes = [16, 32], strides = [1, 1]} : vector<16x96xf32> to vector<16x32xf32>
    %222 = vector.shape_cast %221 : vector<16x32xf32> to vector<2x8x32xf32>
    %223 = vector.extract_strided_slice %218 {offsets = [0, 64], sizes = [16, 32], strides = [1, 1]} : vector<16x96xf32> to vector<16x32xf32>
    %224 = vector.shape_cast %223 : vector<16x32xf32> to vector<2x8x32xf32>
    %c1_91 = arith.constant 1 : index
    %c0_92 = arith.constant 0 : index
    %c0_93 = arith.constant 0 : index
    %225 = vector.load %arg8[%c1_91, %c0_92, %c0_93] : memref<2x32x32xf32, #tpu.memory_space<vmem>>, vector<1x32x32xf32>
    %226 = vector.shape_cast %225 : vector<1x32x32xf32> to vector<32x32xf32>
    %227 = vector.extract_strided_slice %220 {offsets = [0, 0, 0], sizes = [2, 8, 8], strides = [1, 1, 1]} : vector<2x8x32xf32> to vector<2x8x8xf32>
    %228 = vector.extract_strided_slice %222 {offsets = [0, 0, 0], sizes = [2, 8, 8], strides = [1, 1, 1]} : vector<2x8x32xf32> to vector<2x8x8xf32>
    %229 = vector.extract_strided_slice %224 {offsets = [0, 0, 0], sizes = [2, 8, 8], strides = [1, 1, 1]} : vector<2x8x32xf32> to vector<2x8x8xf32>
    "tpu.trace_start"() <{level = 10 : i32, message = "bqd,bkd->bqk"}> : () -> ()
    %cst_94 = arith.constant dense<0.000000e+00> : vector<2x8x8xf32>
    %230 = tpu.matmul %227, %228, %cst_94 {dimension_numbers = #tpu.dot_dimension_numbers<[2], [2], [1], [1], [0, 0, 0, 1, 1, 1], [0], [0]>} : vector<2x8x8xf32>, vector<2x8x8xf32>, vector<2x8x8xf32> -> vector<2x8x8xf32>
    "tpu.trace_stop"() : () -> ()
    %cst_95 = arith.constant 0.353553385 : f32
    %231 = vector.broadcast %cst_95 : f32 to vector<2x8x8xf32>
    %232 = arith.mulf %230, %231 : vector<2x8x8xf32>
    %cst_96 = arith.constant dense<0xFF800000> : vector<2x8xf32>
    %233 = vector.multi_reduction <maximumf>, %232, %cst_96 [2] : vector<2x8x8xf32> to vector<2x8xf32>
    %234 = vector.shape_cast %233 : vector<2x8xf32> to vector<2x8x1xf32>
    %235 = vector.broadcast %234 : vector<2x8x1xf32> to vector<2x8x8xf32>
    %236 = arith.subf %232, %235 : vector<2x8x8xf32>
    %237 = math.exp %236 : vector<2x8x8xf32>
    %cst_97 = arith.constant dense<0.000000e+00> : vector<2x8xf32>
    %238 = vector.multi_reduction <add>, %237, %cst_97 [2] : vector<2x8x8xf32> to vector<2x8xf32>
    %239 = vector.shape_cast %238 : vector<2x8xf32> to vector<2x8x1xf32>
    %240 = tpu.reciprocal %239 {approx = true} : vector<2x8x1xf32> -> vector<2x8x1xf32>
    %241 = vector.broadcast %240 : vector<2x8x1xf32> to vector<2x8x8xf32>
    %242 = arith.mulf %237, %241 : vector<2x8x8xf32>
    "tpu.trace_start"() <{level = 10 : i32, message = "bqk,bkd->bqd"}> : () -> ()
    %cst_98 = arith.constant dense<0.000000e+00> : vector<2x8x8xf32>
    %243 = tpu.matmul %242, %229, %cst_98 {dimension_numbers = #tpu.dot_dimension_numbers<[2], [1], [1], [2], [0, 0, 0, 1, 1, 2], [0], [0]>} : vector<2x8x8xf32>, vector<2x8x8xf32>, vector<2x8x8xf32> -> vector<2x8x8xf32>
    "tpu.trace_stop"() : () -> ()
    %244 = vector.shape_cast %243 : vector<2x8x8xf32> to vector<16x8xf32>
    %245 = vector.extract_strided_slice %226 {offsets = [0, 0], sizes = [8, 32], strides = [1, 1]} : vector<32x32xf32> to vector<8x32xf32>
    %cst_99 = arith.constant dense<0.000000e+00> : vector<16x32xf32>
    %246 = tpu.matmul %244, %245, %cst_99 {dimension_numbers = #tpu.dot_dimension_numbers<[1], [0], [0], [1], [0, 0, 1, 1], [], []>} : vector<16x8xf32>, vector<8x32xf32>, vector<16x32xf32> -> vector<16x32xf32>
    %247 = vector.extract_strided_slice %220 {offsets = [0, 0, 8], sizes = [2, 8, 8], strides = [1, 1, 1]} : vector<2x8x32xf32> to vector<2x8x8xf32>
    %248 = vector.extract_strided_slice %222 {offsets = [0, 0, 8], sizes = [2, 8, 8], strides = [1, 1, 1]} : vector<2x8x32xf32> to vector<2x8x8xf32>
    %249 = vector.extract_strided_slice %224 {offsets = [0, 0, 8], sizes = [2, 8, 8], strides = [1, 1, 1]} : vector<2x8x32xf32> to vector<2x8x8xf32>
    "tpu.trace_start"() <{level = 10 : i32, message = "bqd,bkd->bqk"}> : () -> ()
    %cst_100 = arith.constant dense<0.000000e+00> : vector<2x8x8xf32>
    %250 = tpu.matmul %247, %248, %cst_100 {dimension_numbers = #tpu.dot_dimension_numbers<[2], [2], [1], [1], [0, 0, 0, 1, 1, 1], [0], [0]>} : vector<2x8x8xf32>, vector<2x8x8xf32>, vector<2x8x8xf32> -> vector<2x8x8xf32>
    "tpu.trace_stop"() : () -> ()
    %cst_101 = arith.constant 0.353553385 : f32
    %251 = vector.broadcast %cst_101 : f32 to vector<2x8x8xf32>
    %252 = arith.mulf %250, %251 : vector<2x8x8xf32>
    %cst_102 = arith.constant dense<0xFF800000> : vector<2x8xf32>
    %253 = vector.multi_reduction <maximumf>, %252, %cst_102 [2] : vector<2x8x8xf32> to vector<2x8xf32>
    %254 = vector.shape_cast %253 : vector<2x8xf32> to vector<2x8x1xf32>
    %255 = vector.broadcast %254 : vector<2x8x1xf32> to vector<2x8x8xf32>
    %256 = arith.subf %252, %255 : vector<2x8x8xf32>
    %257 = math.exp %256 : vector<2x8x8xf32>
    %cst_103 = arith.constant dense<0.000000e+00> : vector<2x8xf32>
    %258 = vector.multi_reduction <add>, %257, %cst_103 [2] : vector<2x8x8xf32> to vector<2x8xf32>
    %259 = vector.shape_cast %258 : vector<2x8xf32> to vector<2x8x1xf32>
    %260 = tpu.reciprocal %259 {approx = true} : vector<2x8x1xf32> -> vector<2x8x1xf32>
    %261 = vector.broadcast %260 : vector<2x8x1xf32> to vector<2x8x8xf32>
    %262 = arith.mulf %257, %261 : vector<2x8x8xf32>
    "tpu.trace_start"() <{level = 10 : i32, message = "bqk,bkd->bqd"}> : () -> ()
    %cst_104 = arith.constant dense<0.000000e+00> : vector<2x8x8xf32>
    %263 = tpu.matmul %262, %249, %cst_104 {dimension_numbers = #tpu.dot_dimension_numbers<[2], [1], [1], [2], [0, 0, 0, 1, 1, 2], [0], [0]>} : vector<2x8x8xf32>, vector<2x8x8xf32>, vector<2x8x8xf32> -> vector<2x8x8xf32>
    "tpu.trace_stop"() : () -> ()
    %264 = vector.shape_cast %263 : vector<2x8x8xf32> to vector<16x8xf32>
    %265 = vector.extract_strided_slice %226 {offsets = [8, 0], sizes = [8, 32], strides = [1, 1]} : vector<32x32xf32> to vector<8x32xf32>
    %cst_105 = arith.constant dense<0.000000e+00> : vector<16x32xf32>
    %266 = tpu.matmul %264, %265, %cst_105 {dimension_numbers = #tpu.dot_dimension_numbers<[1], [0], [0], [1], [0, 0, 1, 1], [], []>} : vector<16x8xf32>, vector<8x32xf32>, vector<16x32xf32> -> vector<16x32xf32>
    %267 = arith.addf %246, %266 : vector<16x32xf32>
    %268 = vector.extract_strided_slice %220 {offsets = [0, 0, 16], sizes = [2, 8, 8], strides = [1, 1, 1]} : vector<2x8x32xf32> to vector<2x8x8xf32>
    %269 = vector.extract_strided_slice %222 {offsets = [0, 0, 16], sizes = [2, 8, 8], strides = [1, 1, 1]} : vector<2x8x32xf32> to vector<2x8x8xf32>
    %270 = vector.extract_strided_slice %224 {offsets = [0, 0, 16], sizes = [2, 8, 8], strides = [1, 1, 1]} : vector<2x8x32xf32> to vector<2x8x8xf32>
    "tpu.trace_start"() <{level = 10 : i32, message = "bqd,bkd->bqk"}> : () -> ()
    %cst_106 = arith.constant dense<0.000000e+00> : vector<2x8x8xf32>
    %271 = tpu.matmul %268, %269, %cst_106 {dimension_numbers = #tpu.dot_dimension_numbers<[2], [2], [1], [1], [0, 0, 0, 1, 1, 1], [0], [0]>} : vector<2x8x8xf32>, vector<2x8x8xf32>, vector<2x8x8xf32> -> vector<2x8x8xf32>
    "tpu.trace_stop"() : () -> ()
    %cst_107 = arith.constant 0.353553385 : f32
    %272 = vector.broadcast %cst_107 : f32 to vector<2x8x8xf32>
    %273 = arith.mulf %271, %272 : vector<2x8x8xf32>
    %cst_108 = arith.constant dense<0xFF800000> : vector<2x8xf32>
    %274 = vector.multi_reduction <maximumf>, %273, %cst_108 [2] : vector<2x8x8xf32> to vector<2x8xf32>
    %275 = vector.shape_cast %274 : vector<2x8xf32> to vector<2x8x1xf32>
    %276 = vector.broadcast %275 : vector<2x8x1xf32> to vector<2x8x8xf32>
    %277 = arith.subf %273, %276 : vector<2x8x8xf32>
    %278 = math.exp %277 : vector<2x8x8xf32>
    %cst_109 = arith.constant dense<0.000000e+00> : vector<2x8xf32>
    %279 = vector.multi_reduction <add>, %278, %cst_109 [2] : vector<2x8x8xf32> to vector<2x8xf32>
    %280 = vector.shape_cast %279 : vector<2x8xf32> to vector<2x8x1xf32>
    %281 = tpu.reciprocal %280 {approx = true} : vector<2x8x1xf32> -> vector<2x8x1xf32>
    %282 = vector.broadcast %281 : vector<2x8x1xf32> to vector<2x8x8xf32>
    %283 = arith.mulf %278, %282 : vector<2x8x8xf32>
    "tpu.trace_start"() <{level = 10 : i32, message = "bqk,bkd->bqd"}> : () -> ()
    %cst_110 = arith.constant dense<0.000000e+00> : vector<2x8x8xf32>
    %284 = tpu.matmul %283, %270, %cst_110 {dimension_numbers = #tpu.dot_dimension_numbers<[2], [1], [1], [2], [0, 0, 0, 1, 1, 2], [0], [0]>} : vector<2x8x8xf32>, vector<2x8x8xf32>, vector<2x8x8xf32> -> vector<2x8x8xf32>
    "tpu.trace_stop"() : () -> ()
    %285 = vector.shape_cast %284 : vector<2x8x8xf32> to vector<16x8xf32>
    %286 = vector.extract_strided_slice %226 {offsets = [16, 0], sizes = [8, 32], strides = [1, 1]} : vector<32x32xf32> to vector<8x32xf32>
    %cst_111 = arith.constant dense<0.000000e+00> : vector<16x32xf32>
    %287 = tpu.matmul %285, %286, %cst_111 {dimension_numbers = #tpu.dot_dimension_numbers<[1], [0], [0], [1], [0, 0, 1, 1], [], []>} : vector<16x8xf32>, vector<8x32xf32>, vector<16x32xf32> -> vector<16x32xf32>
    %288 = arith.addf %267, %287 : vector<16x32xf32>
    %289 = vector.extract_strided_slice %220 {offsets = [0, 0, 24], sizes = [2, 8, 8], strides = [1, 1, 1]} : vector<2x8x32xf32> to vector<2x8x8xf32>
    %290 = vector.extract_strided_slice %222 {offsets = [0, 0, 24], sizes = [2, 8, 8], strides = [1, 1, 1]} : vector<2x8x32xf32> to vector<2x8x8xf32>
    %291 = vector.extract_strided_slice %224 {offsets = [0, 0, 24], sizes = [2, 8, 8], strides = [1, 1, 1]} : vector<2x8x32xf32> to vector<2x8x8xf32>
    "tpu.trace_start"() <{level = 10 : i32, message = "bqd,bkd->bqk"}> : () -> ()
    %cst_112 = arith.constant dense<0.000000e+00> : vector<2x8x8xf32>
    %292 = tpu.matmul %289, %290, %cst_112 {dimension_numbers = #tpu.dot_dimension_numbers<[2], [2], [1], [1], [0, 0, 0, 1, 1, 1], [0], [0]>} : vector<2x8x8xf32>, vector<2x8x8xf32>, vector<2x8x8xf32> -> vector<2x8x8xf32>
    "tpu.trace_stop"() : () -> ()
    %cst_113 = arith.constant 0.353553385 : f32
    %293 = vector.broadcast %cst_113 : f32 to vector<2x8x8xf32>
    %294 = arith.mulf %292, %293 : vector<2x8x8xf32>
    %cst_114 = arith.constant dense<0xFF800000> : vector<2x8xf32>
    %295 = vector.multi_reduction <maximumf>, %294, %cst_114 [2] : vector<2x8x8xf32> to vector<2x8xf32>
    %296 = vector.shape_cast %295 : vector<2x8xf32> to vector<2x8x1xf32>
    %297 = vector.broadcast %296 : vector<2x8x1xf32> to vector<2x8x8xf32>
    %298 = arith.subf %294, %297 : vector<2x8x8xf32>
    %299 = math.exp %298 : vector<2x8x8xf32>
    %cst_115 = arith.constant dense<0.000000e+00> : vector<2x8xf32>
    %300 = vector.multi_reduction <add>, %299, %cst_115 [2] : vector<2x8x8xf32> to vector<2x8xf32>
    %301 = vector.shape_cast %300 : vector<2x8xf32> to vector<2x8x1xf32>
    %302 = tpu.reciprocal %301 {approx = true} : vector<2x8x1xf32> -> vector<2x8x1xf32>
    %303 = vector.broadcast %302 : vector<2x8x1xf32> to vector<2x8x8xf32>
    %304 = arith.mulf %299, %303 : vector<2x8x8xf32>
    "tpu.trace_start"() <{level = 10 : i32, message = "bqk,bkd->bqd"}> : () -> ()
    %cst_116 = arith.constant dense<0.000000e+00> : vector<2x8x8xf32>
    %305 = tpu.matmul %304, %291, %cst_116 {dimension_numbers = #tpu.dot_dimension_numbers<[2], [1], [1], [2], [0, 0, 0, 1, 1, 2], [0], [0]>} : vector<2x8x8xf32>, vector<2x8x8xf32>, vector<2x8x8xf32> -> vector<2x8x8xf32>
    "tpu.trace_stop"() : () -> ()
    %306 = vector.shape_cast %305 : vector<2x8x8xf32> to vector<16x8xf32>
    %307 = vector.extract_strided_slice %226 {offsets = [24, 0], sizes = [8, 32], strides = [1, 1]} : vector<32x32xf32> to vector<8x32xf32>
    %cst_117 = arith.constant dense<0.000000e+00> : vector<16x32xf32>
    %308 = tpu.matmul %306, %307, %cst_117 {dimension_numbers = #tpu.dot_dimension_numbers<[1], [0], [0], [1], [0, 0, 1, 1], [], []>} : vector<16x8xf32>, vector<8x32xf32>, vector<16x32xf32> -> vector<16x32xf32>
    %309 = arith.addf %288, %308 : vector<16x32xf32>
    %c1_118 = arith.constant 1 : index
    %c0_119 = arith.constant 0 : index
    %c0_120 = arith.constant 0 : index
    %310 = vector.load %arg9[%c1_118, %c0_119, %c0_120] : memref<2x1x32xf32, #tpu.memory_space<vmem>>, vector<1x1x32xf32>
    %311 = vector.shape_cast %310 : vector<1x1x32xf32> to vector<1x32xf32>
    %312 = vector.broadcast %311 : vector<1x32xf32> to vector<16x32xf32>
    %313 = arith.addf %309, %312 : vector<16x32xf32>
    %314 = arith.addf %313, %185 : vector<16x32xf32>
    %c1_121 = arith.constant 1 : index
    %c0_122 = arith.constant 0 : index
    %c0_123 = arith.constant 0 : index
    %315 = vector.load %arg5[%c1_121, %c0_122, %c0_123] : memref<2x2x32xf32, #tpu.memory_space<vmem>>, vector<1x2x32xf32>
    %316 = vector.shape_cast %315 : vector<1x2x32xf32> to vector<2x32xf32>
    %317 = vector.extract_strided_slice %316 {offsets = [0, 0], sizes = [1, 32], strides = [1, 1]} : vector<2x32xf32> to vector<1x32xf32>
    %318 = vector.extract_strided_slice %316 {offsets = [1, 0], sizes = [1, 32], strides = [1, 1]} : vector<2x32xf32> to vector<1x32xf32>
    %cst_124 = arith.constant dense<0.000000e+00> : vector<16xf32>
    %319 = vector.multi_reduction <add>, %314, %cst_124 [1] : vector<16x32xf32> to vector<16xf32>
    %320 = vector.shape_cast %319 : vector<16xf32> to vector<16x1xf32>
    %cst_125 = arith.constant 3.200000e+01 : f32
    %321 = vector.broadcast %cst_125 : f32 to vector<16x1xf32>
    %322 = arith.divf %320, %321 : vector<16x1xf32>
    %323 = vector.broadcast %322 : vector<16x1xf32> to vector<16x32xf32>
    %324 = arith.subf %314, %323 : vector<16x32xf32>
    %325 = arith.mulf %324, %324 : vector<16x32xf32>
    %cst_126 = arith.constant dense<0.000000e+00> : vector<16xf32>
    %326 = vector.multi_reduction <add>, %325, %cst_126 [1] : vector<16x32xf32> to vector<16xf32>
    %327 = vector.shape_cast %326 : vector<16xf32> to vector<16x1xf32>
    %cst_127 = arith.constant 3.200000e+01 : f32
    %328 = vector.broadcast %cst_127 : f32 to vector<16x1xf32>
    %329 = arith.divf %327, %328 : vector<16x1xf32>
    %330 = vector.broadcast %322 : vector<16x1xf32> to vector<16x32xf32>
    %331 = arith.subf %314, %330 : vector<16x32xf32>
    %cst_128 = arith.constant 9.99999997E-7 : f32
    %332 = vector.broadcast %cst_128 : f32 to vector<16x1xf32>
    %333 = arith.addf %329, %332 : vector<16x1xf32>
    %334 = math.rsqrt %333 : vector<16x1xf32>
    %335 = vector.broadcast %334 : vector<16x1xf32> to vector<16x32xf32>
    %336 = arith.mulf %331, %335 : vector<16x32xf32>
    %337 = vector.broadcast %317 : vector<1x32xf32> to vector<16x32xf32>
    %338 = arith.mulf %336, %337 : vector<16x32xf32>
    %339 = vector.broadcast %318 : vector<1x32xf32> to vector<16x32xf32>
    %340 = arith.addf %338, %339 : vector<16x32xf32>
    %c1_129 = arith.constant 1 : index
    %c0_130 = arith.constant 0 : index
    %c0_131 = arith.constant 0 : index
    %341 = vector.load %arg10[%c1_129, %c0_130, %c0_131] : memref<2x32x64xf32, #tpu.memory_space<vmem>>, vector<1x32x64xf32>
    %342 = vector.shape_cast %341 : vector<1x32x64xf32> to vector<32x64xf32>
    %cst_132 = arith.constant dense<0.000000e+00> : vector<16x64xf32>
    %343 = tpu.matmul %340, %342, %cst_132 {dimension_numbers = #tpu.dot_dimension_numbers<[1], [0], [0], [1], [0, 0, 1, 1], [], []>} : vector<16x32xf32>, vector<32x64xf32>, vector<16x64xf32> -> vector<16x64xf32>
    %c1_133 = arith.constant 1 : index
    %c0_134 = arith.constant 0 : index
    %c0_135 = arith.constant 0 : index
    %344 = vector.load %arg11[%c1_133, %c0_134, %c0_135] : memref<2x1x64xf32, #tpu.memory_space<vmem>>, vector<1x1x64xf32>
    %345 = vector.shape_cast %344 : vector<1x1x64xf32> to vector<1x64xf32>
    %346 = vector.broadcast %345 : vector<1x64xf32> to vector<16x64xf32>
    %347 = arith.addf %343, %346 : vector<16x64xf32>
    %cst_136 = arith.constant 5.000000e-01 : f32
    %348 = vector.broadcast %cst_136 : f32 to vector<16x64xf32>
    %349 = arith.mulf %348, %347 : vector<16x64xf32>
    %cst_137 = arith.constant 0.707106769 : f32
    %350 = vector.broadcast %cst_137 : f32 to vector<16x64xf32>
    %351 = arith.mulf %347, %350 : vector<16x64xf32>
    %352 = math.erf %351 : vector<16x64xf32>
    %cst_138 = arith.constant 1.000000e+00 : f32
    %353 = vector.broadcast %cst_138 : f32 to vector<16x64xf32>
    %354 = arith.addf %353, %352 : vector<16x64xf32>
    %355 = arith.mulf %349, %354 : vector<16x64xf32>
    %c1_139 = arith.constant 1 : index
    %c0_140 = arith.constant 0 : index
    %c0_141 = arith.constant 0 : index
    %356 = vector.load %arg12[%c1_139, %c0_140, %c0_141] : memref<2x64x32xf32, #tpu.memory_space<vmem>>, vector<1x64x32xf32>
    %357 = vector.shape_cast %356 : vector<1x64x32xf32> to vector<64x32xf32>
    %cst_142 = arith.constant dense<0.000000e+00> : vector<16x32xf32>
    %358 = tpu.matmul %355, %357, %cst_142 {dimension_numbers = #tpu.dot_dimension_numbers<[1], [0], [0], [1], [0, 0, 1, 1], [], []>} : vector<16x64xf32>, vector<64x32xf32>, vector<16x32xf32> -> vector<16x32xf32>
    %c1_143 = arith.constant 1 : index
    %c0_144 = arith.constant 0 : index
    %c0_145 = arith.constant 0 : index
    %359 = vector.load %arg13[%c1_143, %c0_144, %c0_145] : memref<2x1x32xf32, #tpu.memory_space<vmem>>, vector<1x1x32xf32>
    %360 = vector.shape_cast %359 : vector<1x1x32xf32> to vector<1x32xf32>
    %361 = vector.broadcast %360 : vector<1x32xf32> to vector<16x32xf32>
    %362 = arith.addf %358, %361 : vector<16x32xf32>
    %363 = arith.addf %362, %314 : vector<16x32xf32>
    %c0_146 = arith.constant 0 : index
    %c0_147 = arith.constant 0 : index
    %364 = vector.load %arg14[%c0_146, %c0_147] : memref<2x32xf32, #tpu.memory_space<vmem>>, vector<2x32xf32>
    %365 = vector.extract_strided_slice %364 {offsets = [0, 0], sizes = [1, 32], strides = [1, 1]} : vector<2x32xf32> to vector<1x32xf32>
    %366 = vector.extract_strided_slice %364 {offsets = [1, 0], sizes = [1, 32], strides = [1, 1]} : vector<2x32xf32> to vector<1x32xf32>
    %cst_148 = arith.constant dense<0.000000e+00> : vector<16xf32>
    %367 = vector.multi_reduction <add>, %363, %cst_148 [1] : vector<16x32xf32> to vector<16xf32>
    %368 = vector.shape_cast %367 : vector<16xf32> to vector<16x1xf32>
    %cst_149 = arith.constant 3.200000e+01 : f32
    %369 = vector.broadcast %cst_149 : f32 to vector<16x1xf32>
    %370 = arith.divf %368, %369 : vector<16x1xf32>
    %371 = vector.broadcast %370 : vector<16x1xf32> to vector<16x32xf32>
    %372 = arith.subf %363, %371 : vector<16x32xf32>
    %373 = arith.mulf %372, %372 : vector<16x32xf32>
    %cst_150 = arith.constant dense<0.000000e+00> : vector<16xf32>
    %374 = vector.multi_reduction <add>, %373, %cst_150 [1] : vector<16x32xf32> to vector<16xf32>
    %375 = vector.shape_cast %374 : vector<16xf32> to vector<16x1xf32>
    %cst_151 = arith.constant 3.200000e+01 : f32
    %376 = vector.broadcast %cst_151 : f32 to vector<16x1xf32>
    %377 = arith.divf %375, %376 : vector<16x1xf32>
    %378 = vector.broadcast %370 : vector<16x1xf32> to vector<16x32xf32>
    %379 = arith.subf %363, %378 : vector<16x32xf32>
    %cst_152 = arith.constant 9.99999997E-7 : f32
    %380 = vector.broadcast %cst_152 : f32 to vector<16x1xf32>
    %381 = arith.addf %377, %380 : vector<16x1xf32>
    %382 = math.rsqrt %381 : vector<16x1xf32>
    %383 = vector.broadcast %382 : vector<16x1xf32> to vector<16x32xf32>
    %384 = arith.mulf %379, %383 : vector<16x32xf32>
    %385 = vector.broadcast %365 : vector<1x32xf32> to vector<16x32xf32>
    %386 = arith.mulf %384, %385 : vector<16x32xf32>
    %387 = vector.broadcast %366 : vector<1x32xf32> to vector<16x32xf32>
    %388 = arith.addf %386, %387 : vector<16x32xf32>
    %c0_153 = arith.constant 0 : index
    %c0_154 = arith.constant 0 : index
    %389 = vector.load %arg15[%c0_153, %c0_154] : memref<16x32xf32, #tpu.memory_space<vmem>>, vector<16x32xf32>
    tpu.vector_store %arg15[%c0_153, %c0_154], %388 {strides = array<i32>} : memref<16x32xf32, #tpu.memory_space<vmem>>, vector<16x32xf32>,
    return
  }
}

</mosaic_0001>

<bundles_post_ra>
// kernel: transformer_forward.7
= control target key start
LH: loop header
LB: loop body
LE: loop exit
PB: predicated region body
PF: predicated region fallthrough
CT: control target
= control target key end

     0   :  { %s990_s12 = smov 0   ;;  %s992_s13 = smov 0   ;;  %s1282_s0 = inlined_call_operand.vmem [shape: f32[2,54,4096], index: 0, kind: input, shape index: {}]   ;;  %s1283_s1 = inlined_call_operand.vmem [shape: f32[4,54], index: 1, kind: input, shape index: {}]   ;;  %s1284_s2 = inlined_call_operand.vmem [shape: f32[4,1], index: 2, kind: input, shape index: {}]   ;;  %s1285_s3 = inlined_call_operand.vmem [shape: f32[2,4,4096], index: 3, kind: output, shape index: {}]  }
   0x1   :  { %s994_s14 = smov 0   ;;  %s996_s15 = smov 0  }
   0x2   :  { %s998_s16 = smov 0   ;;  %s1000_s17 = smov 0  }
   0x3   :  { %s1002_s18 = smov 0  }
   0x4 LB: > { %s22_s19 = sadd.s32 1, %s958_s16  ;;  %s25_s20 = sadd.s32 1, %s962_s17  ;;  %s966_s18 = sphi %s1002_s18, %s13_s18   ;;  %s962_s17 = sphi %s1000_s17, %s1291_s17   ;;  %s958_s16 = sphi %s998_s16, %s1290_s16   ;;  %s954_s15 = sphi %s996_s15, %s1289_s15   ;;  %s950_s14 = sphi %s994_s14, %s1288_s14   ;;  %s946_s13 = sphi %s992_s13, %s1287_s13   ;;  %s942_s12 = sphi %s990_s12, %s1286_s12  }
   0x5   : > { %p23_p0 = scmp.ge.s32.totalorder %s22_s19, 4  ;;  %p41_p1 = scmp.ne.s32.totalorder %s946_s13, %s942_s12 }
   0x6   : > { %p42_p2 = scmp.eq.s32.totalorder %s966_s18, 0  ;;  %s34_s24 = sadd.s32 1, %s946_s13 }
   0x7   : > { %s1293_s19 = smov (%p23_p0, %s22_s19), 0  ;;  %s1295_s20 = smov (!%p23_p0, %s25_s20), %s962_s17 }
   0x8   : > { %p43_p3 = por %p42_p2, %p41_p1  ;;  %p27_p4 = scmp.ge.s32.totalorder %s1295_s20, 2 }
   0x9   : > { %s30_s21 = ssub.s32 %s958_s16, %s1293_s19  ;;  %p829_p6 = scmp.ge.s32.totalorder %s966_s18, 8 }
   0xa   : > { %s1297_s20 = smov (%p27_p4, %s1295_s20), 0 }
   0xb   : > { %s29_s22 = ssub.s32 %s962_s17, %s1297_s20  ;;  %143 = sbr.rel (%p829_p6) target bundleno = 52 (0x34), region = 24 }
   0xc   : > { %s31_s23 = sor.u32 %s30_s21, %s29_s22 }
   0xd   : > { %p32_p5 = scmp.eq.s32.totalorder %s31_s23, 0 }
   0xf   : > { %s1041_s25 = scalar_select %p32_p5, %s946_s13, %s34_s24  }
  0x10   : > { %146 = sbr.rel (!%p43_p3) target bundleno = 52 (0x34), region = 28  ;;  %s148_s26 = sand.u32 (%p43_p3), 1, %s946_s13  }
  0x11   : > { %s850_s27 = smul.u32 (%p43_p3), 448, %s148_s26  ;;  %s830_s28 = sshll.u32 (%p43_p3), %s958_s16, 3 }
  0x12   : > { %s851_s29 = smul.u32 (%p43_p3), 224, %s962_s17 }
  0x13   : > { %s1055_s8 = scalar_lea.vmem (%p43_p3), [#allocation2], %s850_s27 }
  0x14   : > { %s153_s30 = sadd.s32 (%p43_p3), %s851_s29, %s830_s28 }
  0x15   : > { %s831_s4 = sshll.u32 %s153_s30, 3 }
  0x16   : > { %s1050_s7 = scalar_lea.vmem %s1282_s0, %s831_s4 }
  0x17   : > { %v168_v0 = vld [vmem:[%s1050_s7] sm:$0xff]  ;;  %v170_v1 = vld [vmem:[%s1050_s7 + $0x8] sm:$0xff]  ;;  %v172_v2 = vld [vmem:[%s1050_s7 + $0x10] sm:$0xff] }
  0x18   : > { %169 = vst [vmem:[%s1055_s8] sm:$0xff] %v168_v0  ;;  %171 = vst [vmem:[%s1055_s8 + $0x8] sm:$0xff] %v170_v1  ;;  %v174_v3 = vld [vmem:[%s1050_s7 + $0x18] sm:$0xff]  ;;  %v176_v4 = vld [vmem:[%s1050_s7 + $0x20] sm:$0xff] }
  0x19   : > { %173 = vst [vmem:[%s1055_s8 + $0x10] sm:$0xff] %v172_v2  ;;  %v178_v5 = vld [vmem:[%s1050_s7 + $0x28] sm:$0xff]  ;;  %175 = vst [vmem:[%s1055_s8 + $0x18] sm:$0xff] %v174_v3  ;;  %v180_v6 = vld [vmem:[%s1050_s7 + $0x30] sm:$0xff] }
  0x1a   : > { %177 = vst [vmem:[%s1055_s8 + $0x20] sm:$0xff] %v176_v4  ;;  %179 = vst [vmem:[%s1055_s8 + $0x28] sm:$0xff] %v178_v5  ;;  %v182_v7 = vld [vmem:[%s1050_s7 + $0x38] sm:$0xff]  ;;  %v184_v8 = vld [vmem:[%s1050_s7 + $0x100] sm:$0xff] }
  0x1b   : > { %181 = vst [vmem:[%s1055_s8 + $0x30] sm:$0xff] %v180_v6  ;;  %183 = vst [vmem:[%s1055_s8 + $0x38] sm:$0xff] %v182_v7  ;;  %v186_v9 = vld [vmem:[%s1050_s7 + $0x108] sm:$0xff]  ;;  %v188_v10 = vld [vmem:[%s1050_s7 + $0x110] sm:$0xff] }
  0x1c   : > { %185 = vst [vmem:[%s1055_s8 + $0x40] sm:$0xff] %v184_v8  ;;  %v190_v11 = vld [vmem:[%s1050_s7 + $0x118] sm:$0xff]  ;;  %187 = vst [vmem:[%s1055_s8 + $0x48] sm:$0xff] %v186_v9  ;;  %v192_v12 = vld [vmem:[%s1050_s7 + $0x120] sm:$0xff] }
  0x1d   : > { %189 = vst [vmem:[%s1055_s8 + $0x50] sm:$0xff] %v188_v10  ;;  %191 = vst [vmem:[%s1055_s8 + $0x58] sm:$0xff] %v190_v11  ;;  %v194_v13 = vld [vmem:[%s1050_s7 + $0x128] sm:$0xff]  ;;  %v196_v14 = vld [vmem:[%s1050_s7 + $0x130] sm:$0xff] }
  0x1e   : > { %193 = vst [vmem:[%s1055_s8 + $0x60] sm:$0xff] %v192_v12  ;;  %195 = vst [vmem:[%s1055_s8 + $0x68] sm:$0xff] %v194_v13  ;;  %v198_v15 = vld [vmem:[%s1050_s7 + $0x138] sm:$0xff]  ;;  %v200_v16 = vld [vmem:[%s1050_s7 + $0x200] sm:$0xff] }
  0x1f   : > { %197 = vst [vmem:[%s1055_s8 + $0x70] sm:$0xff] %v196_v14  ;;  %v202_v17 = vld [vmem:[%s1050_s7 + $0x208] sm:$0xff]  ;;  %199 = vst [vmem:[%s1055_s8 + $0x78] sm:$0xff] %v198_v15  ;;  %v204_v18 = vld [vmem:[%s1050_s7 + $0x210] sm:$0xff] }
  0x20   : > { %201 = vst [vmem:[%s1055_s8 + $0x80] sm:$0xff] %v200_v16  ;;  %203 = vst [vmem:[%s1055_s8 + $0x88] sm:$0xff] %v202_v17  ;;  %v206_v19 = vld [vmem:[%s1050_s7 + $0x218] sm:$0xff]  ;;  %v208_v20 = vld [vmem:[%s1050_s7 + $0x220] sm:$0xff] }
  0x21   : > { %205 = vst [vmem:[%s1055_s8 + $0x90] sm:$0xff] %v204_v18  ;;  %207 = vst [vmem:[%s1055_s8 + $0x98] sm:$0xff] %v206_v19  ;;  %v210_v21 = vld [vmem:[%s1050_s7 + $0x228] sm:$0xff]  ;;  %v212_v22 = vld [vmem:[%s1050_s7 + $0x230] sm:$0xff] }
  0x22   : > { %209 = vst [vmem:[%s1055_s8 + $0xa0] sm:$0xff] %v208_v20  ;;  %v214_v23 = vld [vmem:[%s1050_s7 + $0x238] sm:$0xff]  ;;  %211 = vst [vmem:[%s1055_s8 + $0xa8] sm:$0xff] %v210_v21  ;;  %v216_v24 = vld [vmem:[%s1050_s7 + $0x300] sm:$0xff] }
  0x23   : > { %213 = vst [vmem:[%s1055_s8 + $0xb0] sm:$0xff] %v212_v22  ;;  %215 = vst [vmem:[%s1055_s8 + $0xb8] sm:$0xff] %v214_v23  ;;  %v218_v25 = vld [vmem:[%s1050_s7 + $0x308] sm:$0xff]  ;;  %v220_v26 = vld [vmem:[%s1050_s7 + $0x310] sm:$0xff] }
  0x24   : > { %217 = vst [vmem:[%s1055_s8 + $0xc0] sm:$0xff] %v216_v24  ;;  %219 = vst [vmem:[%s1055_s8 + $0xc8] sm:$0xff] %v218_v25  ;;  %v222_v27 = vld [vmem:[%s1050_s7 + $0x318] sm:$0xff]  ;;  %v224_v28 = vld [vmem:[%s1050_s7 + $0x320] sm:$0xff] }
  0x25   : > { %221 = vst [vmem:[%s1055_s8 + $0xd0] sm:$0xff] %v220_v26  ;;  %v226_v29 = vld [vmem:[%s1050_s7 + $0x328] sm:$0xff]  ;;  %223 = vst [vmem:[%s1055_s8 + $0xd8] sm:$0xff] %v222_v27  ;;  %v228_v30 = vld [vmem:[%s1050_s7 + $0x330] sm:$0xff] }
  0x26   : > { %225 = vst [vmem:[%s1055_s8 + $0xe0] sm:$0xff] %v224_v28  ;;  %227 = vst [vmem:[%s1055_s8 + $0xe8] sm:$0xff] %v226_v29  ;;  %v230_v31 = vld [vmem:[%s1050_s7 + $0x338] sm:$0xff]  ;;  %v232_v32 = vld [vmem:[%s1050_s7 + $0x400] sm:$0xff] }
  0x27   : > { %229 = vst [vmem:[%s1055_s8 + $0xf0] sm:$0xff] %v228_v30  ;;  %231 = vst [vmem:[%s1055_s8 + $0xf8] sm:$0xff] %v230_v31  ;;  %v234_v33 = vld [vmem:[%s1050_s7 + $0x408] sm:$0xff]  ;;  %v236_v34 = vld [vmem:[%s1050_s7 + $0x410] sm:$0xff] }
  0x28   : > { %233 = vst [vmem:[%s1055_s8 + $0x100] sm:$0xff] %v232_v32  ;;  %v238_v35 = vld [vmem:[%s1050_s7 + $0x418] sm:$0xff]  ;;  %235 = vst [vmem:[%s1055_s8 + $0x108] sm:$0xff] %v234_v33  ;;  %v240_v36 = vld [vmem:[%s1050_s7 + $0x420] sm:$0xff] }
  0x29   : > { %237 = vst [vmem:[%s1055_s8 + $0x110] sm:$0xff] %v236_v34  ;;  %239 = vst [vmem:[%s1055_s8 + $0x118] sm:$0xff] %v238_v35  ;;  %v242_v37 = vld [vmem:[%s1050_s7 + $0x428] sm:$0xff]  ;;  %v244_v38 = vld [vmem:[%s1050_s7 + $0x430] sm:$0xff] }
  0x2a   : > { %241 = vst [vmem:[%s1055_s8 + $0x120] sm:$0xff] %v240_v36  ;;  %243 = vst [vmem:[%s1055_s8 + $0x128] sm:$0xff] %v242_v37  ;;  %v246_v39 = vld [vmem:[%s1050_s7 + $0x438] sm:$0xff]  ;;  %v248_v40 = vld [vmem:[%s1050_s7 + $0x500] sm:$0xff] }
  0x2b   : > { %245 = vst [vmem:[%s1055_s8 + $0x130] sm:$0xff] %v244_v38  ;;  %v250_v41 = vld [vmem:[%s1050_s7 + $0x508] sm:$0xff]  ;;  %247 = vst [vmem:[%s1055_s8 + $0x138] sm:$0xff] %v246_v39  ;;  %v252_v42 = vld [vmem:[%s1050_s7 + $0x510] sm:$0xff] }
  0x2c   : > { %249 = vst [vmem:[%s1055_s8 + $0x140] sm:$0xff] %v248_v40  ;;  %251 = vst [vmem:[%s1055_s8 + $0x148] sm:$0xff] %v250_v41  ;;  %v254_v43 = vld [vmem:[%s1050_s7 + $0x518] sm:$0xff]  ;;  %v256_v44 = vld [vmem:[%s1050_s7 + $0x520] sm:$0xff] }
  0x2d   : > { %253 = vst [vmem:[%s1055_s8 + $0x150] sm:$0xff] %v252_v42  ;;  %255 = vst [vmem:[%s1055_s8 + $0x158] sm:$0xff] %v254_v43  ;;  %v258_v45 = vld [vmem:[%s1050_s7 + $0x528] sm:$0xff]  ;;  %v260_v46 = vld [vmem:[%s1050_s7 + $0x530] sm:$0xff] }
  0x2e   : > { %257 = vst [vmem:[%s1055_s8 + $0x160] sm:$0xff] %v256_v44  ;;  %v262_v47 = vld [vmem:[%s1050_s7 + $0x538] sm:$0xff]  ;;  %259 = vst [vmem:[%s1055_s8 + $0x168] sm:$0xff] %v258_v45  ;;  %v264_v48 = vld [vmem:[%s1050_s7 + $0x600] sm:$0xff] }
  0x2f   : > { %261 = vst [vmem:[%s1055_s8 + $0x170] sm:$0xff] %v260_v46  ;;  %263 = vst [vmem:[%s1055_s8 + $0x178] sm:$0xff] %v262_v47  ;;  %v266_v49 = vld [vmem:[%s1050_s7 + $0x608] sm:$0xff]  ;;  %v268_v50 = vld [vmem:[%s1050_s7 + $0x610] sm:$0xff] }
  0x30   : > { %265 = vst [vmem:[%s1055_s8 + $0x180] sm:$0xff] %v264_v48  ;;  %267 = vst [vmem:[%s1055_s8 + $0x188] sm:$0xff] %v266_v49  ;;  %v270_v51 = vld [vmem:[%s1050_s7 + $0x618] sm:$0xff]  ;;  %v272_v52 = vld [vmem:[%s1050_s7 + $0x620] sm:$0xff] }
  0x31   : > { %269 = vst [vmem:[%s1055_s8 + $0x190] sm:$0xff] %v268_v50  ;;  %v274_v53 = vld [vmem:[%s1050_s7 + $0x628] sm:$0xff]  ;;  %271 = vst [vmem:[%s1055_s8 + $0x198] sm:$0xff] %v270_v51  ;;  %v276_v54 = vld [vmem:[%s1050_s7 + $0x630] sm:$0xff] }
  0x32   : > { %273 = vst [vmem:[%s1055_s8 + $0x1a0] sm:$0xff] %v272_v52  ;;  %275 = vst [vmem:[%s1055_s8 + $0x1a8] sm:$0xff] %v274_v53  ;;  %v278_v55 = vld [vmem:[%s1050_s7 + $0x638] sm:$0xff] }
  0x33   : > { %277 = vst [vmem:[%s1055_s8 + $0x1b0] sm:$0xff] %v276_v54  ;;  %279 = vst [vmem:[%s1055_s8 + $0x1b8] sm:$0xff] %v278_v55 }
  0x34 PF: > { %p832_p7 = scmp.ge.s32.totalorder %s966_s18, 1  ;;  %p284_p8 = scmp.lt.s32.totalorder %s966_s18, 9 }
  0x36   : > { %p285_p9 = pnand %p832_p7, %p284_p8 }
  0x37   : > { %s291_s9 = sand.u32 (!%p285_p9), 1, %s942_s12   ;;  %s833_s24 = sshll.u32 (!%p285_p9), %s950_s14, 3 }
  0x38   : > { %288 = sbr.rel (%p285_p9) target bundleno = 296 (0x128), region = 51  ;;  %p320_p10 = scmp.lt.s32.totalorder (!%p285_p9), %s954_s15, 1 }
  0x39   : > { %s852_s10 = smul.u32 (!%p285_p9), 448, %s291_s9  ;;  %p322_p11 = scmp.lt.s32.totalorder (!%p285_p9), %s833_s24, 31 }
  0x3b   : > { %s1174_s22 = scalar_lea.vmem (!%p285_p9), [#allocation2], %s852_s10 }
  0x3d   : > { %v968_v56 = vmov 0.0   ;;  %v386_v57 = vld [vmem:[%s1284_s2] sm:$0xf]  ;;  %vm396_vm0 = vcmask 1045504   ;;  %v969_v58 = vmov 0   ;;  %v371_v63 = vld [vmem:[%s1174_s22 + $0x148] sm:$0xff] }
  0x3e   : > { %485 = vmatprep.mubr.f32.mxu0 %v968_v56  ;;  %556 = vmatprep.mubr.f32.mxu1 %v968_v56  ;;  %v379_v59 = vld [vmem:[%s1174_s22 + $0x188] sm:$0x3f]  ;;  %v381_v60 = vld [vmem:[%s1174_s22 + $0x198] sm:$0x3f]  ;;  %v378_v61 = vld [vmem:[%s1174_s22 + $0x180] sm:$0x3f] }
  0x3f   : > { %911 = vset.pattern.permute.xlu0 %v969_v58  ;;  %836 = vmatprep.subr.msk.mxu0 %vm396_vm0, %v379_v59  ;;  %v380_v62 = vld [vmem:[%s1174_s22 + $0x190] sm:$0x3f]  ;;  %v373_v0 = vld [vmem:[%s1174_s22 + $0x158] sm:$0xff]  ;;  %v370_v1 = vld [vmem:[%s1174_s22 + $0x140] sm:$0xff]  ;;  %vm392_vm1 = vcmask 441344   ;;  %s1299_s15 = smov (!%p320_p10, %s954_s15), 1 }
  0x40   : > { %389 = vperm.xlu0 %911, %v386_v57   ;;  %839 = vmatprep.subr.msk.mxu1 %vm396_vm0, %v381_v60  ;;  %v372_v2 = vld [vmem:[%s1174_s22 + $0x150] sm:$0xff]  ;;  %v363_v3 = vld [vmem:[%s1174_s22 + $0x108] sm:$0xff]  ;;  %v365_v4 = vld [vmem:[%s1174_s22 + $0x118] sm:$0xff]  ;;  %s1301_s24 = smov (!%p322_p11, %s833_s24), 31  ;;  %s834_s26 = sshll.u32 %s1299_s15, 5 }
  0x41   : > { %837 = vmatpush1.msk.msra.mxu0 %vm396_vm0, %v378_v61  ;;  %840 = vmatpush1.msk.msra.mxu1 %vm396_vm0, %v380_v62  ;;  %v362_v5 = vld [vmem:[%s1174_s22 + $0x100] sm:$0xff]  ;;  %v364_v6 = vld [vmem:[%s1174_s22 + $0x110] sm:$0xff]  ;;  %v355_v7 = vld [vmem:[%s1174_s22 + $0xc8] sm:$0xff]  ;;  %s325_s27 = sadd.s32 %s834_s26, %s1301_s24 }
  0x42   : > { %441 = vmatprep.subr.mxu0 %v371_v63  ;;  %512 = vmatprep.subr.mxu1 %v373_v0  ;;  %v357_v8 = vld [vmem:[%s1174_s22 + $0xd8] sm:$0xff]  ;;  %v354_v9 = vld [vmem:[%s1174_s22 + $0xc0] sm:$0xff]  ;;  %v356_v10 = vld [vmem:[%s1174_s22 + $0xd0] sm:$0xff]  ;;  %s835_s28 = sshll.u32 %s325_s27, 2 }
  0x43   : > { %442 = vmatpush1.msra.mxu0 %v370_v1  ;;  %513 = vmatpush1.msra.mxu1 %v372_v2  ;;  %v347_v11 = vld [vmem:[%s1174_s22 + $0x88] sm:$0xff]  ;;  %v349_v12 = vld [vmem:[%s1174_s22 + $0x98] sm:$0xff]  ;;  %v346_v13 = vld [vmem:[%s1174_s22 + $0x80] sm:$0xff]  ;;  %s327_s30 = scalar_lea.vmem %s1285_s3, %s835_s28 }
  0x44   : > { %443 = vmatprep.subr.mxu0 %v363_v3  ;;  %514 = vmatprep.subr.mxu1 %v365_v4  ;;  %v348_v14 = vld [vmem:[%s1174_s22 + $0x90] sm:$0xff]  ;;  %v339_v15 = vld [vmem:[%s1174_s22 + $0x48] sm:$0xff]  ;;  %v341_v16 = vld [vmem:[%s1174_s22 + $0x58] sm:$0xff] }
  0x45   : > { %444 = vmatpush1.msra.mxu0 %v362_v5  ;;  %515 = vmatpush1.msra.mxu1 %v364_v6  ;;  %v338_v17 = vld [vmem:[%s1174_s22 + $0x40] sm:$0xff]  ;;  %v340_v18 = vld [vmem:[%s1174_s22 + $0x50] sm:$0xff]  ;;  %v331_v19 = vld [vmem:[%s1174_s22 + $0x8] sm:$0xff] }
  0x46   : > { %445 = vmatprep.subr.mxu0 %v355_v7  ;;  %516 = vmatprep.subr.mxu1 %v357_v8  ;;  %v333_v20 = vld [vmem:[%s1174_s22 + $0x18] sm:$0xff]  ;;  %v330_v21 = vld [vmem:[%s1174_s22] sm:$0xff]  ;;  %v332_v22 = vld [vmem:[%s1174_s22 + $0x10] sm:$0xff] }
  0x47   : > { %446 = vmatpush1.msra.mxu0 %v354_v9  ;;  %517 = vmatpush1.msra.mxu1 %v356_v10  ;;  %v1211_v23 = vld [vmem:[%s1283_s1] sm:$0xf]  ;;  %v383_v24 = vld [vmem:[%s1174_s22 + $0x1a8] sm:$0x3f]  ;;  %v385_v25 = vld [vmem:[%s1174_s22 + $0x1b8] sm:$0x3f] }
  0x48   : > { %447 = vmatprep.subr.mxu0 %v347_v11  ;;  %518 = vmatprep.subr.mxu1 %v349_v12  ;;  %v382_v26 = vld [vmem:[%s1174_s22 + $0x1a0] sm:$0x3f]  ;;  %v384_v27 = vld [vmem:[%s1174_s22 + $0x1b0] sm:$0x3f]  ;;  %v375_v28 = vld [vmem:[%s1174_s22 + $0x168] sm:$0xff] }
  0x49   : > { %448 = vmatpush1.msra.mxu0 %v346_v13  ;;  %519 = vmatpush1.msra.mxu1 %v348_v14  ;;  %v377_v29 = vld [vmem:[%s1174_s22 + $0x178] sm:$0xff]  ;;  %v374_v30 = vld [vmem:[%s1174_s22 + $0x160] sm:$0xff]  ;;  %v376_v31 = vld [vmem:[%s1174_s22 + $0x170] sm:$0xff] }
  0x4a   : > { %449 = vmatprep.subr.mxu0 %v339_v15  ;;  %520 = vmatprep.subr.mxu1 %v341_v16  ;;  %v367_v32 = vld [vmem:[%s1174_s22 + $0x128] sm:$0xff]  ;;  %v369_v33 = vld [vmem:[%s1174_s22 + $0x138] sm:$0xff]  ;;  %v366_v34 = vld [vmem:[%s1174_s22 + $0x120] sm:$0xff] }
  0x4b   : > { %450 = vmatpush1.msra.mxu0 %v338_v17  ;;  %521 = vmatpush1.msra.mxu1 %v340_v18  ;;  %v368_v35 = vld [vmem:[%s1174_s22 + $0x130] sm:$0xff]  ;;  %v359_v36 = vld [vmem:[%s1174_s22 + $0xe8] sm:$0xff]  ;;  %v361_v37 = vld [vmem:[%s1174_s22 + $0xf8] sm:$0xff] }
  0x4c   : > { %451 = vmatprep.subr.mxu0 %v331_v19  ;;  %522 = vmatprep.subr.mxu1 %v333_v20  ;;  %v358_v38 = vld [vmem:[%s1174_s22 + $0xe0] sm:$0xff]  ;;  %v360_v39 = vld [vmem:[%s1174_s22 + $0xf0] sm:$0xff]  ;;  %v351_v40 = vld [vmem:[%s1174_s22 + $0xa8] sm:$0xff] }
  0x4d   : > { %452 = vmatpush1.msra.mxu0 %v330_v21  ;;  %523 = vmatpush1.msra.mxu1 %v332_v22  ;;  %v353_v41 = vld [vmem:[%s1174_s22 + $0xb8] sm:$0xff]  ;;  %v350_v42 = vld [vmem:[%s1174_s22 + $0xa0] sm:$0xff]  ;;  %v352_v43 = vld [vmem:[%s1174_s22 + $0xb0] sm:$0xff] }
  0x4e   : > { %838 = vmatmul.mubr.msk.f32.vlgmr.msra.gmra.mxu0 %vm392_vm1, %v1211_v23  ;;  %841 = vmatmul.mubr.msk.f32.vlgmr.msra.gmra.mxu1 %vm392_vm1, %v1211_v23  ;;  %v343_v44 = vld [vmem:[%s1174_s22 + $0x68] sm:$0xff]  ;;  %v345_v45 = vld [vmem:[%s1174_s22 + $0x78] sm:$0xff]  ;;  %v342_v46 = vld [vmem:[%s1174_s22 + $0x60] sm:$0xff] }
  0x4f   : > { %842 = vmatprep.subr.msk.mxu0 %vm396_vm0, %v383_v24  ;;  %845 = vmatprep.subr.msk.mxu1 %vm396_vm0, %v385_v25  ;;  %v344_v47 = vld [vmem:[%s1174_s22 + $0x70] sm:$0xff]  ;;  %v335_v48 = vld [vmem:[%s1174_s22 + $0x28] sm:$0xff]  ;;  %v337_v49 = vld [vmem:[%s1174_s22 + $0x38] sm:$0xff] }
  0x50   : > { %843 = vmatpush1.msk.msra.mxu0 %vm396_vm0, %v382_v26  ;;  %846 = vmatpush1.msk.msra.mxu1 %vm396_vm0, %v384_v27  ;;  %v334_v50 = vld [vmem:[%s1174_s22 + $0x20] sm:$0xff]  ;;  %v336_v51 = vld [vmem:[%s1174_s22 + $0x30] sm:$0xff] }
  0x51   : > { %583 = vmatprep.subr.mxu0 %v375_v28  ;;  %654 = vmatprep.subr.mxu1 %v377_v29 }
  0x52   : > { %584 = vmatpush1.msra.mxu0 %v374_v30  ;;  %655 = vmatpush1.msra.mxu1 %v376_v31 }
  0x53   : > { %585 = vmatprep.subr.mxu0 %v367_v32  ;;  %656 = vmatprep.subr.mxu1 %v369_v33 }
  0x54   : > { %586 = vmatpush1.msra.mxu0 %v366_v34  ;;  %657 = vmatpush1.msra.mxu1 %v368_v35 }
  0x55   : > { %587 = vmatprep.subr.mxu0 %v359_v36  ;;  %658 = vmatprep.subr.mxu1 %v361_v37 }
  0x56   : > { %588 = vmatpush1.msra.mxu0 %v358_v38  ;;  %659 = vmatpush1.msra.mxu1 %v360_v39 }
  0x57   : > { %589 = vmatprep.subr.mxu0 %v351_v40  ;;  %660 = vmatprep.subr.mxu1 %v353_v41 }
  0x58   : > { %590 = vmatpush1.msra.mxu0 %v350_v42  ;;  %661 = vmatpush1.msra.mxu1 %v352_v43 }
  0x59   : > { %591 = vmatprep.subr.mxu0 %v343_v44  ;;  %662 = vmatprep.subr.mxu1 %v345_v45 }
  0x5a   : > { %592 = vmatpush1.msra.mxu0 %v342_v46  ;;  %663 = vmatpush1.msra.mxu1 %v344_v47 }
  0x5b   : > { %593 = vmatprep.subr.mxu0 %v335_v48  ;;  %664 = vmatprep.subr.mxu1 %v337_v49 }
  0x5c   : > { %594 = vmatpush1.msra.mxu0 %v334_v50  ;;  %627 = vmatprep.mubr.f32.mxu0 %v968_v56 }
  0x5d   : > { %665 = vmatpush1.msra.mxu1 %v336_v51  ;;  %698 = vmatprep.mubr.f32.mxu1 %v968_v56 }
  0x5e   : > { %844 = vmatmul.mubr.msk.f32.vlgmr.msra.gmra.mxu0 %vm392_vm1, %v1211_v23  ;;  %847 = vmatmul.mubr.msk.f32.vlgmr.msra.gmra.mxu1 %vm392_vm1, %v1211_v23 }
  0xbb   : > { %v390_v52 = vpop.permute.xlu0 %389 }
 0x10e   : > { %v487_v53 = vpop.f32.mrf.mxu0  ;;  %v558_v54 = vpop.f32.mrf.mxu1 }
 0x10f   : > { %v488_v55 = vadd.f32 %v487_v53, %v390_v52  ;;  %v559_v57 = vadd.f32 %v558_v54, %v390_v52 }
 0x110   : > { %v489_v58 = vpop.f32.mrf.mxu0  ;;  %v560_v56 = vpop.f32.mrf.mxu1 }
 0x111   : > { %v490_v59 = vadd.f32 %v489_v58, %v390_v52  ;;  %v705_v60 = vmax.f32 %v488_v55, 0.0  ;;  %v561_v61 = vadd.f32 %v560_v56, %v390_v52  ;;  %v707_v62 = vmax.f32 %v559_v57, 0.0 }
 0x113   : > { %v706_v63 = vmax.f32 %v490_v59, 0.0  ;;  %v708_v0 = vmax.f32 %v561_v61, 0.0 }
 0x115   : > { %v721_v1 = vcombine.low %v705_v60, %v706_v63  ;;  %v722_v2 = vcombine.low %v707_v62, %v708_v0 }
 0x117   : > { %729 = vst [vmem:[%s327_s30] sm:$0xff] %v721_v1  ;;  %730 = vst [vmem:[%s327_s30 + $0x8] sm:$0xff] %v722_v2 }
 0x11e   : > { %v629_v3 = vpop.f32.mrf.mxu0  ;;  %v700_v4 = vpop.f32.mrf.mxu1 }
 0x11f   : > { %v630_v5 = vadd.f32 %v629_v3, %v390_v52  ;;  %v701_v6 = vadd.f32 %v700_v4, %v390_v52 }
 0x120   : > { %v631_v7 = vpop.f32.mrf.mxu0  ;;  %v702_v8 = vpop.f32.mrf.mxu1 }
 0x121   : > { %v632_v9 = vadd.f32 %v631_v7, %v390_v52  ;;  %v703_v10 = vadd.f32 %v702_v8, %v390_v52  ;;  %v709_v11 = vmax.f32 %v630_v5, 0.0  ;;  %v711_v12 = vmax.f32 %v701_v6, 0.0 }
 0x123   : > { %v710_v13 = vmax.f32 %v632_v9, 0.0  ;;  %v712_v14 = vmax.f32 %v703_v10, 0.0 }
 0x125   : > { %v723_v15 = vcombine.low %v709_v11, %v710_v13  ;;  %v724_v16 = vcombine.low %v711_v12, %v712_v14 }
 0x127   : > { %731 = vst [vmem:[%s327_s30 + $0x10] sm:$0xff] %v723_v15  ;;  %732 = vst [vmem:[%s327_s30 + $0x18] sm:$0xff] %v724_v16 }
 0x128 PF: > { %s13_s18 = sadd.s32 1, %s966_s18   ;;  %s1286_s12 = smov %s946_s13 }
 0x129   : > { %p10_p12 = scmp.ge.s32.totalorder %s13_s18, 10   ;;  %s1287_s13 = smov %s1041_s25 }
 0x12a   : > { %s1288_s14 = smov %s958_s16  ;;  %s1289_s15 = smov %s962_s17 }
 0x12b   : > { %s1290_s16 = smov %s1293_s19  ;;  %s1291_s17 = smov %s1297_s20 }
 0x12c   :  { %12 = sbr.rel (!%p10_p12) target bundleno = 4 (0x4), region = 90 }

// kernel: transformer_forward.8
= control target key start
LH: loop header
LB: loop body
LE: loop exit
PB: predicated region body
PF: predicated region fallthrough
CT: control target
= control target key end

     0   :  { %s1158_s12 = smov 0   ;;  %s1160_s13 = smov 0   ;;  %s1618_s0 = inlined_call_operand.vmem [shape: f32[2,108,4096], index: 0, kind: input, shape index: {}]   ;;  %s1619_s1 = inlined_call_operand.vmem [shape: f32[4,108], index: 1, kind: input, shape index: {}]   ;;  %s1620_s2 = inlined_call_operand.vmem [shape: f32[4,1], index: 2, kind: input, shape index: {}]   ;;  %s1621_s3 = inlined_call_operand.vmem [shape: f32[2,4,4096], index: 3, kind: output, shape index: {}]  }
   0x1   :  { %s1162_s14 = smov 0   ;;  %s1164_s15 = smov 0  }
   0x2   :  { %s1166_s16 = smov 0   ;;  %s1168_s17 = smov 0  }
   0x3   :  { %s1170_s18 = smov 0  }
   0x4 LB: > { %s22_s19 = sadd.s32 1, %s1126_s16  ;;  %s25_s20 = sadd.s32 1, %s1130_s17  ;;  %s1134_s18 = sphi %s1170_s18, %s13_s18   ;;  %s1130_s17 = sphi %s1168_s17, %s1627_s17   ;;  %s1126_s16 = sphi %s1166_s16, %s1626_s16   ;;  %s1122_s15 = sphi %s1164_s15, %s1625_s15   ;;  %s1118_s14 = sphi %s1162_s14, %s1624_s14   ;;  %s1114_s13 = sphi %s1160_s13, %s1623_s13   ;;  %s1110_s12 = sphi %s1158_s12, %s1622_s12  }
   0x5   : > { %p23_p0 = scmp.ge.s32.totalorder %s22_s19, 4  ;;  %p41_p1 = scmp.ne.s32.totalorder %s1114_s13, %s1110_s12 }
   0x6   : > { %p42_p2 = scmp.eq.s32.totalorder %s1134_s18, 0  ;;  %s34_s24 = sadd.s32 1, %s1114_s13 }
   0x7   : > { %s1629_s19 = smov (%p23_p0, %s22_s19), 0  ;;  %s1631_s20 = smov (!%p23_p0, %s25_s20), %s1130_s17 }
   0x8   : > { %p43_p3 = por %p42_p2, %p41_p1  ;;  %p27_p4 = scmp.ge.s32.totalorder %s1631_s20, 2 }
   0x9   : > { %s30_s21 = ssub.s32 %s1126_s16, %s1629_s19  ;;  %p997_p6 = scmp.ge.s32.totalorder %s1134_s18, 8 }
   0xa   : > { %s1633_s20 = smov (%p27_p4, %s1631_s20), 0 }
   0xb   : > { %s29_s22 = ssub.s32 %s1130_s17, %s1633_s20  ;;  %143 = sbr.rel (%p997_p6) target bundleno = 80 (0x50), region = 24 }
   0xc   : > { %s31_s23 = sor.u32 %s30_s21, %s29_s22 }
   0xd   : > { %p32_p5 = scmp.eq.s32.totalorder %s31_s23, 0 }
   0xf   : > { %s1209_s25 = scalar_select %p32_p5, %s1114_s13, %s34_s24  }
  0x10   : > { %146 = sbr.rel (!%p43_p3) target bundleno = 80 (0x50), region = 28  ;;  %s148_s26 = sand.u32 (%p43_p3), 1, %s1114_s13  }
  0x11   : > { %s1018_s27 = smul.u32 (%p43_p3), 896, %s148_s26  ;;  %s998_s28 = sshll.u32 (%p43_p3), %s1126_s16, 3 }
  0x12   : > { %s1019_s29 = smul.u32 (%p43_p3), 448, %s1130_s17 }
  0x13   : > { %s1223_s8 = scalar_lea.vmem (%p43_p3), [#allocation2], %s1018_s27 }
  0x14   : > { %s153_s30 = sadd.s32 (%p43_p3), %s1019_s29, %s998_s28 }
  0x15   : > { %s999_s4 = sshll.u32 %s153_s30, 3 }
  0x16   : > { %s1218_s7 = scalar_lea.vmem %s1618_s0, %s999_s4 }
  0x17   : > { %v168_v0 = vld [vmem:[%s1218_s7] sm:$0xff]  ;;  %v170_v1 = vld [vmem:[%s1218_s7 + $0x8] sm:$0xff]  ;;  %v172_v2 = vld [vmem:[%s1218_s7 + $0x10] sm:$0xff] }
  0x18   : > { %169 = vst [vmem:[%s1223_s8] sm:$0xff] %v168_v0  ;;  %171 = vst [vmem:[%s1223_s8 + $0x8] sm:$0xff] %v170_v1  ;;  %v174_v3 = vld [vmem:[%s1218_s7 + $0x18] sm:$0xff]  ;;  %v176_v4 = vld [vmem:[%s1218_s7 + $0x20] sm:$0xff] }
  0x19   : > { %173 = vst [vmem:[%s1223_s8 + $0x10] sm:$0xff] %v172_v2  ;;  %v178_v5 = vld [vmem:[%s1218_s7 + $0x28] sm:$0xff]  ;;  %175 = vst [vmem:[%s1223_s8 + $0x18] sm:$0xff] %v174_v3  ;;  %v180_v6 = vld [vmem:[%s1218_s7 + $0x30] sm:$0xff] }
  0x1a   : > { %177 = vst [vmem:[%s1223_s8 + $0x20] sm:$0xff] %v176_v4  ;;  %179 = vst [vmem:[%s1223_s8 + $0x28] sm:$0xff] %v178_v5  ;;  %v182_v7 = vld [vmem:[%s1218_s7 + $0x38] sm:$0xff]  ;;  %v184_v8 = vld [vmem:[%s1218_s7 + $0x100] sm:$0xff] }
  0x1b   : > { %181 = vst [vmem:[%s1223_s8 + $0x30] sm:$0xff] %v180_v6  ;;  %183 = vst [vmem:[%s1223_s8 + $0x38] sm:$0xff] %v182_v7  ;;  %v186_v9 = vld [vmem:[%s1218_s7 + $0x108] sm:$0xff]  ;;  %v188_v10 = vld [vmem:[%s1218_s7 + $0x110] sm:$0xff] }
  0x1c   : > { %185 = vst [vmem:[%s1223_s8 + $0x40] sm:$0xff] %v184_v8  ;;  %v190_v11 = vld [vmem:[%s1218_s7 + $0x118] sm:$0xff]  ;;  %187 = vst [vmem:[%s1223_s8 + $0x48] sm:$0xff] %v186_v9  ;;  %v192_v12 = vld [vmem:[%s1218_s7 + $0x120] sm:$0xff] }
  0x1d   : > { %189 = vst [vmem:[%s1223_s8 + $0x50] sm:$0xff] %v188_v10  ;;  %191 = vst [vmem:[%s1223_s8 + $0x58] sm:$0xff] %v190_v11  ;;  %v194_v13 = vld [vmem:[%s1218_s7 + $0x128] sm:$0xff]  ;;  %v196_v14 = vld [vmem:[%s1218_s7 + $0x130] sm:$0xff] }
  0x1e   : > { %193 = vst [vmem:[%s1223_s8 + $0x60] sm:$0xff] %v192_v12  ;;  %195 = vst [vmem:[%s1223_s8 + $0x68] sm:$0xff] %v194_v13  ;;  %v198_v15 = vld [vmem:[%s1218_s7 + $0x138] sm:$0xff]  ;;  %v200_v16 = vld [vmem:[%s1218_s7 + $0x200] sm:$0xff] }
  0x1f   : > { %197 = vst [vmem:[%s1223_s8 + $0x70] sm:$0xff] %v196_v14  ;;  %v202_v17 = vld [vmem:[%s1218_s7 + $0x208] sm:$0xff]  ;;  %199 = vst [vmem:[%s1223_s8 + $0x78] sm:$0xff] %v198_v15  ;;  %v204_v18 = vld [vmem:[%s1218_s7 + $0x210] sm:$0xff] }
  0x20   : > { %201 = vst [vmem:[%s1223_s8 + $0x80] sm:$0xff] %v200_v16  ;;  %203 = vst [vmem:[%s1223_s8 + $0x88] sm:$0xff] %v202_v17  ;;  %v206_v19 = vld [vmem:[%s1218_s7 + $0x218] sm:$0xff]  ;;  %v208_v20 = vld [vmem:[%s1218_s7 + $0x220] sm:$0xff] }
  0x21   : > { %205 = vst [vmem:[%s1223_s8 + $0x90] sm:$0xff] %v204_v18  ;;  %207 = vst [vmem:[%s1223_s8 + $0x98] sm:$0xff] %v206_v19  ;;  %v210_v21 = vld [vmem:[%s1218_s7 + $0x228] sm:$0xff]  ;;  %v212_v22 = vld [vmem:[%s1218_s7 + $0x230] sm:$0xff] }
  0x22   : > { %209 = vst [vmem:[%s1223_s8 + $0xa0] sm:$0xff] %v208_v20  ;;  %v214_v23 = vld [vmem:[%s1218_s7 + $0x238] sm:$0xff]  ;;  %211 = vst [vmem:[%s1223_s8 + $0xa8] sm:$0xff] %v210_v21  ;;  %v216_v24 = vld [vmem:[%s1218_s7 + $0x300] sm:$0xff] }
  0x23   : > { %213 = vst [vmem:[%s1223_s8 + $0xb0] sm:$0xff] %v212_v22  ;;  %215 = vst [vmem:[%s1223_s8 + $0xb8] sm:$0xff] %v214_v23  ;;  %v218_v25 = vld [vmem:[%s1218_s7 + $0x308] sm:$0xff]  ;;  %v220_v26 = vld [vmem:[%s1218_s7 + $0x310] sm:$0xff] }
  0x24   : > { %217 = vst [vmem:[%s1223_s8 + $0xc0] sm:$0xff] %v216_v24  ;;  %219 = vst [vmem:[%s1223_s8 + $0xc8] sm:$0xff] %v218_v25  ;;  %v222_v27 = vld [vmem:[%s1218_s7 + $0x318] sm:$0xff]  ;;  %v224_v28 = vld [vmem:[%s1218_s7 + $0x320] sm:$0xff] }
  0x25   : > { %221 = vst [vmem:[%s1223_s8 + $0xd0] sm:$0xff] %v220_v26  ;;  %v226_v29 = vld [vmem:[%s1218_s7 + $0x328] sm:$0xff]  ;;  %223 = vst [vmem:[%s1223_s8 + $0xd8] sm:$0xff] %v222_v27  ;;  %v228_v30 = vld [vmem:[%s1218_s7 + $0x330] sm:$0xff] }
  0x26   : > { %225 = vst [vmem:[%s1223_s8 + $0xe0] sm:$0xff] %v224_v28  ;;  %227 = vst [vmem:[%s1223_s8 + $0xe8] sm:$0xff] %v226_v29  ;;  %v230_v31 = vld [vmem:[%s1218_s7 + $0x338] sm:$0xff]  ;;  %v232_v32 = vld [vmem:[%s1218_s7 + $0x400] sm:$0xff] }
  0x27   : > { %229 = vst [vmem:[%s1223_s8 + $0xf0] sm:$0xff] %v228_v30  ;;  %231 = vst [vmem:[%s1223_s8 + $0xf8] sm:$0xff] %v230_v31  ;;  %v234_v33 = vld [vmem:[%s1218_s7 + $0x408] sm:$0xff]  ;;  %v236_v34 = vld [vmem:[%s1218_s7 + $0x410] sm:$0xff] }
  0x28   : > { %233 = vst [vmem:[%s1223_s8 + $0x100] sm:$0xff] %v232_v32  ;;  %v238_v35 = vld [vmem:[%s1218_s7 + $0x418] sm:$0xff]  ;;  %235 = vst [vmem:[%s1223_s8 + $0x108] sm:$0xff] %v234_v33  ;;  %v240_v36 = vld [vmem:[%s1218_s7 + $0x420] sm:$0xff] }
  0x29   : > { %237 = vst [vmem:[%s1223_s8 + $0x110] sm:$0xff] %v236_v34  ;;  %239 = vst [vmem:[%s1223_s8 + $0x118] sm:$0xff] %v238_v35  ;;  %v242_v37 = vld [vmem:[%s1218_s7 + $0x428] sm:$0xff]  ;;  %v244_v38 = vld [vmem:[%s1218_s7 + $0x430] sm:$0xff] }
  0x2a   : > { %241 = vst [vmem:[%s1223_s8 + $0x120] sm:$0xff] %v240_v36  ;;  %243 = vst [vmem:[%s1223_s8 + $0x128] sm:$0xff] %v242_v37  ;;  %v246_v39 = vld [vmem:[%s1218_s7 + $0x438] sm:$0xff]  ;;  %v248_v40 = vld [vmem:[%s1218_s7 + $0x500] sm:$0xff] }
  0x2b   : > { %245 = vst [vmem:[%s1223_s8 + $0x130] sm:$0xff] %v244_v38  ;;  %v250_v41 = vld [vmem:[%s1218_s7 + $0x508] sm:$0xff]  ;;  %247 = vst [vmem:[%s1223_s8 + $0x138] sm:$0xff] %v246_v39  ;;  %v252_v42 = vld [vmem:[%s1218_s7 + $0x510] sm:$0xff] }
  0x2c   : > { %249 = vst [vmem:[%s1223_s8 + $0x140] sm:$0xff] %v248_v40  ;;  %251 = vst [vmem:[%s1223_s8 + $0x148] sm:$0xff] %v250_v41  ;;  %v254_v43 = vld [vmem:[%s1218_s7 + $0x518] sm:$0xff]  ;;  %v256_v44 = vld [vmem:[%s1218_s7 + $0x520] sm:$0xff] }
  0x2d   : > { %253 = vst [vmem:[%s1223_s8 + $0x150] sm:$0xff] %v252_v42  ;;  %255 = vst [vmem:[%s1223_s8 + $0x158] sm:$0xff] %v254_v43  ;;  %v258_v45 = vld [vmem:[%s1218_s7 + $0x528] sm:$0xff]  ;;  %v260_v46 = vld [vmem:[%s1218_s7 + $0x530] sm:$0xff] }
  0x2e   : > { %257 = vst [vmem:[%s1223_s8 + $0x160] sm:$0xff] %v256_v44  ;;  %v262_v47 = vld [vmem:[%s1218_s7 + $0x538] sm:$0xff]  ;;  %259 = vst [vmem:[%s1223_s8 + $0x168] sm:$0xff] %v258_v45  ;;  %v264_v48 = vld [vmem:[%s1218_s7 + $0x600] sm:$0xff] }
  0x2f   : > { %261 = vst [vmem:[%s1223_s8 + $0x170] sm:$0xff] %v260_v46  ;;  %263 = vst [vmem:[%s1223_s8 + $0x178] sm:$0xff] %v262_v47  ;;  %v266_v49 = vld [vmem:[%s1218_s7 + $0x608] sm:$0xff]  ;;  %v268_v50 = vld [vmem:[%s1218_s7 + $0x610] sm:$0xff] }
  0x30   : > { %265 = vst [vmem:[%s1223_s8 + $0x180] sm:$0xff] %v264_v48  ;;  %267 = vst [vmem:[%s1223_s8 + $0x188] sm:$0xff] %v266_v49  ;;  %v270_v51 = vld [vmem:[%s1218_s7 + $0x618] sm:$0xff]  ;;  %v272_v52 = vld [vmem:[%s1218_s7 + $0x620] sm:$0xff] }
  0x31   : > { %269 = vst [vmem:[%s1223_s8 + $0x190] sm:$0xff] %v268_v50  ;;  %v274_v53 = vld [vmem:[%s1218_s7 + $0x628] sm:$0xff]  ;;  %271 = vst [vmem:[%s1223_s8 + $0x198] sm:$0xff] %v270_v51  ;;  %v276_v54 = vld [vmem:[%s1218_s7 + $0x630] sm:$0xff] }
  0x32   : > { %273 = vst [vmem:[%s1223_s8 + $0x1a0] sm:$0xff] %v272_v52  ;;  %275 = vst [vmem:[%s1223_s8 + $0x1a8] sm:$0xff] %v274_v53  ;;  %v278_v55 = vld [vmem:[%s1218_s7 + $0x638] sm:$0xff]  ;;  %v280_v56 = vld [vmem:[%s1218_s7 + $0x700] sm:$0xff] }
  0x33   : > { %277 = vst [vmem:[%s1223_s8 + $0x1b0] sm:$0xff] %v276_v54  ;;  %279 = vst [vmem:[%s1223_s8 + $0x1b8] sm:$0xff] %v278_v55  ;;  %v282_v57 = vld [vmem:[%s1218_s7 + $0x708] sm:$0xff]  ;;  %v284_v58 = vld [vmem:[%s1218_s7 + $0x710] sm:$0xff] }
  0x34   : > { %281 = vst [vmem:[%s1223_s8 + $0x1c0] sm:$0xff] %v280_v56  ;;  %v286_v59 = vld [vmem:[%s1218_s7 + $0x718] sm:$0xff]  ;;  %283 = vst [vmem:[%s1223_s8 + $0x1c8] sm:$0xff] %v282_v57  ;;  %v288_v60 = vld [vmem:[%s1218_s7 + $0x720] sm:$0xff] }
  0x35   : > { %285 = vst [vmem:[%s1223_s8 + $0x1d0] sm:$0xff] %v284_v58  ;;  %287 = vst [vmem:[%s1223_s8 + $0x1d8] sm:$0xff] %v286_v59  ;;  %v290_v61 = vld [vmem:[%s1218_s7 + $0x728] sm:$0xff]  ;;  %v292_v62 = vld [vmem:[%s1218_s7 + $0x730] sm:$0xff] }
  0x36   : > { %289 = vst [vmem:[%s1223_s8 + $0x1e0] sm:$0xff] %v288_v60  ;;  %291 = vst [vmem:[%s1223_s8 + $0x1e8] sm:$0xff] %v290_v61  ;;  %v294_v63 = vld [vmem:[%s1218_s7 + $0x738] sm:$0xff]  ;;  %v296_v0 = vld [vmem:[%s1218_s7 + $0x800] sm:$0xff] }
  0x37   : > { %293 = vst [vmem:[%s1223_s8 + $0x1f0] sm:$0xff] %v292_v62  ;;  %v298_v1 = vld [vmem:[%s1218_s7 + $0x808] sm:$0xff]  ;;  %295 = vst [vmem:[%s1223_s8 + $0x1f8] sm:$0xff] %v294_v63  ;;  %v300_v2 = vld [vmem:[%s1218_s7 + $0x810] sm:$0xff] }
  0x38   : > { %297 = vst [vmem:[%s1223_s8 + $0x200] sm:$0xff] %v296_v0  ;;  %299 = vst [vmem:[%s1223_s8 + $0x208] sm:$0xff] %v298_v1  ;;  %v302_v3 = vld [vmem:[%s1218_s7 + $0x818] sm:$0xff]  ;;  %v304_v4 = vld [vmem:[%s1218_s7 + $0x820] sm:$0xff] }
  0x39   : > { %301 = vst [vmem:[%s1223_s8 + $0x210] sm:$0xff] %v300_v2  ;;  %303 = vst [vmem:[%s1223_s8 + $0x218] sm:$0xff] %v302_v3  ;;  %v306_v5 = vld [vmem:[%s1218_s7 + $0x828] sm:$0xff]  ;;  %v308_v6 = vld [vmem:[%s1218_s7 + $0x830] sm:$0xff] }
  0x3a   : > { %305 = vst [vmem:[%s1223_s8 + $0x220] sm:$0xff] %v304_v4  ;;  %v310_v7 = vld [vmem:[%s1218_s7 + $0x838] sm:$0xff]  ;;  %307 = vst [vmem:[%s1223_s8 + $0x228] sm:$0xff] %v306_v5  ;;  %v312_v8 = vld [vmem:[%s1218_s7 + $0x900] sm:$0xff] }
  0x3b   : > { %309 = vst [vmem:[%s1223_s8 + $0x230] sm:$0xff] %v308_v6  ;;  %311 = vst [vmem:[%s1223_s8 + $0x238] sm:$0xff] %v310_v7  ;;  %v314_v9 = vld [vmem:[%s1218_s7 + $0x908] sm:$0xff]  ;;  %v316_v10 = vld [vmem:[%s1218_s7 + $0x910] sm:$0xff] }
  0x3c   : > { %313 = vst [vmem:[%s1223_s8 + $0x240] sm:$0xff] %v312_v8  ;;  %315 = vst [vmem:[%s1223_s8 + $0x248] sm:$0xff] %v314_v9  ;;  %v318_v11 = vld [vmem:[%s1218_s7 + $0x918] sm:$0xff]  ;;  %v320_v12 = vld [vmem:[%s1218_s7 + $0x920] sm:$0xff] }
  0x3d   : > { %317 = vst [vmem:[%s1223_s8 + $0x250] sm:$0xff] %v316_v10  ;;  %v322_v13 = vld [vmem:[%s1218_s7 + $0x928] sm:$0xff]  ;;  %319 = vst [vmem:[%s1223_s8 + $0x258] sm:$0xff] %v318_v11  ;;  %v324_v14 = vld [vmem:[%s1218_s7 + $0x930] sm:$0xff] }
  0x3e   : > { %321 = vst [vmem:[%s1223_s8 + $0x260] sm:$0xff] %v320_v12  ;;  %323 = vst [vmem:[%s1223_s8 + $0x268] sm:$0xff] %v322_v13  ;;  %v326_v15 = vld [vmem:[%s1218_s7 + $0x938] sm:$0xff]  ;;  %v328_v16 = vld [vmem:[%s1218_s7 + $0xa00] sm:$0xff] }
  0x3f   : > { %325 = vst [vmem:[%s1223_s8 + $0x270] sm:$0xff] %v324_v14  ;;  %327 = vst [vmem:[%s1223_s8 + $0x278] sm:$0xff] %v326_v15  ;;  %v330_v17 = vld [vmem:[%s1218_s7 + $0xa08] sm:$0xff]  ;;  %v332_v18 = vld [vmem:[%s1218_s7 + $0xa10] sm:$0xff] }
  0x40   : > { %329 = vst [vmem:[%s1223_s8 + $0x280] sm:$0xff] %v328_v16  ;;  %v334_v19 = vld [vmem:[%s1218_s7 + $0xa18] sm:$0xff]  ;;  %331 = vst [vmem:[%s1223_s8 + $0x288] sm:$0xff] %v330_v17  ;;  %v336_v20 = vld [vmem:[%s1218_s7 + $0xa20] sm:$0xff] }
  0x41   : > { %333 = vst [vmem:[%s1223_s8 + $0x290] sm:$0xff] %v332_v18  ;;  %335 = vst [vmem:[%s1223_s8 + $0x298] sm:$0xff] %v334_v19  ;;  %v338_v21 = vld [vmem:[%s1218_s7 + $0xa28] sm:$0xff]  ;;  %v340_v22 = vld [vmem:[%s1218_s7 + $0xa30] sm:$0xff] }
  0x42   : > { %337 = vst [vmem:[%s1223_s8 + $0x2a0] sm:$0xff] %v336_v20  ;;  %339 = vst [vmem:[%s1223_s8 + $0x2a8] sm:$0xff] %v338_v21  ;;  %v342_v23 = vld [vmem:[%s1218_s7 + $0xa38] sm:$0xff]  ;;  %v344_v24 = vld [vmem:[%s1218_s7 + $0xb00] sm:$0xff] }
  0x43   : > { %341 = vst [vmem:[%s1223_s8 + $0x2b0] sm:$0xff] %v340_v22  ;;  %v346_v25 = vld [vmem:[%s1218_s7 + $0xb08] sm:$0xff]  ;;  %343 = vst [vmem:[%s1223_s8 + $0x2b8] sm:$0xff] %v342_v23  ;;  %v348_v26 = vld [vmem:[%s1218_s7 + $0xb10] sm:$0xff] }
  0x44   : > { %345 = vst [vmem:[%s1223_s8 + $0x2c0] sm:$0xff] %v344_v24  ;;  %347 = vst [vmem:[%s1223_s8 + $0x2c8] sm:$0xff] %v346_v25  ;;  %v350_v27 = vld [vmem:[%s1218_s7 + $0xb18] sm:$0xff]  ;;  %v352_v28 = vld [vmem:[%s1218_s7 + $0xb20] sm:$0xff] }
  0x45   : > { %349 = vst [vmem:[%s1223_s8 + $0x2d0] sm:$0xff] %v348_v26  ;;  %351 = vst [vmem:[%s1223_s8 + $0x2d8] sm:$0xff] %v350_v27  ;;  %v354_v29 = vld [vmem:[%s1218_s7 + $0xb28] sm:$0xff]  ;;  %v356_v30 = vld [vmem:[%s1218_s7 + $0xb30] sm:$0xff] }
  0x46   : > { %353 = vst [vmem:[%s1223_s8 + $0x2e0] sm:$0xff] %v352_v28  ;;  %v358_v31 = vld [vmem:[%s1218_s7 + $0xb38] sm:$0xff]  ;;  %355 = vst [vmem:[%s1223_s8 + $0x2e8] sm:$0xff] %v354_v29  ;;  %v360_v32 = vld [vmem:[%s1218_s7 + $0xc00] sm:$0xff] }
  0x47   : > { %357 = vst [vmem:[%s1223_s8 + $0x2f0] sm:$0xff] %v356_v30  ;;  %359 = vst [vmem:[%s1223_s8 + $0x2f8] sm:$0xff] %v358_v31  ;;  %v362_v33 = vld [vmem:[%s1218_s7 + $0xc08] sm:$0xff]  ;;  %v364_v34 = vld [vmem:[%s1218_s7 + $0xc10] sm:$0xff] }
  0x48   : > { %361 = vst [vmem:[%s1223_s8 + $0x300] sm:$0xff] %v360_v32  ;;  %363 = vst [vmem:[%s1223_s8 + $0x308] sm:$0xff] %v362_v33  ;;  %v366_v35 = vld [vmem:[%s1218_s7 + $0xc18] sm:$0xff]  ;;  %v368_v36 = vld [vmem:[%s1218_s7 + $0xc20] sm:$0xff] }
  0x49   : > { %365 = vst [vmem:[%s1223_s8 + $0x310] sm:$0xff] %v364_v34  ;;  %v370_v37 = vld [vmem:[%s1218_s7 + $0xc28] sm:$0xff]  ;;  %367 = vst [vmem:[%s1223_s8 + $0x318] sm:$0xff] %v366_v35  ;;  %v372_v38 = vld [vmem:[%s1218_s7 + $0xc30] sm:$0xff] }
  0x4a   : > { %369 = vst [vmem:[%s1223_s8 + $0x320] sm:$0xff] %v368_v36  ;;  %371 = vst [vmem:[%s1223_s8 + $0x328] sm:$0xff] %v370_v37  ;;  %v374_v39 = vld [vmem:[%s1218_s7 + $0xc38] sm:$0xff]  ;;  %v376_v40 = vld [vmem:[%s1218_s7 + $0xd00] sm:$0xff] }
  0x4b   : > { %373 = vst [vmem:[%s1223_s8 + $0x330] sm:$0xff] %v372_v38  ;;  %375 = vst [vmem:[%s1223_s8 + $0x338] sm:$0xff] %v374_v39  ;;  %v378_v41 = vld [vmem:[%s1218_s7 + $0xd08] sm:$0xff]  ;;  %v380_v42 = vld [vmem:[%s1218_s7 + $0xd10] sm:$0xff] }
  0x4c   : > { %377 = vst [vmem:[%s1223_s8 + $0x340] sm:$0xff] %v376_v40  ;;  %v382_v43 = vld [vmem:[%s1218_s7 + $0xd18] sm:$0xff]  ;;  %379 = vst [vmem:[%s1223_s8 + $0x348] sm:$0xff] %v378_v41  ;;  %v384_v44 = vld [vmem:[%s1218_s7 + $0xd20] sm:$0xff] }
  0x4d   : > { %381 = vst [vmem:[%s1223_s8 + $0x350] sm:$0xff] %v380_v42  ;;  %383 = vst [vmem:[%s1223_s8 + $0x358] sm:$0xff] %v382_v43  ;;  %v386_v45 = vld [vmem:[%s1218_s7 + $0xd28] sm:$0xff]  ;;  %v388_v46 = vld [vmem:[%s1218_s7 + $0xd30] sm:$0xff] }
  0x4e   : > { %385 = vst [vmem:[%s1223_s8 + $0x360] sm:$0xff] %v384_v44  ;;  %387 = vst [vmem:[%s1223_s8 + $0x368] sm:$0xff] %v386_v45  ;;  %v390_v47 = vld [vmem:[%s1218_s7 + $0xd38] sm:$0xff] }
  0x4f   : > { %389 = vst [vmem:[%s1223_s8 + $0x370] sm:$0xff] %v388_v46  ;;  %391 = vst [vmem:[%s1223_s8 + $0x378] sm:$0xff] %v390_v47 }
  0x50 PF: > { %p1000_p7 = scmp.ge.s32.totalorder %s1134_s18, 1  ;;  %p396_p8 = scmp.lt.s32.totalorder %s1134_s18, 9 }
  0x52   : > { %p397_p9 = pnand %p1000_p7, %p396_p8 }
  0x53   : > { %s403_s9 = sand.u32 (!%p397_p9), 1, %s1110_s12   ;;  %s1001_s24 = sshll.u32 (!%p397_p9), %s1118_s14, 3 }
  0x54   : > { %400 = sbr.rel (%p397_p9) target bundleno = 352 (0x160), region = 51  ;;  %p432_p10 = scmp.lt.s32.totalorder (!%p397_p9), %s1122_s15, 1 }
  0x55   : > { %s1020_s10 = smul.u32 (!%p397_p9), 896, %s403_s9  ;;  %p434_p11 = scmp.lt.s32.totalorder (!%p397_p9), %s1001_s24, 31 }
  0x57   : > { %s1454_s22 = scalar_lea.vmem (!%p397_p9), [#allocation2], %s1020_s10 }
  0x59   : > { %v1136_v48 = vmov 0.0   ;;  %v554_v49 = vld [vmem:[%s1620_s2] sm:$0xf]  ;;  %vm564_vm0 = vcmask 1043456   ;;  %v1137_v50 = vmov 0   ;;  %v539_v55 = vld [vmem:[%s1454_s22 + $0x308] sm:$0xff] }
  0x5a   : > { %653 = vmatprep.mubr.f32.mxu0 %v1136_v48  ;;  %724 = vmatprep.mubr.f32.mxu1 %v1136_v48  ;;  %v547_v51 = vld [vmem:[%s1454_s22 + $0x348] sm:$0xf]  ;;  %v549_v52 = vld [vmem:[%s1454_s22 + $0x358] sm:$0xf]  ;;  %v546_v53 = vld [vmem:[%s1454_s22 + $0x340] sm:$0xf] }
  0x5b   : > { %1079 = vset.pattern.permute.xlu0 %v1137_v50  ;;  %1004 = vmatprep.subr.msk.mxu0 %vm564_vm0, %v547_v51  ;;  %v548_v54 = vld [vmem:[%s1454_s22 + $0x350] sm:$0xf]  ;;  %v541_v56 = vld [vmem:[%s1454_s22 + $0x318] sm:$0xff]  ;;  %v538_v57 = vld [vmem:[%s1454_s22 + $0x300] sm:$0xff]  ;;  %vm560_vm1 = vcmask 883712   ;;  %s1635_s15 = smov (!%p432_p10, %s1122_s15), 1 }
  0x5c   : > { %557 = vperm.xlu0 %1079, %v554_v49   ;;  %1007 = vmatprep.subr.msk.mxu1 %vm564_vm0, %v549_v52  ;;  %v540_v58 = vld [vmem:[%s1454_s22 + $0x310] sm:$0xff]  ;;  %v531_v59 = vld [vmem:[%s1454_s22 + $0x2c8] sm:$0xff]  ;;  %v533_v60 = vld [vmem:[%s1454_s22 + $0x2d8] sm:$0xff]  ;;  %s1637_s24 = smov (!%p434_p11, %s1001_s24), 31  ;;  %s1002_s26 = sshll.u32 %s1635_s15, 5 }
  0x5d   : > { %1005 = vmatpush1.msk.msra.mxu0 %vm564_vm0, %v546_v53  ;;  %1008 = vmatpush1.msk.msra.mxu1 %vm564_vm0, %v548_v54  ;;  %v530_v61 = vld [vmem:[%s1454_s22 + $0x2c0] sm:$0xff]  ;;  %v532_v62 = vld [vmem:[%s1454_s22 + $0x2d0] sm:$0xff]  ;;  %v523_v63 = vld [vmem:[%s1454_s22 + $0x288] sm:$0xff]  ;;  %s437_s27 = sadd.s32 %s1002_s26, %s1637_s24 }
  0x5e   : > { %595 = vmatprep.subr.mxu0 %v539_v55  ;;  %666 = vmatprep.subr.mxu1 %v541_v56  ;;  %v525_v0 = vld [vmem:[%s1454_s22 + $0x298] sm:$0xff]  ;;  %v522_v1 = vld [vmem:[%s1454_s22 + $0x280] sm:$0xff]  ;;  %v524_v2 = vld [vmem:[%s1454_s22 + $0x290] sm:$0xff]  ;;  %s1003_s28 = sshll.u32 %s437_s27, 2 }
  0x5f   : > { %596 = vmatpush1.msra.mxu0 %v538_v57  ;;  %667 = vmatpush1.msra.mxu1 %v540_v58  ;;  %v515_v3 = vld [vmem:[%s1454_s22 + $0x248] sm:$0xff]  ;;  %v517_v4 = vld [vmem:[%s1454_s22 + $0x258] sm:$0xff]  ;;  %v514_v5 = vld [vmem:[%s1454_s22 + $0x240] sm:$0xff]  ;;  %s439_s30 = scalar_lea.vmem %s1621_s3, %s1003_s28 }
  0x60   : > { %597 = vmatprep.subr.mxu0 %v531_v59  ;;  %668 = vmatprep.subr.mxu1 %v533_v60  ;;  %v516_v6 = vld [vmem:[%s1454_s22 + $0x250] sm:$0xff]  ;;  %v507_v7 = vld [vmem:[%s1454_s22 + $0x208] sm:$0xff]  ;;  %v509_v8 = vld [vmem:[%s1454_s22 + $0x218] sm:$0xff] }
  0x61   : > { %598 = vmatpush1.msra.mxu0 %v530_v61  ;;  %669 = vmatpush1.msra.mxu1 %v532_v62  ;;  %v506_v9 = vld [vmem:[%s1454_s22 + $0x200] sm:$0xff]  ;;  %v508_v10 = vld [vmem:[%s1454_s22 + $0x210] sm:$0xff]  ;;  %v499_v11 = vld [vmem:[%s1454_s22 + $0x1c8] sm:$0xff] }
  0x62   : > { %599 = vmatprep.subr.mxu0 %v523_v63  ;;  %670 = vmatprep.subr.mxu1 %v525_v0  ;;  %v501_v12 = vld [vmem:[%s1454_s22 + $0x1d8] sm:$0xff]  ;;  %v498_v13 = vld [vmem:[%s1454_s22 + $0x1c0] sm:$0xff]  ;;  %v500_v14 = vld [vmem:[%s1454_s22 + $0x1d0] sm:$0xff] }
  0x63   : > { %600 = vmatpush1.msra.mxu0 %v522_v1  ;;  %671 = vmatpush1.msra.mxu1 %v524_v2  ;;  %v491_v15 = vld [vmem:[%s1454_s22 + $0x188] sm:$0xff]  ;;  %v493_v16 = vld [vmem:[%s1454_s22 + $0x198] sm:$0xff]  ;;  %v490_v17 = vld [vmem:[%s1454_s22 + $0x180] sm:$0xff] }
  0x64   : > { %601 = vmatprep.subr.mxu0 %v515_v3  ;;  %672 = vmatprep.subr.mxu1 %v517_v4  ;;  %v492_v18 = vld [vmem:[%s1454_s22 + $0x190] sm:$0xff]  ;;  %v483_v19 = vld [vmem:[%s1454_s22 + $0x148] sm:$0xff]  ;;  %v485_v20 = vld [vmem:[%s1454_s22 + $0x158] sm:$0xff] }
  0x65   : > { %602 = vmatpush1.msra.mxu0 %v514_v5  ;;  %673 = vmatpush1.msra.mxu1 %v516_v6  ;;  %v482_v21 = vld [vmem:[%s1454_s22 + $0x140] sm:$0xff]  ;;  %v484_v22 = vld [vmem:[%s1454_s22 + $0x150] sm:$0xff]  ;;  %v475_v23 = vld [vmem:[%s1454_s22 + $0x108] sm:$0xff] }
  0x66   : > { %603 = vmatprep.subr.mxu0 %v507_v7  ;;  %674 = vmatprep.subr.mxu1 %v509_v8  ;;  %v477_v24 = vld [vmem:[%s1454_s22 + $0x118] sm:$0xff]  ;;  %v474_v25 = vld [vmem:[%s1454_s22 + $0x100] sm:$0xff]  ;;  %v476_v26 = vld [vmem:[%s1454_s22 + $0x110] sm:$0xff] }
  0x67   : > { %604 = vmatpush1.msra.mxu0 %v506_v9  ;;  %675 = vmatpush1.msra.mxu1 %v508_v10  ;;  %v467_v27 = vld [vmem:[%s1454_s22 + $0xc8] sm:$0xff]  ;;  %v469_v28 = vld [vmem:[%s1454_s22 + $0xd8] sm:$0xff]  ;;  %v466_v29 = vld [vmem:[%s1454_s22 + $0xc0] sm:$0xff] }
  0x68   : > { %605 = vmatprep.subr.mxu0 %v499_v11  ;;  %676 = vmatprep.subr.mxu1 %v501_v12  ;;  %v468_v30 = vld [vmem:[%s1454_s22 + $0xd0] sm:$0xff]  ;;  %v459_v31 = vld [vmem:[%s1454_s22 + $0x88] sm:$0xff]  ;;  %v461_v32 = vld [vmem:[%s1454_s22 + $0x98] sm:$0xff] }
  0x69   : > { %606 = vmatpush1.msra.mxu0 %v498_v13  ;;  %677 = vmatpush1.msra.mxu1 %v500_v14  ;;  %v458_v33 = vld [vmem:[%s1454_s22 + $0x80] sm:$0xff]  ;;  %v460_v34 = vld [vmem:[%s1454_s22 + $0x90] sm:$0xff]  ;;  %v451_v35 = vld [vmem:[%s1454_s22 + $0x48] sm:$0xff] }
  0x6a   : > { %607 = vmatprep.subr.mxu0 %v491_v15  ;;  %678 = vmatprep.subr.mxu1 %v493_v16  ;;  %v453_v36 = vld [vmem:[%s1454_s22 + $0x58] sm:$0xff]  ;;  %v450_v37 = vld [vmem:[%s1454_s22 + $0x40] sm:$0xff]  ;;  %v452_v38 = vld [vmem:[%s1454_s22 + $0x50] sm:$0xff] }
  0x6b   : > { %608 = vmatpush1.msra.mxu0 %v490_v17  ;;  %679 = vmatpush1.msra.mxu1 %v492_v18  ;;  %v443_v39 = vld [vmem:[%s1454_s22 + $0x8] sm:$0xff]  ;;  %v445_v40 = vld [vmem:[%s1454_s22 + $0x18] sm:$0xff]  ;;  %v442_v41 = vld [vmem:[%s1454_s22] sm:$0xff] }
  0x6c   : > { %609 = vmatprep.subr.mxu0 %v483_v19  ;;  %680 = vmatprep.subr.mxu1 %v485_v20  ;;  %v444_v42 = vld [vmem:[%s1454_s22 + $0x10] sm:$0xff]  ;;  %v1519_v43 = vld [vmem:[%s1619_s1] sm:$0xf]  ;;  %v551_v44 = vld [vmem:[%s1454_s22 + $0x368] sm:$0xf] }
  0x6d   : > { %610 = vmatpush1.msra.mxu0 %v482_v21  ;;  %681 = vmatpush1.msra.mxu1 %v484_v22  ;;  %v553_v45 = vld [vmem:[%s1454_s22 + $0x378] sm:$0xf]  ;;  %v550_v46 = vld [vmem:[%s1454_s22 + $0x360] sm:$0xf]  ;;  %v552_v47 = vld [vmem:[%s1454_s22 + $0x370] sm:$0xf] }
  0x6e   : > { %611 = vmatprep.subr.mxu0 %v475_v23  ;;  %682 = vmatprep.subr.mxu1 %v477_v24  ;;  %v543_v49 = vld [vmem:[%s1454_s22 + $0x328] sm:$0xff]  ;;  %v545_v50 = vld [vmem:[%s1454_s22 + $0x338] sm:$0xff]  ;;  %v542_v51 = vld [vmem:[%s1454_s22 + $0x320] sm:$0xff] }
  0x6f   : > { %612 = vmatpush1.msra.mxu0 %v474_v25  ;;  %683 = vmatpush1.msra.mxu1 %v476_v26  ;;  %v544_v52 = vld [vmem:[%s1454_s22 + $0x330] sm:$0xff]  ;;  %v535_v53 = vld [vmem:[%s1454_s22 + $0x2e8] sm:$0xff]  ;;  %v537_v54 = vld [vmem:[%s1454_s22 + $0x2f8] sm:$0xff] }
  0x70   : > { %613 = vmatprep.subr.mxu0 %v467_v27  ;;  %684 = vmatprep.subr.mxu1 %v469_v28  ;;  %v534_v55 = vld [vmem:[%s1454_s22 + $0x2e0] sm:$0xff]  ;;  %v536_v56 = vld [vmem:[%s1454_s22 + $0x2f0] sm:$0xff]  ;;  %v527_v57 = vld [vmem:[%s1454_s22 + $0x2a8] sm:$0xff] }
  0x71   : > { %614 = vmatpush1.msra.mxu0 %v466_v29  ;;  %685 = vmatpush1.msra.mxu1 %v468_v30  ;;  %v529_v58 = vld [vmem:[%s1454_s22 + $0x2b8] sm:$0xff]  ;;  %v526_v59 = vld [vmem:[%s1454_s22 + $0x2a0] sm:$0xff]  ;;  %v528_v60 = vld [vmem:[%s1454_s22 + $0x2b0] sm:$0xff] }
  0x72   : > { %615 = vmatprep.subr.mxu0 %v459_v31  ;;  %686 = vmatprep.subr.mxu1 %v461_v32  ;;  %v519_v61 = vld [vmem:[%s1454_s22 + $0x268] sm:$0xff]  ;;  %v521_v62 = vld [vmem:[%s1454_s22 + $0x278] sm:$0xff]  ;;  %v518_v63 = vld [vmem:[%s1454_s22 + $0x260] sm:$0xff] }
  0x73   : > { %616 = vmatpush1.msra.mxu0 %v458_v33  ;;  %687 = vmatpush1.msra.mxu1 %v460_v34  ;;  %v520_v0 = vld [vmem:[%s1454_s22 + $0x270] sm:$0xff]  ;;  %v511_v1 = vld [vmem:[%s1454_s22 + $0x228] sm:$0xff]  ;;  %v513_v2 = vld [vmem:[%s1454_s22 + $0x238] sm:$0xff] }
  0x74   : > { %617 = vmatprep.subr.mxu0 %v451_v35  ;;  %688 = vmatprep.subr.mxu1 %v453_v36  ;;  %v510_v3 = vld [vmem:[%s1454_s22 + $0x220] sm:$0xff]  ;;  %v512_v4 = vld [vmem:[%s1454_s22 + $0x230] sm:$0xff]  ;;  %v503_v5 = vld [vmem:[%s1454_s22 + $0x1e8] sm:$0xff] }
  0x75   : > { %618 = vmatpush1.msra.mxu0 %v450_v37  ;;  %689 = vmatpush1.msra.mxu1 %v452_v38  ;;  %v505_v6 = vld [vmem:[%s1454_s22 + $0x1f8] sm:$0xff]  ;;  %v502_v7 = vld [vmem:[%s1454_s22 + $0x1e0] sm:$0xff]  ;;  %v504_v8 = vld [vmem:[%s1454_s22 + $0x1f0] sm:$0xff] }
  0x76   : > { %619 = vmatprep.subr.mxu0 %v443_v39  ;;  %690 = vmatprep.subr.mxu1 %v445_v40  ;;  %v495_v9 = vld [vmem:[%s1454_s22 + $0x1a8] sm:$0xff]  ;;  %v497_v10 = vld [vmem:[%s1454_s22 + $0x1b8] sm:$0xff]  ;;  %v494_v11 = vld [vmem:[%s1454_s22 + $0x1a0] sm:$0xff] }
  0x77   : > { %620 = vmatpush1.msra.mxu0 %v442_v41  ;;  %691 = vmatpush1.msra.mxu1 %v444_v42  ;;  %v496_v12 = vld [vmem:[%s1454_s22 + $0x1b0] sm:$0xff]  ;;  %v487_v13 = vld [vmem:[%s1454_s22 + $0x168] sm:$0xff]  ;;  %v489_v14 = vld [vmem:[%s1454_s22 + $0x178] sm:$0xff] }
  0x78   : > { %1006 = vmatmul.mubr.msk.f32.vlgmr.msra.gmra.mxu0 %vm560_vm1, %v1519_v43  ;;  %1009 = vmatmul.mubr.msk.f32.vlgmr.msra.gmra.mxu1 %vm560_vm1, %v1519_v43  ;;  %v486_v15 = vld [vmem:[%s1454_s22 + $0x160] sm:$0xff]  ;;  %v488_v16 = vld [vmem:[%s1454_s22 + $0x170] sm:$0xff]  ;;  %v479_v17 = vld [vmem:[%s1454_s22 + $0x128] sm:$0xff] }
  0x79   : > { %1010 = vmatprep.subr.msk.mxu0 %vm564_vm0, %v551_v44  ;;  %1013 = vmatprep.subr.msk.mxu1 %vm564_vm0, %v553_v45  ;;  %v481_v18 = vld [vmem:[%s1454_s22 + $0x138] sm:$0xff]  ;;  %v478_v19 = vld [vmem:[%s1454_s22 + $0x120] sm:$0xff]  ;;  %v480_v20 = vld [vmem:[%s1454_s22 + $0x130] sm:$0xff] }
  0x7a   : > { %1011 = vmatpush1.msk.msra.mxu0 %vm564_vm0, %v550_v46  ;;  %1014 = vmatpush1.msk.msra.mxu1 %vm564_vm0, %v552_v47  ;;  %v471_v21 = vld [vmem:[%s1454_s22 + $0xe8] sm:$0xff]  ;;  %v473_v22 = vld [vmem:[%s1454_s22 + $0xf8] sm:$0xff]  ;;  %v470_v23 = vld [vmem:[%s1454_s22 + $0xe0] sm:$0xff] }
  0x7b   : > { %737 = vmatprep.subr.mxu0 %v543_v49  ;;  %808 = vmatprep.subr.mxu1 %v545_v50  ;;  %v472_v24 = vld [vmem:[%s1454_s22 + $0xf0] sm:$0xff]  ;;  %v463_v25 = vld [vmem:[%s1454_s22 + $0xa8] sm:$0xff]  ;;  %v465_v26 = vld [vmem:[%s1454_s22 + $0xb8] sm:$0xff] }
  0x7c   : > { %738 = vmatpush1.msra.mxu0 %v542_v51  ;;  %809 = vmatpush1.msra.mxu1 %v544_v52  ;;  %v462_v27 = vld [vmem:[%s1454_s22 + $0xa0] sm:$0xff]  ;;  %v464_v28 = vld [vmem:[%s1454_s22 + $0xb0] sm:$0xff]  ;;  %v455_v29 = vld [vmem:[%s1454_s22 + $0x68] sm:$0xff] }
  0x7d   : > { %739 = vmatprep.subr.mxu0 %v535_v53  ;;  %810 = vmatprep.subr.mxu1 %v537_v54  ;;  %v457_v30 = vld [vmem:[%s1454_s22 + $0x78] sm:$0xff]  ;;  %v454_v31 = vld [vmem:[%s1454_s22 + $0x60] sm:$0xff]  ;;  %v456_v32 = vld [vmem:[%s1454_s22 + $0x70] sm:$0xff] }
  0x7e   : > { %740 = vmatpush1.msra.mxu0 %v534_v55  ;;  %811 = vmatpush1.msra.mxu1 %v536_v56  ;;  %v447_v33 = vld [vmem:[%s1454_s22 + $0x28] sm:$0xff]  ;;  %v449_v34 = vld [vmem:[%s1454_s22 + $0x38] sm:$0xff]  ;;  %v446_v35 = vld [vmem:[%s1454_s22 + $0x20] sm:$0xff] }
  0x7f   : > { %741 = vmatprep.subr.mxu0 %v527_v57  ;;  %812 = vmatprep.subr.mxu1 %v529_v58  ;;  %v448_v36 = vld [vmem:[%s1454_s22 + $0x30] sm:$0xff] }
  0x80   : > { %742 = vmatpush1.msra.mxu0 %v526_v59  ;;  %813 = vmatpush1.msra.mxu1 %v528_v60 }
  0x81   : > { %743 = vmatprep.subr.mxu0 %v519_v61  ;;  %814 = vmatprep.subr.mxu1 %v521_v62 }
  0x82   : > { %744 = vmatpush1.msra.mxu0 %v518_v63  ;;  %815 = vmatpush1.msra.mxu1 %v520_v0 }
  0x83   : > { %745 = vmatprep.subr.mxu0 %v511_v1  ;;  %816 = vmatprep.subr.mxu1 %v513_v2 }
  0x84   : > { %746 = vmatpush1.msra.mxu0 %v510_v3  ;;  %817 = vmatpush1.msra.mxu1 %v512_v4 }
  0x85   : > { %747 = vmatprep.subr.mxu0 %v503_v5  ;;  %818 = vmatprep.subr.mxu1 %v505_v6 }
  0x86   : > { %748 = vmatpush1.msra.mxu0 %v502_v7  ;;  %819 = vmatpush1.msra.mxu1 %v504_v8 }
  0x87   : > { %749 = vmatprep.subr.mxu0 %v495_v9  ;;  %820 = vmatprep.subr.mxu1 %v497_v10 }
  0x88   : > { %750 = vmatpush1.msra.mxu0 %v494_v11  ;;  %821 = vmatpush1.msra.mxu1 %v496_v12 }
  0x89   : > { %751 = vmatprep.subr.mxu0 %v487_v13  ;;  %822 = vmatprep.subr.mxu1 %v489_v14 }
  0x8a   : > { %752 = vmatpush1.msra.mxu0 %v486_v15  ;;  %823 = vmatpush1.msra.mxu1 %v488_v16 }
  0x8b   : > { %753 = vmatprep.subr.mxu0 %v479_v17  ;;  %824 = vmatprep.subr.mxu1 %v481_v18 }
  0x8c   : > { %754 = vmatpush1.msra.mxu0 %v478_v19  ;;  %825 = vmatpush1.msra.mxu1 %v480_v20 }
  0x8d   : > { %755 = vmatprep.subr.mxu0 %v471_v21  ;;  %826 = vmatprep.subr.mxu1 %v473_v22 }
  0x8e   : > { %756 = vmatpush1.msra.mxu0 %v470_v23  ;;  %827 = vmatpush1.msra.mxu1 %v472_v24 }
  0x8f   : > { %757 = vmatprep.subr.mxu0 %v463_v25  ;;  %828 = vmatprep.subr.mxu1 %v465_v26 }
  0x90   : > { %758 = vmatpush1.msra.mxu0 %v462_v27  ;;  %829 = vmatpush1.msra.mxu1 %v464_v28 }
  0x91   : > { %759 = vmatprep.subr.mxu0 %v455_v29  ;;  %830 = vmatprep.subr.mxu1 %v457_v30 }
  0x92   : > { %760 = vmatpush1.msra.mxu0 %v454_v31  ;;  %831 = vmatpush1.msra.mxu1 %v456_v32 }
  0x93   : > { %761 = vmatprep.subr.mxu0 %v447_v33  ;;  %832 = vmatprep.subr.mxu1 %v449_v34 }
  0x94   : > { %762 = vmatpush1.msra.mxu0 %v446_v35  ;;  %795 = vmatprep.mubr.f32.mxu0 %v1136_v48 }
  0x95   : > { %833 = vmatpush1.msra.mxu1 %v448_v36  ;;  %866 = vmatprep.mubr.f32.mxu1 %v1136_v48 }
  0x96   : > { %1012 = vmatmul.mubr.msk.f32.vlgmr.msra.gmra.mxu0 %vm560_vm1, %v1519_v43  ;;  %1015 = vmatmul.mubr.msk.f32.vlgmr.msra.gmra.mxu1 %vm560_vm1, %v1519_v43 }
  0xd7   : > { %v558_v37 = vpop.permute.xlu0 %557 }
 0x138   : > { %v655_v38 = vpop.f32.mrf.mxu0  ;;  %v726_v39 = vpop.f32.mrf.mxu1 }
 0x139   : > { %v656_v40 = vadd.f32 %v655_v38, %v558_v37  ;;  %v727_v41 = vadd.f32 %v726_v39, %v558_v37 }
 0x13a   : > { %v657_v42 = vpop.f32.mrf.mxu0  ;;  %v728_v48 = vpop.f32.mrf.mxu1 }
 0x13b   : > { %v658_v44 = vadd.f32 %v657_v42, %v558_v37  ;;  %v873_v45 = vmax.f32 %v656_v40, 0.0  ;;  %v729_v46 = vadd.f32 %v728_v48, %v558_v37  ;;  %v875_v47 = vmax.f32 %v727_v41, 0.0 }
 0x13d   : > { %v874_v43 = vmax.f32 %v658_v44, 0.0  ;;  %v876_v49 = vmax.f32 %v729_v46, 0.0 }
 0x13f   : > { %v889_v50 = vcombine.low %v873_v45, %v874_v43  ;;  %v890_v51 = vcombine.low %v875_v47, %v876_v49 }
 0x141   : > { %897 = vst [vmem:[%s439_s30] sm:$0xff] %v889_v50  ;;  %898 = vst [vmem:[%s439_s30 + $0x8] sm:$0xff] %v890_v51 }
 0x156   : > { %v797_v52 = vpop.f32.mrf.mxu0  ;;  %v868_v53 = vpop.f32.mrf.mxu1 }
 0x157   : > { %v798_v54 = vadd.f32 %v797_v52, %v558_v37  ;;  %v869_v55 = vadd.f32 %v868_v53, %v558_v37 }
 0x158   : > { %v799_v56 = vpop.f32.mrf.mxu0  ;;  %v870_v57 = vpop.f32.mrf.mxu1 }
 0x159   : > { %v800_v58 = vadd.f32 %v799_v56, %v558_v37  ;;  %v871_v59 = vadd.f32 %v870_v57, %v558_v37  ;;  %v877_v60 = vmax.f32 %v798_v54, 0.0  ;;  %v879_v61 = vmax.f32 %v869_v55, 0.0 }
 0x15b   : > { %v878_v62 = vmax.f32 %v800_v58, 0.0  ;;  %v880_v63 = vmax.f32 %v871_v59, 0.0 }
 0x15d   : > { %v891_v0 = vcombine.low %v877_v60, %v878_v62  ;;  %v892_v1 = vcombine.low %v879_v61, %v880_v63 }
 0x15f   : > { %899 = vst [vmem:[%s439_s30 + $0x10] sm:$0xff] %v891_v0  ;;  %900 = vst [vmem:[%s439_s30 + $0x18] sm:$0xff] %v892_v1 }
 0x160 PF: > { %s13_s18 = sadd.s32 1, %s1134_s18   ;;  %s1622_s12 = smov %s1114_s13 }
 0x161   : > { %p10_p12 = scmp.ge.s32.totalorder %s13_s18, 10   ;;  %s1623_s13 = smov %s1209_s25 }
 0x162   : > { %s1624_s14 = smov %s1126_s16  ;;  %s1625_s15 = smov %s1130_s17 }
 0x163   : > { %s1626_s16 = smov %s1629_s19  ;;  %s1627_s17 = smov %s1633_s20 }
 0x164   :  { %12 = sbr.rel (!%p10_p12) target bundleno = 4 (0x4), region = 90 }

// kernel: transformer_forward.9
= control target key start
LH: loop header
LB: loop body
LE: loop exit
PB: predicated region body
PF: predicated region fallthrough
CT: control target
= control target key end

     0   :  { %s618_s12 = smov 0   ;;  %s620_s13 = smov 0   ;;  %s719_s0 = inlined_call_operand.vmem [shape: f32[2,108,512], index: 0, kind: input, shape index: {}]   ;;  %s720_s1 = inlined_call_operand.vmem [shape: f32[8,108], index: 1, kind: input, shape index: {}]   ;;  %s721_s2 = inlined_call_operand.vmem [shape: f32[8,1], index: 2, kind: input, shape index: {}]   ;;  %s722_s3 = inlined_call_operand.vmem [shape: f32[2,8,512], index: 3, kind: output, shape index: {}]  }
   0x1   :  { %s622_s14 = smov 0  }
   0x2 LB: > { %s25_s15 = sadd.s32 1, %s590_s13  ;;  %p531_p0 = scmp.ge.s32.totalorder %s594_s14, 1  ;;  %s594_s14 = sphi %s622_s14, %s13_s14   ;;  %s590_s13 = sphi %s620_s13, %s724_s13   ;;  %s586_s12 = sphi %s618_s12, %s723_s12  }
   0x3   : > { %p27_p1 = scmp.ge.s32.totalorder %s25_s15, 2  ;;  %p158_p2 = scmp.lt.s32.totalorder %s594_s14, 3 }
   0x5   : > { %s726_s15 = smov (%p27_p1, %s25_s15), 0  ;;  %p159_p3 = pnand %p531_p0, %p158_p2 }
   0x6   : > { %p191_p4 = scmp.lt.s32.totalorder (!%p159_p3), %s586_s12, 1 }
   0x7   : > { %162 = sbr.rel (%p159_p3) target bundleno = 245 (0xf5), region = 32 }
   0xc   : > { %v596_v0 = vmov 0.0   ;;  %v267_v1 = vld [vmem:[%s721_s2] sm:$0xff]  ;;  %s728_s12 = smov (!%p191_p4, %s586_s12), 1  ;;  %v597_v2 = vmov 0   ;;  %vm277_vm0 = vcmask 1043456   ;;  %vm273_vm1 = vcmask 883712  }
   0xd   : > { %354 = vmatprep.mubr.f32.mxu0 %v596_v0  ;;  %425 = vmatprep.mubr.f32.mxu1 %v596_v0  ;;  %s544_s18 = smul.u32 448, %s728_s12  ;;  %v210_v59 = vld [vmem:[%s720_s1] sm:$0xff]  ;;  %s543_s24 = sshll.u32 %s728_s12, 5 }
   0xe   : > { %571 = vset.pattern.permute.xlu0 %v597_v2  ;;  %s208_s27 = scalar_lea.vmem %s722_s3, %s543_s24 }
   0xf   : > { %270 = vperm.xlu0 %571, %v267_v1   ;;  %s645_s21 = scalar_lea.vmem %s719_s0, %s544_s18 }
  0x10   : > { %v264_v3 = vld [vmem:[%s645_s21 + $0x1a8] sm:$0xf]  ;;  %v266_v4 = vld [vmem:[%s645_s21 + $0x1b8] sm:$0xf]  ;;  %v263_v5 = vld [vmem:[%s645_s21 + $0x1a0] sm:$0xf] }
  0x11   : > { %535 = vmatprep.subr.msk.mxu0 %vm277_vm0, %v264_v3  ;;  %538 = vmatprep.subr.msk.mxu1 %vm277_vm0, %v266_v4  ;;  %v265_v6 = vld [vmem:[%s645_s21 + $0x1b0] sm:$0xf]  ;;  %v260_v7 = vld [vmem:[%s645_s21 + $0x188] sm:$0xff]  ;;  %v262_v8 = vld [vmem:[%s645_s21 + $0x198] sm:$0xff] }
  0x12   : > { %536 = vmatpush1.msk.msra.mxu0 %vm277_vm0, %v263_v5  ;;  %539 = vmatpush1.msk.msra.mxu1 %vm277_vm0, %v265_v6  ;;  %v259_v9 = vld [vmem:[%s645_s21 + $0x180] sm:$0xff]  ;;  %v261_v10 = vld [vmem:[%s645_s21 + $0x190] sm:$0xff]  ;;  %v256_v11 = vld [vmem:[%s645_s21 + $0x168] sm:$0xff] }
  0x13   : > { %296 = vmatprep.subr.mxu0 %v260_v7  ;;  %367 = vmatprep.subr.mxu1 %v262_v8  ;;  %v258_v12 = vld [vmem:[%s645_s21 + $0x178] sm:$0xff]  ;;  %v255_v13 = vld [vmem:[%s645_s21 + $0x160] sm:$0xff]  ;;  %v257_v14 = vld [vmem:[%s645_s21 + $0x170] sm:$0xff] }
  0x14   : > { %297 = vmatpush1.msra.mxu0 %v259_v9  ;;  %368 = vmatpush1.msra.mxu1 %v261_v10  ;;  %v252_v15 = vld [vmem:[%s645_s21 + $0x148] sm:$0xff]  ;;  %v254_v16 = vld [vmem:[%s645_s21 + $0x158] sm:$0xff]  ;;  %v251_v17 = vld [vmem:[%s645_s21 + $0x140] sm:$0xff] }
  0x15   : > { %298 = vmatprep.subr.mxu0 %v256_v11  ;;  %369 = vmatprep.subr.mxu1 %v258_v12  ;;  %v253_v18 = vld [vmem:[%s645_s21 + $0x150] sm:$0xff]  ;;  %v248_v19 = vld [vmem:[%s645_s21 + $0x128] sm:$0xff]  ;;  %v250_v20 = vld [vmem:[%s645_s21 + $0x138] sm:$0xff] }
  0x16   : > { %299 = vmatpush1.msra.mxu0 %v255_v13  ;;  %370 = vmatpush1.msra.mxu1 %v257_v14  ;;  %v247_v21 = vld [vmem:[%s645_s21 + $0x120] sm:$0xff]  ;;  %v249_v22 = vld [vmem:[%s645_s21 + $0x130] sm:$0xff]  ;;  %v244_v23 = vld [vmem:[%s645_s21 + $0x108] sm:$0xff] }
  0x17   : > { %300 = vmatprep.subr.mxu0 %v252_v15  ;;  %371 = vmatprep.subr.mxu1 %v254_v16  ;;  %v246_v24 = vld [vmem:[%s645_s21 + $0x118] sm:$0xff]  ;;  %v243_v25 = vld [vmem:[%s645_s21 + $0x100] sm:$0xff]  ;;  %v245_v26 = vld [vmem:[%s645_s21 + $0x110] sm:$0xff] }
  0x18   : > { %301 = vmatpush1.msra.mxu0 %v251_v17  ;;  %372 = vmatpush1.msra.mxu1 %v253_v18  ;;  %v240_v27 = vld [vmem:[%s645_s21 + $0xe8] sm:$0xff]  ;;  %v242_v28 = vld [vmem:[%s645_s21 + $0xf8] sm:$0xff]  ;;  %v239_v29 = vld [vmem:[%s645_s21 + $0xe0] sm:$0xff] }
  0x19   : > { %302 = vmatprep.subr.mxu0 %v248_v19  ;;  %373 = vmatprep.subr.mxu1 %v250_v20  ;;  %v241_v30 = vld [vmem:[%s645_s21 + $0xf0] sm:$0xff]  ;;  %v236_v31 = vld [vmem:[%s645_s21 + $0xc8] sm:$0xff]  ;;  %v238_v32 = vld [vmem:[%s645_s21 + $0xd8] sm:$0xff] }
  0x1a   : > { %303 = vmatpush1.msra.mxu0 %v247_v21  ;;  %374 = vmatpush1.msra.mxu1 %v249_v22  ;;  %v235_v33 = vld [vmem:[%s645_s21 + $0xc0] sm:$0xff]  ;;  %v237_v34 = vld [vmem:[%s645_s21 + $0xd0] sm:$0xff]  ;;  %v232_v35 = vld [vmem:[%s645_s21 + $0xa8] sm:$0xff] }
  0x1b   : > { %304 = vmatprep.subr.mxu0 %v244_v23  ;;  %375 = vmatprep.subr.mxu1 %v246_v24  ;;  %v234_v36 = vld [vmem:[%s645_s21 + $0xb8] sm:$0xff]  ;;  %v231_v37 = vld [vmem:[%s645_s21 + $0xa0] sm:$0xff]  ;;  %v233_v38 = vld [vmem:[%s645_s21 + $0xb0] sm:$0xff] }
  0x1c   : > { %305 = vmatpush1.msra.mxu0 %v243_v25  ;;  %376 = vmatpush1.msra.mxu1 %v245_v26  ;;  %v228_v39 = vld [vmem:[%s645_s21 + $0x88] sm:$0xff]  ;;  %v230_v40 = vld [vmem:[%s645_s21 + $0x98] sm:$0xff]  ;;  %v227_v41 = vld [vmem:[%s645_s21 + $0x80] sm:$0xff] }
  0x1d   : > { %306 = vmatprep.subr.mxu0 %v240_v27  ;;  %377 = vmatprep.subr.mxu1 %v242_v28  ;;  %v229_v42 = vld [vmem:[%s645_s21 + $0x90] sm:$0xff]  ;;  %v224_v43 = vld [vmem:[%s645_s21 + $0x68] sm:$0xff]  ;;  %v226_v44 = vld [vmem:[%s645_s21 + $0x78] sm:$0xff] }
  0x1e   : > { %307 = vmatpush1.msra.mxu0 %v239_v29  ;;  %378 = vmatpush1.msra.mxu1 %v241_v30  ;;  %v223_v45 = vld [vmem:[%s645_s21 + $0x60] sm:$0xff]  ;;  %v225_v46 = vld [vmem:[%s645_s21 + $0x70] sm:$0xff]  ;;  %v220_v47 = vld [vmem:[%s645_s21 + $0x48] sm:$0xff] }
  0x1f   : > { %308 = vmatprep.subr.mxu0 %v236_v31  ;;  %379 = vmatprep.subr.mxu1 %v238_v32  ;;  %v222_v48 = vld [vmem:[%s645_s21 + $0x58] sm:$0xff]  ;;  %v219_v49 = vld [vmem:[%s645_s21 + $0x40] sm:$0xff]  ;;  %v221_v50 = vld [vmem:[%s645_s21 + $0x50] sm:$0xff] }
  0x20   : > { %309 = vmatpush1.msra.mxu0 %v235_v33  ;;  %380 = vmatpush1.msra.mxu1 %v237_v34  ;;  %v216_v51 = vld [vmem:[%s645_s21 + $0x28] sm:$0xff]  ;;  %v218_v52 = vld [vmem:[%s645_s21 + $0x38] sm:$0xff]  ;;  %v215_v53 = vld [vmem:[%s645_s21 + $0x20] sm:$0xff] }
  0x21   : > { %310 = vmatprep.subr.mxu0 %v232_v35  ;;  %381 = vmatprep.subr.mxu1 %v234_v36  ;;  %v217_v54 = vld [vmem:[%s645_s21 + $0x30] sm:$0xff]  ;;  %v212_v55 = vld [vmem:[%s645_s21 + $0x8] sm:$0xff]  ;;  %v214_v56 = vld [vmem:[%s645_s21 + $0x18] sm:$0xff] }
  0x22   : > { %311 = vmatpush1.msra.mxu0 %v231_v37  ;;  %382 = vmatpush1.msra.mxu1 %v233_v38  ;;  %v211_v57 = vld [vmem:[%s645_s21] sm:$0xff]  ;;  %v213_v58 = vld [vmem:[%s645_s21 + $0x10] sm:$0xff] }
  0x23   : > { %312 = vmatprep.subr.mxu0 %v228_v39  ;;  %383 = vmatprep.subr.mxu1 %v230_v40 }
  0x24   : > { %313 = vmatpush1.msra.mxu0 %v227_v41  ;;  %384 = vmatpush1.msra.mxu1 %v229_v42 }
  0x25   : > { %314 = vmatprep.subr.mxu0 %v224_v43  ;;  %385 = vmatprep.subr.mxu1 %v226_v44 }
  0x26   : > { %315 = vmatpush1.msra.mxu0 %v223_v45  ;;  %386 = vmatpush1.msra.mxu1 %v225_v46 }
  0x27   : > { %316 = vmatprep.subr.mxu0 %v220_v47  ;;  %387 = vmatprep.subr.mxu1 %v222_v48 }
  0x28   : > { %317 = vmatpush1.msra.mxu0 %v219_v49  ;;  %388 = vmatpush1.msra.mxu1 %v221_v50 }
  0x29   : > { %318 = vmatprep.subr.mxu0 %v216_v51  ;;  %389 = vmatprep.subr.mxu1 %v218_v52 }
  0x2a   : > { %319 = vmatpush1.msra.mxu0 %v215_v53  ;;  %390 = vmatpush1.msra.mxu1 %v217_v54 }
  0x2b   : > { %320 = vmatprep.subr.mxu0 %v212_v55  ;;  %391 = vmatprep.subr.mxu1 %v214_v56 }
  0x2c   : > { %321 = vmatpush1.msra.mxu0 %v211_v57  ;;  %392 = vmatpush1.msra.mxu1 %v213_v58 }
  0x2d   : > { %537 = vmatmul.mubr.msk.f32.vlgmr.msra.gmra.mxu0 %vm273_vm1, %v210_v59  ;;  %540 = vmatmul.mubr.msk.f32.vlgmr.msra.gmra.mxu1 %vm273_vm1, %v210_v59 }
  0x8a   : > { %v271_v60 = vpop.permute.xlu0 %270 }
  0xed   : > { %v356_v61 = vpop.f32.mrf.mxu0  ;;  %v427_v62 = vpop.f32.mrf.mxu1 }
  0xee   : > { %v357_v63 = vadd.f32 %v356_v61, %v271_v60  ;;  %v428_v0 = vadd.f32 %v427_v62, %v271_v60 }
  0xef   : > { %v358_v1 = vpop.f32.mrf.mxu0  ;;  %v429_v2 = vpop.f32.mrf.mxu1 }
  0xf0   : > { %v432_v3 = vmax.f32 %v357_v63, 0.0  ;;  %v434_v4 = vmax.f32 %v428_v0, 0.0  ;;  %v359_v5 = vadd.f32 %v358_v1, %v271_v60  ;;  %v430_v6 = vadd.f32 %v429_v2, %v271_v60 }
  0xf2   : > { %436 = vst [vmem:[%s208_s27] sm:$0xff] %v432_v3  ;;  %438 = vst [vmem:[%s208_s27 + $0x10] sm:$0xff] %v434_v4  ;;  %v433_v7 = vmax.f32 %v359_v5, 0.0  ;;  %v435_v8 = vmax.f32 %v430_v6, 0.0 }
  0xf4   : > { %437 = vst [vmem:[%s208_s27 + $0x8] sm:$0xff] %v433_v7  ;;  %439 = vst [vmem:[%s208_s27 + $0x18] sm:$0xff] %v435_v8 }
  0xf5 PF: > { %s13_s14 = sadd.s32 1, %s594_s14   ;;  %s723_s12 = smov %s590_s13 }
  0xf6   : > { %p10_p5 = scmp.ge.s32.totalorder %s13_s14, 4   ;;  %s724_s13 = smov %s726_s15 }
  0xf8   :  { %12 = sbr.rel (!%p10_p5) target bundleno = 2 (0x2), region = 62 }

// kernel: transformer_forward.10
= control target key start
LH: loop header
LB: loop body
LE: loop exit
PB: predicated region body
PF: predicated region fallthrough
CT: control target
= control target key end

     0   :  { %s652_s12 = smov 0   ;;  %s654_s13 = smov 0   ;;  %s808_s0 = inlined_call_operand.vmem [shape: f32[2,216,512], index: 0, kind: input, shape index: {}]   ;;  %s809_s1 = inlined_call_operand.vmem [shape: f32[8,216], index: 1, kind: input, shape index: {}]   ;;  %s810_s2 = inlined_call_operand.vmem [shape: f32[8,1], index: 2, kind: input, shape index: {}]   ;;  %s811_s3 = inlined_call_operand.vmem [shape: f32[2,8,512], index: 3, kind: output, shape index: {}]  }
   0x1   :  { %s656_s14 = smov 0  }
   0x2 LB: > { %s25_s15 = sadd.s32 1, %s625_s13  ;;  %p571_p0 = scmp.ge.s32.totalorder %s629_s14, 1  ;;  %s629_s14 = sphi %s656_s14, %s13_s14   ;;  %s625_s13 = sphi %s654_s13, %s813_s13   ;;  %s621_s12 = sphi %s652_s12, %s812_s12  }
   0x3   : > { %p27_p1 = scmp.ge.s32.totalorder %s25_s15, 2  ;;  %p158_p2 = scmp.lt.s32.totalorder %s629_s14, 3 }
   0x5   : > { %s815_s15 = smov (%p27_p1, %s25_s15), 0  ;;  %p159_p3 = pnand %p571_p0, %p158_p2 }
   0x6   : > { %p191_p4 = scmp.lt.s32.totalorder (!%p159_p3), %s621_s12, 1 }
   0x7   : > { %162 = sbr.rel (%p159_p3) target bundleno = 271 (0x10f), region = 32 }
   0xc   : > { %v211_v0 = vld [vmem:[%s809_s1 + $0x8] sm:$0xff]  ;;  %vm326_vm0 = vcmask 719872   ;;  %v320_v1 = vld [vmem:[%s810_s2] sm:$0xff]  ;;  %s817_s12 = smov (!%p191_p4, %s621_s12), 1  ;;  %v631_v2 = vmov 0  }
   0xd   : > { %575 = vmatprep.mubr.msk.f32.mxu0 %vm326_vm0, %v211_v0  ;;  %576 = vmatprep.mubr.msk.f32.mxu1 %vm326_vm0, %v211_v0  ;;  %s580_s20 = smul.u32 864, %s817_s12  ;;  %s579_s26 = sshll.u32 %s817_s12, 5 }
   0xe   : > { %606 = vset.pattern.permute.xlu0 %v631_v2  ;;  %s208_s29 = scalar_lea.vmem %s811_s3, %s579_s26 }
   0xf   : > { %323 = vperm.xlu0 %606, %v320_v1   ;;  %s682_s23 = scalar_lea.vmem %s808_s0, %s580_s20 }
  0x10   : > { %v273_v3 = vld [vmem:[%s682_s23 + $0x1e8] sm:$0xff]  ;;  %v275_v4 = vld [vmem:[%s682_s23 + $0x1f8] sm:$0xff]  ;;  %v272_v5 = vld [vmem:[%s682_s23 + $0x1e0] sm:$0xff] }
  0x11   : > { %330 = vmatprep.subr.mxu0 %v273_v3  ;;  %401 = vmatprep.subr.mxu1 %v275_v4  ;;  %v274_v6 = vld [vmem:[%s682_s23 + $0x1f0] sm:$0xff]  ;;  %v269_v7 = vld [vmem:[%s682_s23 + $0x1c8] sm:$0xff]  ;;  %v271_v8 = vld [vmem:[%s682_s23 + $0x1d8] sm:$0xff] }
  0x12   : > { %331 = vmatpush1.msra.mxu0 %v272_v5  ;;  %402 = vmatpush1.msra.mxu1 %v274_v6  ;;  %v268_v9 = vld [vmem:[%s682_s23 + $0x1c0] sm:$0xff]  ;;  %v270_v10 = vld [vmem:[%s682_s23 + $0x1d0] sm:$0xff]  ;;  %v265_v11 = vld [vmem:[%s682_s23 + $0x1a8] sm:$0xff] }
  0x13   : > { %332 = vmatprep.subr.mxu0 %v269_v7  ;;  %403 = vmatprep.subr.mxu1 %v271_v8  ;;  %v267_v12 = vld [vmem:[%s682_s23 + $0x1b8] sm:$0xff]  ;;  %v264_v13 = vld [vmem:[%s682_s23 + $0x1a0] sm:$0xff]  ;;  %v266_v14 = vld [vmem:[%s682_s23 + $0x1b0] sm:$0xff] }
  0x14   : > { %333 = vmatpush1.msra.mxu0 %v268_v9  ;;  %404 = vmatpush1.msra.mxu1 %v270_v10  ;;  %v261_v15 = vld [vmem:[%s682_s23 + $0x188] sm:$0xff]  ;;  %v263_v16 = vld [vmem:[%s682_s23 + $0x198] sm:$0xff]  ;;  %v260_v17 = vld [vmem:[%s682_s23 + $0x180] sm:$0xff] }
  0x15   : > { %334 = vmatprep.subr.mxu0 %v265_v11  ;;  %405 = vmatprep.subr.mxu1 %v267_v12  ;;  %v262_v18 = vld [vmem:[%s682_s23 + $0x190] sm:$0xff]  ;;  %v257_v19 = vld [vmem:[%s682_s23 + $0x168] sm:$0xff]  ;;  %v259_v20 = vld [vmem:[%s682_s23 + $0x178] sm:$0xff] }
  0x16   : > { %335 = vmatpush1.msra.mxu0 %v264_v13  ;;  %406 = vmatpush1.msra.mxu1 %v266_v14  ;;  %v256_v21 = vld [vmem:[%s682_s23 + $0x160] sm:$0xff]  ;;  %v258_v22 = vld [vmem:[%s682_s23 + $0x170] sm:$0xff]  ;;  %v253_v23 = vld [vmem:[%s682_s23 + $0x148] sm:$0xff] }
  0x17   : > { %336 = vmatprep.subr.mxu0 %v261_v15  ;;  %407 = vmatprep.subr.mxu1 %v263_v16  ;;  %v255_v24 = vld [vmem:[%s682_s23 + $0x158] sm:$0xff]  ;;  %v252_v25 = vld [vmem:[%s682_s23 + $0x140] sm:$0xff]  ;;  %v254_v26 = vld [vmem:[%s682_s23 + $0x150] sm:$0xff] }
  0x18   : > { %337 = vmatpush1.msra.mxu0 %v260_v17  ;;  %408 = vmatpush1.msra.mxu1 %v262_v18  ;;  %v249_v27 = vld [vmem:[%s682_s23 + $0x128] sm:$0xff]  ;;  %v251_v28 = vld [vmem:[%s682_s23 + $0x138] sm:$0xff]  ;;  %v248_v29 = vld [vmem:[%s682_s23 + $0x120] sm:$0xff] }
  0x19   : > { %338 = vmatprep.subr.mxu0 %v257_v19  ;;  %409 = vmatprep.subr.mxu1 %v259_v20  ;;  %v250_v30 = vld [vmem:[%s682_s23 + $0x130] sm:$0xff]  ;;  %v245_v31 = vld [vmem:[%s682_s23 + $0x108] sm:$0xff]  ;;  %v247_v32 = vld [vmem:[%s682_s23 + $0x118] sm:$0xff] }
  0x1a   : > { %339 = vmatpush1.msra.mxu0 %v256_v21  ;;  %410 = vmatpush1.msra.mxu1 %v258_v22  ;;  %v244_v33 = vld [vmem:[%s682_s23 + $0x100] sm:$0xff]  ;;  %v246_v34 = vld [vmem:[%s682_s23 + $0x110] sm:$0xff]  ;;  %v241_v35 = vld [vmem:[%s682_s23 + $0xe8] sm:$0xff] }
  0x1b   : > { %340 = vmatprep.subr.mxu0 %v253_v23  ;;  %411 = vmatprep.subr.mxu1 %v255_v24  ;;  %v243_v36 = vld [vmem:[%s682_s23 + $0xf8] sm:$0xff]  ;;  %v240_v37 = vld [vmem:[%s682_s23 + $0xe0] sm:$0xff]  ;;  %v242_v38 = vld [vmem:[%s682_s23 + $0xf0] sm:$0xff] }
  0x1c   : > { %341 = vmatpush1.msra.mxu0 %v252_v25  ;;  %412 = vmatpush1.msra.mxu1 %v254_v26  ;;  %v237_v39 = vld [vmem:[%s682_s23 + $0xc8] sm:$0xff]  ;;  %v239_v40 = vld [vmem:[%s682_s23 + $0xd8] sm:$0xff]  ;;  %v236_v41 = vld [vmem:[%s682_s23 + $0xc0] sm:$0xff] }
  0x1d   : > { %342 = vmatprep.subr.mxu0 %v249_v27  ;;  %413 = vmatprep.subr.mxu1 %v251_v28  ;;  %v238_v42 = vld [vmem:[%s682_s23 + $0xd0] sm:$0xff]  ;;  %v233_v43 = vld [vmem:[%s682_s23 + $0xa8] sm:$0xff]  ;;  %v235_v44 = vld [vmem:[%s682_s23 + $0xb8] sm:$0xff] }
  0x1e   : > { %343 = vmatpush1.msra.mxu0 %v248_v29  ;;  %414 = vmatpush1.msra.mxu1 %v250_v30  ;;  %v232_v45 = vld [vmem:[%s682_s23 + $0xa0] sm:$0xff]  ;;  %v234_v46 = vld [vmem:[%s682_s23 + $0xb0] sm:$0xff]  ;;  %v229_v47 = vld [vmem:[%s682_s23 + $0x88] sm:$0xff] }
  0x1f   : > { %344 = vmatprep.subr.mxu0 %v245_v31  ;;  %415 = vmatprep.subr.mxu1 %v247_v32  ;;  %v231_v48 = vld [vmem:[%s682_s23 + $0x98] sm:$0xff]  ;;  %v228_v49 = vld [vmem:[%s682_s23 + $0x80] sm:$0xff]  ;;  %v230_v50 = vld [vmem:[%s682_s23 + $0x90] sm:$0xff] }
  0x20   : > { %345 = vmatpush1.msra.mxu0 %v244_v33  ;;  %416 = vmatpush1.msra.mxu1 %v246_v34  ;;  %v225_v51 = vld [vmem:[%s682_s23 + $0x68] sm:$0xff]  ;;  %v227_v52 = vld [vmem:[%s682_s23 + $0x78] sm:$0xff]  ;;  %v224_v53 = vld [vmem:[%s682_s23 + $0x60] sm:$0xff] }
  0x21   : > { %346 = vmatprep.subr.mxu0 %v241_v35  ;;  %417 = vmatprep.subr.mxu1 %v243_v36  ;;  %v226_v54 = vld [vmem:[%s682_s23 + $0x70] sm:$0xff]  ;;  %v221_v55 = vld [vmem:[%s682_s23 + $0x48] sm:$0xff]  ;;  %v223_v56 = vld [vmem:[%s682_s23 + $0x58] sm:$0xff] }
  0x22   : > { %347 = vmatpush1.msra.mxu0 %v240_v37  ;;  %418 = vmatpush1.msra.mxu1 %v242_v38  ;;  %v220_v57 = vld [vmem:[%s682_s23 + $0x40] sm:$0xff]  ;;  %v222_v58 = vld [vmem:[%s682_s23 + $0x50] sm:$0xff]  ;;  %v217_v59 = vld [vmem:[%s682_s23 + $0x28] sm:$0xff] }
  0x23   : > { %348 = vmatprep.subr.mxu0 %v237_v39  ;;  %419 = vmatprep.subr.mxu1 %v239_v40  ;;  %v219_v60 = vld [vmem:[%s682_s23 + $0x38] sm:$0xff]  ;;  %v216_v61 = vld [vmem:[%s682_s23 + $0x20] sm:$0xff]  ;;  %v218_v62 = vld [vmem:[%s682_s23 + $0x30] sm:$0xff] }
  0x24   : > { %349 = vmatpush1.msra.mxu0 %v236_v41  ;;  %420 = vmatpush1.msra.mxu1 %v238_v42  ;;  %v213_v63 = vld [vmem:[%s682_s23 + $0x8] sm:$0xff]  ;;  %v215_v0 = vld [vmem:[%s682_s23 + $0x18] sm:$0xff]  ;;  %v212_v1 = vld [vmem:[%s682_s23] sm:$0xff] }
  0x25   : > { %350 = vmatprep.subr.mxu0 %v233_v43  ;;  %421 = vmatprep.subr.mxu1 %v235_v44  ;;  %v214_v2 = vld [vmem:[%s682_s23 + $0x10] sm:$0xff]  ;;  %v317_v3 = vld [vmem:[%s682_s23 + $0x348] sm:$0xff]  ;;  %v319_v4 = vld [vmem:[%s682_s23 + $0x358] sm:$0xff] }
  0x26   : > { %351 = vmatpush1.msra.mxu0 %v232_v45  ;;  %422 = vmatpush1.msra.mxu1 %v234_v46  ;;  %v316_v5 = vld [vmem:[%s682_s23 + $0x340] sm:$0xff]  ;;  %v318_v6 = vld [vmem:[%s682_s23 + $0x350] sm:$0xff]  ;;  %v313_v7 = vld [vmem:[%s682_s23 + $0x328] sm:$0xff] }
  0x27   : > { %352 = vmatprep.subr.mxu0 %v229_v47  ;;  %423 = vmatprep.subr.mxu1 %v231_v48  ;;  %v315_v8 = vld [vmem:[%s682_s23 + $0x338] sm:$0xff]  ;;  %v312_v9 = vld [vmem:[%s682_s23 + $0x320] sm:$0xff]  ;;  %v314_v10 = vld [vmem:[%s682_s23 + $0x330] sm:$0xff] }
  0x28   : > { %353 = vmatpush1.msra.mxu0 %v228_v49  ;;  %424 = vmatpush1.msra.mxu1 %v230_v50  ;;  %v309_v11 = vld [vmem:[%s682_s23 + $0x308] sm:$0xff]  ;;  %v311_v12 = vld [vmem:[%s682_s23 + $0x318] sm:$0xff]  ;;  %v308_v13 = vld [vmem:[%s682_s23 + $0x300] sm:$0xff] }
  0x29   : > { %354 = vmatprep.subr.mxu0 %v225_v51  ;;  %425 = vmatprep.subr.mxu1 %v227_v52  ;;  %v310_v14 = vld [vmem:[%s682_s23 + $0x310] sm:$0xff]  ;;  %v305_v15 = vld [vmem:[%s682_s23 + $0x2e8] sm:$0xff]  ;;  %v307_v16 = vld [vmem:[%s682_s23 + $0x2f8] sm:$0xff] }
  0x2a   : > { %355 = vmatpush1.msra.mxu0 %v224_v53  ;;  %426 = vmatpush1.msra.mxu1 %v226_v54  ;;  %v304_v17 = vld [vmem:[%s682_s23 + $0x2e0] sm:$0xff]  ;;  %v306_v18 = vld [vmem:[%s682_s23 + $0x2f0] sm:$0xff]  ;;  %v301_v19 = vld [vmem:[%s682_s23 + $0x2c8] sm:$0xff] }
  0x2b   : > { %356 = vmatprep.subr.mxu0 %v221_v55  ;;  %427 = vmatprep.subr.mxu1 %v223_v56  ;;  %v303_v20 = vld [vmem:[%s682_s23 + $0x2d8] sm:$0xff]  ;;  %v300_v21 = vld [vmem:[%s682_s23 + $0x2c0] sm:$0xff]  ;;  %v302_v22 = vld [vmem:[%s682_s23 + $0x2d0] sm:$0xff] }
  0x2c   : > { %357 = vmatpush1.msra.mxu0 %v220_v57  ;;  %428 = vmatpush1.msra.mxu1 %v222_v58  ;;  %v297_v23 = vld [vmem:[%s682_s23 + $0x2a8] sm:$0xff]  ;;  %v299_v24 = vld [vmem:[%s682_s23 + $0x2b8] sm:$0xff]  ;;  %v296_v25 = vld [vmem:[%s682_s23 + $0x2a0] sm:$0xff] }
  0x2d   : > { %358 = vmatprep.subr.mxu0 %v217_v59  ;;  %429 = vmatprep.subr.mxu1 %v219_v60  ;;  %v298_v26 = vld [vmem:[%s682_s23 + $0x2b0] sm:$0xff]  ;;  %v293_v27 = vld [vmem:[%s682_s23 + $0x288] sm:$0xff]  ;;  %v295_v28 = vld [vmem:[%s682_s23 + $0x298] sm:$0xff] }
  0x2e   : > { %359 = vmatpush1.msra.mxu0 %v216_v61  ;;  %430 = vmatpush1.msra.mxu1 %v218_v62  ;;  %v292_v29 = vld [vmem:[%s682_s23 + $0x280] sm:$0xff]  ;;  %v294_v30 = vld [vmem:[%s682_s23 + $0x290] sm:$0xff]  ;;  %v289_v31 = vld [vmem:[%s682_s23 + $0x268] sm:$0xff] }
  0x2f   : > { %360 = vmatprep.subr.mxu0 %v213_v63  ;;  %431 = vmatprep.subr.mxu1 %v215_v0  ;;  %v291_v32 = vld [vmem:[%s682_s23 + $0x278] sm:$0xff]  ;;  %v288_v33 = vld [vmem:[%s682_s23 + $0x260] sm:$0xff]  ;;  %v290_v34 = vld [vmem:[%s682_s23 + $0x270] sm:$0xff] }
  0x30   : > { %361 = vmatpush1.msra.mxu0 %v212_v1  ;;  %432 = vmatpush1.msra.mxu1 %v214_v2  ;;  %v285_v35 = vld [vmem:[%s682_s23 + $0x248] sm:$0xff]  ;;  %v287_v36 = vld [vmem:[%s682_s23 + $0x258] sm:$0xff]  ;;  %v284_v37 = vld [vmem:[%s682_s23 + $0x240] sm:$0xff] }
  0x31   : > { %372 = vmatprep.subr.mxu0 %v317_v3  ;;  %443 = vmatprep.subr.mxu1 %v319_v4  ;;  %v286_v38 = vld [vmem:[%s682_s23 + $0x250] sm:$0xff]  ;;  %v281_v39 = vld [vmem:[%s682_s23 + $0x228] sm:$0xff]  ;;  %v283_v40 = vld [vmem:[%s682_s23 + $0x238] sm:$0xff] }
  0x32   : > { %373 = vmatpush2.msra.mxu0 %v316_v5  ;;  %444 = vmatpush2.msra.mxu1 %v318_v6  ;;  %v280_v41 = vld [vmem:[%s682_s23 + $0x220] sm:$0xff]  ;;  %v282_v42 = vld [vmem:[%s682_s23 + $0x230] sm:$0xff]  ;;  %v277_v43 = vld [vmem:[%s682_s23 + $0x208] sm:$0xff] }
  0x33   : > { %374 = vmatprep.subr.mxu0 %v313_v7  ;;  %445 = vmatprep.subr.mxu1 %v315_v8  ;;  %v279_v44 = vld [vmem:[%s682_s23 + $0x218] sm:$0xff]  ;;  %v276_v45 = vld [vmem:[%s682_s23 + $0x200] sm:$0xff]  ;;  %v278_v46 = vld [vmem:[%s682_s23 + $0x210] sm:$0xff] }
  0x34   : > { %375 = vmatpush2.msra.mxu0 %v312_v9  ;;  %446 = vmatpush2.msra.mxu1 %v314_v10  ;;  %v210_v47 = vld [vmem:[%s809_s1] sm:$0xff] }
  0x35   : > { %376 = vmatprep.subr.mxu0 %v309_v11  ;;  %447 = vmatprep.subr.mxu1 %v311_v12 }
  0x36   : > { %377 = vmatpush2.msra.mxu0 %v308_v13  ;;  %448 = vmatpush2.msra.mxu1 %v310_v14 }
  0x37   : > { %378 = vmatprep.subr.mxu0 %v305_v15  ;;  %449 = vmatprep.subr.mxu1 %v307_v16 }
  0x38   : > { %379 = vmatpush2.msra.mxu0 %v304_v17  ;;  %450 = vmatpush2.msra.mxu1 %v306_v18 }
  0x39   : > { %380 = vmatprep.subr.mxu0 %v301_v19  ;;  %451 = vmatprep.subr.mxu1 %v303_v20 }
  0x3a   : > { %381 = vmatpush2.msra.mxu0 %v300_v21  ;;  %452 = vmatpush2.msra.mxu1 %v302_v22 }
  0x3b   : > { %382 = vmatprep.subr.mxu0 %v297_v23  ;;  %453 = vmatprep.subr.mxu1 %v299_v24 }
  0x3c   : > { %383 = vmatpush2.msra.mxu0 %v296_v25  ;;  %454 = vmatpush2.msra.mxu1 %v298_v26 }
  0x3d   : > { %384 = vmatprep.subr.mxu0 %v293_v27  ;;  %455 = vmatprep.subr.mxu1 %v295_v28 }
  0x3e   : > { %385 = vmatpush2.msra.mxu0 %v292_v29  ;;  %456 = vmatpush2.msra.mxu1 %v294_v30 }
  0x3f   : > { %386 = vmatprep.subr.mxu0 %v289_v31  ;;  %457 = vmatprep.subr.mxu1 %v291_v32 }
  0x40   : > { %387 = vmatpush2.msra.mxu0 %v288_v33  ;;  %458 = vmatpush2.msra.mxu1 %v290_v34 }
  0x41   : > { %388 = vmatprep.subr.mxu0 %v285_v35  ;;  %459 = vmatprep.subr.mxu1 %v287_v36 }
  0x42   : > { %389 = vmatpush2.msra.mxu0 %v284_v37  ;;  %460 = vmatpush2.msra.mxu1 %v286_v38 }
  0x43   : > { %390 = vmatprep.subr.mxu0 %v281_v39  ;;  %461 = vmatprep.subr.mxu1 %v283_v40 }
  0x44   : > { %391 = vmatpush2.msra.mxu0 %v280_v41  ;;  %462 = vmatpush2.msra.mxu1 %v282_v42 }
  0x45   : > { %392 = vmatprep.subr.mxu0 %v277_v43  ;;  %463 = vmatprep.subr.mxu1 %v279_v44 }
  0x46   : > { %393 = vmatpush2.msra.mxu0 %v276_v45  ;;  %464 = vmatpush2.msra.mxu1 %v278_v46 }
  0x47   : > { %395 = vmatmul.mubr.f32.vlgmr.msra.gmra.mxu0 %v210_v47  ;;  %466 = vmatmul.mubr.f32.vlgmr.msra.gmra.mxu1 %v210_v47 }
  0x8a   : > { %v324_v48 = vpop.permute.xlu0 %323 }
 0x107   : > { %v396_v49 = vpop.f32.mrf.mxu0  ;;  %v467_v50 = vpop.f32.mrf.mxu1 }
 0x108   : > { %v397_v51 = vadd.f32 %v396_v49, %v324_v48  ;;  %v468_v52 = vadd.f32 %v467_v50, %v324_v48 }
 0x109   : > { %v398_v53 = vpop.f32.mrf.mxu0  ;;  %v469_v54 = vpop.f32.mrf.mxu1 }
 0x10a   : > { %v472_v55 = vmax.f32 %v397_v51, 0.0  ;;  %v474_v56 = vmax.f32 %v468_v52, 0.0  ;;  %v399_v57 = vadd.f32 %v398_v53, %v324_v48  ;;  %v470_v58 = vadd.f32 %v469_v54, %v324_v48 }
 0x10c   : > { %476 = vst [vmem:[%s208_s29] sm:$0xff] %v472_v55  ;;  %478 = vst [vmem:[%s208_s29 + $0x10] sm:$0xff] %v474_v56  ;;  %v473_v59 = vmax.f32 %v399_v57, 0.0  ;;  %v475_v60 = vmax.f32 %v470_v58, 0.0 }
 0x10e   : > { %477 = vst [vmem:[%s208_s29 + $0x8] sm:$0xff] %v473_v59  ;;  %479 = vst [vmem:[%s208_s29 + $0x18] sm:$0xff] %v475_v60 }
 0x10f PF: > { %s13_s14 = sadd.s32 1, %s629_s14   ;;  %s812_s12 = smov %s625_s13 }
 0x110   : > { %p10_p5 = scmp.ge.s32.totalorder %s13_s14, 4   ;;  %s813_s13 = smov %s815_s15 }
 0x112   :  { %12 = sbr.rel (!%p10_p5) target bundleno = 2 (0x2), region = 62 }

// kernel: transformer_forward.11
= control target key start
LH: loop header
LB: loop body
LE: loop exit
PB: predicated region body
PF: predicated region fallthrough
CT: control target
= control target key end

     0   :  { %s556_s12 = smov 0   ;;  %s558_s13 = smov 0   ;;  %s694_s0 = inlined_call_operand.vmem [shape: f32[2,216,64], index: 0, kind: input, shape index: {}]   ;;  %s695_s1 = inlined_call_operand.vmem [shape: f32[16,216], index: 1, kind: input, shape index: {}]   ;;  %s696_s2 = inlined_call_operand.vmem [shape: f32[16,1], index: 2, kind: input, shape index: {}]   ;;  %s697_s3 = inlined_call_operand.vmem [shape: f32[2,16,64], index: 3, kind: output, shape index: {}]  }
   0x1   :  { %s560_s14 = smov 0  }
   0x2 LB: > { %s25_s15 = sadd.s32 1, %s528_s13  ;;  %p419_p0 = scmp.ge.s32.totalorder %s532_s14, 1  ;;  %s532_s14 = sphi %s560_s14, %s13_s14   ;;  %s528_s13 = sphi %s558_s13, %s699_s13   ;;  %s524_s12 = sphi %s556_s12, %s698_s12  }
   0x3   : > { %p27_p1 = scmp.ge.s32.totalorder %s25_s15, 2  ;;  %p156_p2 = scmp.lt.s32.totalorder %s532_s14, 3 }
   0x5   : > { %s701_s15 = smov (%p27_p1, %s25_s15), 0  ;;  %p157_p3 = pnand %p419_p0, %p156_p2 }
   0x6   : > { %p186_p4 = scmp.lt.s32.totalorder (!%p157_p3), %s524_s12, 1 }
   0x7   : > { %160 = sbr.rel (%p157_p3) target bundleno = 268 (0x10c), region = 32 }
   0xc   : > { %v203_v0 = vld [vmem:[%s695_s1 + $0x8] sm:$0xff]  ;;  %vm245_vm0 = vcmask 719872   ;;  %v205_v1 = vld [vmem:[%s695_s1 + $0x18] sm:$0xff]  ;;  %v534_v2 = vmov 0.0   ;;  %v233_v3 = vld [vmem:[%s696_s2] sm:$0xff]  ;;  %s703_s12 = smov (!%p186_p4, %s524_s12), 1 }
   0xd   : > { %252 = vmatprep.subr.mxu0 %v534_v2  ;;  %428 = vmatprep.subr.mxu1 %v534_v2  ;;  %v535_v4 = vmov 0   ;;  %s482_s22 = smul.u32 216, %s703_s12  ;;  %v202_v32 = vld [vmem:[%s695_s1] sm:$0xff]  ;;  %v204_v33 = vld [vmem:[%s695_s1 + $0x10] sm:$0xff]  ;;  %v234_v34 = vld [vmem:[%s696_s2 + $0x8] sm:$0xff]  ;;  %s427_s5 = sshll.u32 %s703_s12, 4 }
   0xe   : > { %423 = vmatprep.mubr.msk.f32.mxu0 %vm245_vm0, %v203_v0  ;;  %424 = vmatprep.mubr.msk.f32.mxu1 %vm245_vm0, %v205_v1  ;;  %s201_s8 = scalar_lea.vmem %s697_s3, %s427_s5  ;;  %vm329_vm1 = vcmask 523264  }
   0xf   : > { %509 = vset.pattern.permute.xlu0 %v535_v4  ;;  %s591_s25 = scalar_lea.vmem %s694_s0, %s482_s22 }
  0x10   : > { %237 = vperm.xlu0 %509, %v233_v3   ;;  %v221_v5 = vld [vmem:[%s591_s25 + $0x78] sm:$0xff]  ;;  %v220_v6 = vld [vmem:[%s591_s25 + $0x70] sm:$0xff]  ;;  %v219_v7 = vld [vmem:[%s591_s25 + $0x68] sm:$0xff] }
  0x11   : > { %253 = vmatpush1.msra.mxu0 %v221_v5  ;;  %455 = vmatpush1.msra.mxu1 %v221_v5  ;;  %v218_v8 = vld [vmem:[%s591_s25 + $0x60] sm:$0xff]  ;;  %v217_v9 = vld [vmem:[%s591_s25 + $0x58] sm:$0xff]  ;;  %v216_v10 = vld [vmem:[%s591_s25 + $0x50] sm:$0xff] }
  0x12   : > { %254 = vmatprep.subr.mxu0 %v534_v2  ;;  %429 = vmatprep.subr.mxu1 %v534_v2  ;;  %v215_v11 = vld [vmem:[%s591_s25 + $0x48] sm:$0xff]  ;;  %v214_v12 = vld [vmem:[%s591_s25 + $0x40] sm:$0xff]  ;;  %v213_v13 = vld [vmem:[%s591_s25 + $0x38] sm:$0xff] }
  0x13   : > { %255 = vmatpush1.msra.mxu0 %v220_v6  ;;  %456 = vmatpush1.msra.mxu1 %v220_v6  ;;  %v212_v14 = vld [vmem:[%s591_s25 + $0x30] sm:$0xff]  ;;  %v211_v15 = vld [vmem:[%s591_s25 + $0x28] sm:$0xff]  ;;  %v210_v16 = vld [vmem:[%s591_s25 + $0x20] sm:$0xff] }
  0x14   : > { %256 = vmatprep.subr.mxu0 %v534_v2  ;;  %430 = vmatprep.subr.mxu1 %v534_v2  ;;  %v209_v17 = vld [vmem:[%s591_s25 + $0x18] sm:$0xff]  ;;  %v208_v18 = vld [vmem:[%s591_s25 + $0x10] sm:$0xff]  ;;  %v207_v19 = vld [vmem:[%s591_s25 + $0x8] sm:$0xff] }
  0x15   : > { %257 = vmatpush1.msra.mxu0 %v219_v7  ;;  %457 = vmatpush1.msra.mxu1 %v219_v7  ;;  %v206_v20 = vld [vmem:[%s591_s25] sm:$0xff]  ;;  %v232_v21 = vld [vmem:[%s591_s25 + $0xd0] sm:$0xff]  ;;  %v231_v22 = vld [vmem:[%s591_s25 + $0xc8] sm:$0xff] }
  0x16   : > { %258 = vmatprep.subr.mxu0 %v534_v2  ;;  %431 = vmatprep.subr.mxu1 %v534_v2  ;;  %v230_v23 = vld [vmem:[%s591_s25 + $0xc0] sm:$0xff]  ;;  %v229_v24 = vld [vmem:[%s591_s25 + $0xb8] sm:$0xff]  ;;  %v228_v25 = vld [vmem:[%s591_s25 + $0xb0] sm:$0xff] }
  0x17   : > { %259 = vmatpush1.msra.mxu0 %v218_v8  ;;  %458 = vmatpush1.msra.mxu1 %v218_v8  ;;  %v227_v26 = vld [vmem:[%s591_s25 + $0xa8] sm:$0xff]  ;;  %v226_v27 = vld [vmem:[%s591_s25 + $0xa0] sm:$0xff]  ;;  %v225_v28 = vld [vmem:[%s591_s25 + $0x98] sm:$0xff] }
  0x18   : > { %260 = vmatprep.subr.mxu0 %v534_v2  ;;  %432 = vmatprep.subr.mxu1 %v534_v2  ;;  %v224_v29 = vld [vmem:[%s591_s25 + $0x90] sm:$0xff]  ;;  %v223_v30 = vld [vmem:[%s591_s25 + $0x88] sm:$0xff]  ;;  %v222_v31 = vld [vmem:[%s591_s25 + $0x80] sm:$0xff] }
  0x19   : > { %261 = vmatpush1.msra.mxu0 %v217_v9  ;;  %459 = vmatpush1.msra.mxu1 %v217_v9 }
  0x1a   : > { %262 = vmatprep.subr.mxu0 %v534_v2  ;;  %433 = vmatprep.subr.mxu1 %v534_v2 }
  0x1b   : > { %263 = vmatpush1.msra.mxu0 %v216_v10  ;;  %460 = vmatpush1.msra.mxu1 %v216_v10 }
  0x1c   : > { %264 = vmatprep.subr.mxu0 %v534_v2  ;;  %434 = vmatprep.subr.mxu1 %v534_v2 }
  0x1d   : > { %265 = vmatpush1.msra.mxu0 %v215_v11  ;;  %461 = vmatpush1.msra.mxu1 %v215_v11 }
  0x1e   : > { %266 = vmatprep.subr.mxu0 %v534_v2  ;;  %435 = vmatprep.subr.mxu1 %v534_v2 }
  0x1f   : > { %267 = vmatpush1.msra.mxu0 %v214_v12  ;;  %462 = vmatpush1.msra.mxu1 %v214_v12 }
  0x20   : > { %268 = vmatprep.subr.mxu0 %v534_v2  ;;  %436 = vmatprep.subr.mxu1 %v534_v2 }
  0x21   : > { %269 = vmatpush1.msra.mxu0 %v213_v13  ;;  %463 = vmatpush1.msra.mxu1 %v213_v13 }
  0x22   : > { %270 = vmatprep.subr.mxu0 %v534_v2  ;;  %437 = vmatprep.subr.mxu1 %v534_v2 }
  0x23   : > { %271 = vmatpush1.msra.mxu0 %v212_v14  ;;  %464 = vmatpush1.msra.mxu1 %v212_v14 }
  0x24   : > { %272 = vmatprep.subr.mxu0 %v534_v2  ;;  %438 = vmatprep.subr.mxu1 %v534_v2 }
  0x25   : > { %273 = vmatpush1.msra.mxu0 %v211_v15  ;;  %465 = vmatpush1.msra.mxu1 %v211_v15 }
  0x26   : > { %274 = vmatprep.subr.mxu0 %v534_v2  ;;  %439 = vmatprep.subr.mxu1 %v534_v2 }
  0x27   : > { %275 = vmatpush1.msra.mxu0 %v210_v16  ;;  %466 = vmatpush1.msra.mxu1 %v210_v16 }
  0x28   : > { %276 = vmatprep.subr.mxu0 %v534_v2  ;;  %440 = vmatprep.subr.mxu1 %v534_v2 }
  0x29   : > { %277 = vmatpush1.msra.mxu0 %v209_v17  ;;  %467 = vmatpush1.msra.mxu1 %v209_v17 }
  0x2a   : > { %278 = vmatprep.subr.mxu0 %v534_v2  ;;  %441 = vmatprep.subr.mxu1 %v534_v2 }
  0x2b   : > { %279 = vmatpush1.msra.mxu0 %v208_v18  ;;  %468 = vmatpush1.msra.mxu1 %v208_v18 }
  0x2c   : > { %280 = vmatprep.subr.mxu0 %v534_v2  ;;  %442 = vmatprep.subr.mxu1 %v534_v2 }
  0x2d   : > { %281 = vmatpush1.msra.mxu0 %v207_v19  ;;  %469 = vmatpush1.msra.mxu1 %v207_v19 }
  0x2e   : > { %282 = vmatprep.subr.mxu0 %v534_v2  ;;  %443 = vmatprep.subr.mxu1 %v534_v2 }
  0x2f   : > { %283 = vmatpush1.msra.mxu0 %v206_v20  ;;  %470 = vmatpush1.msra.mxu1 %v206_v20 }
  0x30   : > { %294 = vmatprep.subr.mxu0 %v534_v2  ;;  %444 = vmatprep.subr.mxu1 %v534_v2 }
  0x31   : > { %295 = vmatpush2.msra.mxu0 %v232_v21  ;;  %471 = vmatpush2.msra.mxu1 %v232_v21 }
  0x32   : > { %296 = vmatprep.subr.mxu0 %v534_v2  ;;  %445 = vmatprep.subr.mxu1 %v534_v2 }
  0x33   : > { %297 = vmatpush2.msra.mxu0 %v231_v22  ;;  %472 = vmatpush2.msra.mxu1 %v231_v22 }
  0x34   : > { %298 = vmatprep.subr.mxu0 %v534_v2  ;;  %446 = vmatprep.subr.mxu1 %v534_v2 }
  0x35   : > { %299 = vmatpush2.msra.mxu0 %v230_v23  ;;  %473 = vmatpush2.msra.mxu1 %v230_v23 }
  0x36   : > { %300 = vmatprep.subr.mxu0 %v534_v2  ;;  %447 = vmatprep.subr.mxu1 %v534_v2 }
  0x37   : > { %301 = vmatpush2.msra.mxu0 %v229_v24  ;;  %474 = vmatpush2.msra.mxu1 %v229_v24 }
  0x38   : > { %302 = vmatprep.subr.mxu0 %v534_v2  ;;  %448 = vmatprep.subr.mxu1 %v534_v2 }
  0x39   : > { %303 = vmatpush2.msra.mxu0 %v228_v25  ;;  %475 = vmatpush2.msra.mxu1 %v228_v25 }
  0x3a   : > { %304 = vmatprep.subr.mxu0 %v534_v2  ;;  %449 = vmatprep.subr.mxu1 %v534_v2 }
  0x3b   : > { %305 = vmatpush2.msra.mxu0 %v227_v26  ;;  %476 = vmatpush2.msra.mxu1 %v227_v26 }
  0x3c   : > { %306 = vmatprep.subr.mxu0 %v534_v2  ;;  %450 = vmatprep.subr.mxu1 %v534_v2 }
  0x3d   : > { %307 = vmatpush2.msra.mxu0 %v226_v27  ;;  %477 = vmatpush2.msra.mxu1 %v226_v27 }
  0x3e   : > { %308 = vmatprep.subr.mxu0 %v534_v2  ;;  %451 = vmatprep.subr.mxu1 %v534_v2 }
  0x3f   : > { %309 = vmatpush2.msra.mxu0 %v225_v28  ;;  %478 = vmatpush2.msra.mxu1 %v225_v28 }
  0x40   : > { %310 = vmatprep.subr.mxu0 %v534_v2  ;;  %452 = vmatprep.subr.mxu1 %v534_v2 }
  0x41   : > { %311 = vmatpush2.msra.mxu0 %v224_v29  ;;  %479 = vmatpush2.msra.mxu1 %v224_v29 }
  0x42   : > { %312 = vmatprep.subr.mxu0 %v534_v2  ;;  %453 = vmatprep.subr.mxu1 %v534_v2 }
  0x43   : > { %313 = vmatpush2.msra.mxu0 %v223_v30  ;;  %480 = vmatpush2.msra.mxu1 %v223_v30 }
  0x44   : > { %314 = vmatprep.subr.mxu0 %v534_v2  ;;  %454 = vmatprep.subr.mxu1 %v534_v2 }
  0x45   : > { %315 = vmatpush2.msra.mxu0 %v222_v31  ;;  %481 = vmatpush2.msra.mxu1 %v222_v31 }
  0x46   : > { %317 = vmatmul.mubr.f32.vlgmr.msra.gmra.mxu0 %v202_v32  ;;  %322 = vmatmul.mubr.f32.vlgmr.msra.gmra.mxu1 %v204_v33 }
  0x47   : > { %242 = vperm.xlu0 %509, %v234_v34  }
  0x8b   : > { %v238_v35 = vpop.permute.xlu0 %237 }
  0xc2   : > { %v243_v36 = vpop.permute.xlu0 %242 }
 0x106   : > { %v318_v37 = vpop.f32.mrf.mxu0  ;;  %v323_v38 = vpop.f32.mrf.mxu1 }
 0x107   : > { %v319_v39 = vadd.f32 %v318_v37, %v238_v35  ;;  %v324_v40 = vadd.f32 %v323_v38, %v243_v36 }
 0x108   : > { %v320_v41 = vpop.f32.mrf.mxu0  ;;  %v325_v42 = vpop.f32.mrf.mxu1 }
 0x109   : > { %v327_v43 = vmax.f32 %v319_v39, 0.0  ;;  %v328_v44 = vmax.f32 %v324_v40, 0.0 }
 0x10b   : > { %330 = vst.msk [vmem:[%s201_s8] sm:$0xff] %vm329_vm1, %v327_v43  ;;  %331 = vst.msk [vmem:[%s201_s8 + $0x8] sm:$0xff] %vm329_vm1, %v328_v44 }
 0x10c PF: > { %s13_s14 = sadd.s32 1, %s532_s14   ;;  %s698_s12 = smov %s528_s13 }
 0x10d   : > { %p10_p5 = scmp.ge.s32.totalorder %s13_s14, 4   ;;  %s699_s13 = smov %s701_s15 }
 0x10f   :  { %12 = sbr.rel (!%p10_p5) target bundleno = 2 (0x2), region = 62 }

// kernel: transformer_forward.12
= control target key start
LH: loop header
LB: loop body
LE: loop exit
PB: predicated region body
PF: predicated region fallthrough
CT: control target
= control target key end

     0   :  { %s646_s12 = smov 0   ;;  %s648_s13 = smov 0   ;;  %s793_s0 = inlined_call_operand.vmem [shape: f32[2,432,64], index: 0, kind: input, shape index: {}]   ;;  %s794_s1 = inlined_call_operand.vmem [shape: f32[16,432], index: 1, kind: input, shape index: {}]   ;;  %s795_s2 = inlined_call_operand.vmem [shape: f32[16,1], index: 2, kind: input, shape index: {}]   ;;  %s796_s3 = inlined_call_operand.vmem [shape: f32[2,16,64], index: 3, kind: output, shape index: {}]  }
   0x1   :  { %s650_s14 = smov 0  }
   0x2 LB: > { %s25_s15 = sadd.s32 1, %s618_s13  ;;  %p525_p0 = scmp.ge.s32.totalorder %s622_s14, 1  ;;  %s622_s14 = sphi %s650_s14, %s13_s14   ;;  %s618_s13 = sphi %s648_s13, %s798_s13   ;;  %s614_s12 = sphi %s646_s12, %s797_s12  }
   0x3   : > { %p27_p1 = scmp.ge.s32.totalorder %s25_s15, 2  ;;  %p156_p2 = scmp.lt.s32.totalorder %s622_s14, 3 }
   0x5   : > { %s800_s15 = smov (%p27_p1, %s25_s15), 0  ;;  %p157_p3 = pnand %p525_p0, %p156_p2 }
   0x6   : > { %p186_p4 = scmp.lt.s32.totalorder (!%p157_p3), %s614_s12, 1 }
   0x7   : > { %160 = sbr.rel (%p157_p3) target bundleno = 263 (0x107), region = 32 }
   0xc   : > { %v203_v0 = vld [vmem:[%s794_s1 + $0x8] sm:$0xff]  ;;  %vm276_vm0 = vcmask 392192   ;;  %v624_v1 = vmov 0.0   ;;  %v205_v2 = vld [vmem:[%s794_s1 + $0x18] sm:$0xff]  ;;  %s802_s12 = smov (!%p186_p4, %s614_s12), 1  ;;  %v625_v3 = vmov 0  }
   0xd   : > { %358 = vmatprep.subr.mxu1 %v624_v1  ;;  %347 = vmatprep.mubr.f32.mxu0 %v203_v0  ;;  %v264_v4 = vld [vmem:[%s795_s2] sm:$0xff]  ;;  %s572_s22 = smul.u32 432, %s802_s12  ;;  %v265_v5 = vld [vmem:[%s795_s2 + $0x8] sm:$0xff]  ;;  %v204_v63 = vld [vmem:[%s794_s1 + $0x10] sm:$0xff]  ;;  %s533_s17 = sshll.u32 %s802_s12, 4  ;;  %vm435_vm1 = vcmask 523264  }
   0xe   : > { %529 = vmatprep.mubr.msk.f32.mxu1 %vm276_vm0, %v205_v2  ;;  %599 = vset.pattern.permute.xlu0 %v625_v3  ;;  %v202_v55 = vld [vmem:[%s794_s1] sm:$0xff]  ;;  %v207_v56 = vld [vmem:[%s794_s1 + $0x28] sm:$0xff]  ;;  %v209_v0 = vld [vmem:[%s794_s1 + $0x38] sm:$0xff]  ;;  %s201_s20 = scalar_lea.vmem %s796_s3, %s533_s17 }
   0xf   : > { %268 = vperm.xlu0 %599, %v264_v4   ;;  %s684_s27 = scalar_lea.vmem %s793_s0, %s572_s22  ;;  %v206_v59 = vld [vmem:[%s794_s1 + $0x20] sm:$0xff]  ;;  %v208_v2 = vld [vmem:[%s794_s1 + $0x30] sm:$0xff] }
  0x10   : > { %v257_v6 = vld [vmem:[%s684_s27 + $0x178] sm:$0xff]  ;;  %v256_v9 = vld [vmem:[%s684_s27 + $0x170] sm:$0xff]  ;;  %v255_v12 = vld [vmem:[%s684_s27 + $0x168] sm:$0xff] }
  0x11   : > { %v241_v7 = vld [vmem:[%s684_s27 + $0xf8] sm:$0xff]  ;;  %359 = vmatpush1.msra.mxu1 %v257_v6  ;;  %v240_v10 = vld [vmem:[%s684_s27 + $0xf0] sm:$0xff]  ;;  %v239_v13 = vld [vmem:[%s684_s27 + $0xe8] sm:$0xff] }
  0x12   : > { %v225_v8 = vld [vmem:[%s684_s27 + $0x78] sm:$0xff]  ;;  %534 = vmatprep.subr.mxu0 %v241_v7  ;;  %v224_v11 = vld [vmem:[%s684_s27 + $0x70] sm:$0xff]  ;;  %360 = vmatprep.subr.mxu1 %v624_v1  ;;  %v223_v14 = vld [vmem:[%s684_s27 + $0x68] sm:$0xff] }
  0x13   : > { %273 = vperm.xlu0 %599, %v265_v5   ;;  %535 = vmatpush3.msra.mxu0 %v225_v8  ;;  %v254_v15 = vld [vmem:[%s684_s27 + $0x160] sm:$0xff]  ;;  %v253_v18 = vld [vmem:[%s684_s27 + $0x158] sm:$0xff]  ;;  %v252_v21 = vld [vmem:[%s684_s27 + $0x150] sm:$0xff] }
  0x14   : > { %361 = vmatpush1.msra.mxu1 %v256_v9  ;;  %536 = vmatprep.subr.mxu0 %v240_v10  ;;  %v238_v16 = vld [vmem:[%s684_s27 + $0xe0] sm:$0xff]  ;;  %v237_v19 = vld [vmem:[%s684_s27 + $0xd8] sm:$0xff]  ;;  %v236_v22 = vld [vmem:[%s684_s27 + $0xd0] sm:$0xff] }
  0x15   : > { %362 = vmatprep.subr.mxu1 %v624_v1  ;;  %537 = vmatpush3.msra.mxu0 %v224_v11  ;;  %v222_v17 = vld [vmem:[%s684_s27 + $0x60] sm:$0xff]  ;;  %v221_v20 = vld [vmem:[%s684_s27 + $0x58] sm:$0xff]  ;;  %v220_v23 = vld [vmem:[%s684_s27 + $0x50] sm:$0xff] }
  0x16   : > { %363 = vmatpush1.msra.mxu1 %v255_v12  ;;  %538 = vmatprep.subr.mxu0 %v239_v13  ;;  %v251_v24 = vld [vmem:[%s684_s27 + $0x148] sm:$0xff]  ;;  %v250_v27 = vld [vmem:[%s684_s27 + $0x140] sm:$0xff]  ;;  %v249_v30 = vld [vmem:[%s684_s27 + $0x138] sm:$0xff] }
  0x17   : > { %364 = vmatprep.subr.mxu1 %v624_v1  ;;  %539 = vmatpush3.msra.mxu0 %v223_v14  ;;  %v235_v25 = vld [vmem:[%s684_s27 + $0xc8] sm:$0xff]  ;;  %v234_v28 = vld [vmem:[%s684_s27 + $0xc0] sm:$0xff]  ;;  %v233_v31 = vld [vmem:[%s684_s27 + $0xb8] sm:$0xff] }
  0x18   : > { %365 = vmatpush1.msra.mxu1 %v254_v15  ;;  %540 = vmatprep.subr.mxu0 %v238_v16  ;;  %v219_v26 = vld [vmem:[%s684_s27 + $0x48] sm:$0xff]  ;;  %v218_v29 = vld [vmem:[%s684_s27 + $0x40] sm:$0xff]  ;;  %v217_v32 = vld [vmem:[%s684_s27 + $0x38] sm:$0xff] }
  0x19   : > { %366 = vmatprep.subr.mxu1 %v624_v1  ;;  %541 = vmatpush3.msra.mxu0 %v222_v17  ;;  %v248_v33 = vld [vmem:[%s684_s27 + $0x130] sm:$0xff]  ;;  %v247_v36 = vld [vmem:[%s684_s27 + $0x128] sm:$0xff]  ;;  %v246_v39 = vld [vmem:[%s684_s27 + $0x120] sm:$0xff] }
  0x1a   : > { %367 = vmatpush1.msra.mxu1 %v253_v18  ;;  %542 = vmatprep.subr.mxu0 %v237_v19  ;;  %v232_v34 = vld [vmem:[%s684_s27 + $0xb0] sm:$0xff]  ;;  %v231_v37 = vld [vmem:[%s684_s27 + $0xa8] sm:$0xff]  ;;  %v230_v40 = vld [vmem:[%s684_s27 + $0xa0] sm:$0xff] }
  0x1b   : > { %368 = vmatprep.subr.mxu1 %v624_v1  ;;  %543 = vmatpush3.msra.mxu0 %v221_v20  ;;  %v216_v35 = vld [vmem:[%s684_s27 + $0x30] sm:$0xff]  ;;  %v215_v38 = vld [vmem:[%s684_s27 + $0x28] sm:$0xff]  ;;  %v214_v41 = vld [vmem:[%s684_s27 + $0x20] sm:$0xff] }
  0x1c   : > { %369 = vmatpush1.msra.mxu1 %v252_v21  ;;  %544 = vmatprep.subr.mxu0 %v236_v22  ;;  %v245_v42 = vld [vmem:[%s684_s27 + $0x118] sm:$0xff]  ;;  %v244_v45 = vld [vmem:[%s684_s27 + $0x110] sm:$0xff]  ;;  %v243_v48 = vld [vmem:[%s684_s27 + $0x108] sm:$0xff] }
  0x1d   : > { %370 = vmatprep.subr.mxu1 %v624_v1  ;;  %545 = vmatpush3.msra.mxu0 %v220_v23  ;;  %v229_v43 = vld [vmem:[%s684_s27 + $0x98] sm:$0xff]  ;;  %v228_v46 = vld [vmem:[%s684_s27 + $0x90] sm:$0xff]  ;;  %v227_v49 = vld [vmem:[%s684_s27 + $0x88] sm:$0xff] }
  0x1e   : > { %371 = vmatpush1.msra.mxu1 %v251_v24  ;;  %546 = vmatprep.subr.mxu0 %v235_v25  ;;  %v213_v44 = vld [vmem:[%s684_s27 + $0x18] sm:$0xff]  ;;  %v212_v47 = vld [vmem:[%s684_s27 + $0x10] sm:$0xff]  ;;  %v211_v50 = vld [vmem:[%s684_s27 + $0x8] sm:$0xff] }
  0x1f   : > { %372 = vmatprep.subr.mxu1 %v624_v1  ;;  %547 = vmatpush3.msra.mxu0 %v219_v26  ;;  %v242_v51 = vld [vmem:[%s684_s27 + $0x100] sm:$0xff]  ;;  %v263_v54 = vld [vmem:[%s684_s27 + $0x1a8] sm:$0xff]  ;;  %v261_v58 = vld [vmem:[%s684_s27 + $0x198] sm:$0xff] }
  0x20   : > { %373 = vmatpush1.msra.mxu1 %v250_v27  ;;  %548 = vmatprep.subr.mxu0 %v234_v28  ;;  %v226_v52 = vld [vmem:[%s684_s27 + $0x80] sm:$0xff]  ;;  %v260_v60 = vld [vmem:[%s684_s27 + $0x190] sm:$0xff]  ;;  %v259_v61 = vld [vmem:[%s684_s27 + $0x188] sm:$0xff] }
  0x21   : > { %374 = vmatprep.subr.mxu1 %v624_v1  ;;  %549 = vmatpush3.msra.mxu0 %v218_v29  ;;  %v210_v53 = vld [vmem:[%s684_s27] sm:$0xff] }
  0x22   : > { %375 = vmatpush1.msra.mxu1 %v249_v30  ;;  %550 = vmatprep.subr.mxu0 %v233_v31  ;;  %v262_v57 = vld [vmem:[%s684_s27 + $0x1a0] sm:$0xff] }
  0x23   : > { %376 = vmatprep.subr.mxu1 %v624_v1  ;;  %551 = vmatpush3.msra.mxu0 %v217_v32  ;;  %v258_v62 = vld [vmem:[%s684_s27 + $0x180] sm:$0xff] }
  0x24   : > { %377 = vmatpush1.msra.mxu1 %v248_v33  ;;  %552 = vmatprep.subr.mxu0 %v232_v34 }
  0x25   : > { %378 = vmatprep.subr.mxu1 %v624_v1  ;;  %553 = vmatpush3.msra.mxu0 %v216_v35 }
  0x26   : > { %379 = vmatpush1.msra.mxu1 %v247_v36  ;;  %554 = vmatprep.subr.mxu0 %v231_v37 }
  0x27   : > { %380 = vmatprep.subr.mxu1 %v624_v1  ;;  %555 = vmatpush3.msra.mxu0 %v215_v38 }
  0x28   : > { %381 = vmatpush1.msra.mxu1 %v246_v39  ;;  %556 = vmatprep.subr.mxu0 %v230_v40 }
  0x29   : > { %382 = vmatprep.subr.mxu1 %v624_v1  ;;  %557 = vmatpush3.msra.mxu0 %v214_v41 }
  0x2a   : > { %383 = vmatpush1.msra.mxu1 %v245_v42  ;;  %558 = vmatprep.subr.mxu0 %v229_v43 }
  0x2b   : > { %384 = vmatprep.subr.mxu1 %v624_v1  ;;  %559 = vmatpush3.msra.mxu0 %v213_v44 }
  0x2c   : > { %385 = vmatpush1.msra.mxu1 %v244_v45  ;;  %560 = vmatprep.subr.mxu0 %v228_v46 }
  0x2d   : > { %386 = vmatprep.subr.mxu1 %v624_v1  ;;  %561 = vmatpush3.msra.mxu0 %v212_v47 }
  0x2e   : > { %387 = vmatpush1.msra.mxu1 %v243_v48  ;;  %562 = vmatprep.subr.mxu0 %v227_v49 }
  0x2f   : > { %388 = vmatprep.subr.mxu1 %v624_v1  ;;  %563 = vmatpush3.msra.mxu0 %v211_v50 }
  0x30   : > { %389 = vmatpush1.msra.mxu1 %v242_v51  ;;  %564 = vmatprep.subr.mxu0 %v226_v52 }
  0x31   : > { %410 = vmatprep.subr.mxu1 %v624_v1  ;;  %565 = vmatpush3.msra.mxu0 %v210_v53 }
  0x32   : > { %411 = vmatpush2.msra.mxu1 %v263_v54  ;;  %348 = vmatmul.mubr.f32.vlgmr.msra.gmra.mxu0 %v202_v55 }
  0x33   : > { %412 = vmatprep.subr.mxu1 %v624_v1  ;;  %352 = vmatprep.mubr.f32.mxu0 %v207_v56 }
  0x34   : > { %413 = vmatpush2.msra.mxu1 %v262_v57 }
  0x35   : > { %414 = vmatprep.subr.mxu1 %v624_v1 }
  0x36   : > { %415 = vmatpush2.msra.mxu1 %v261_v58  ;;  %353 = vmatmul.mubr.f32.gmra.mxu0 %v206_v59 }
  0x37   : > { %416 = vmatprep.subr.mxu1 %v624_v1 }
  0x38   : > { %417 = vmatpush2.msra.mxu1 %v260_v60 }
  0x39   : > { %418 = vmatprep.subr.mxu1 %v624_v1 }
  0x3a   : > { %419 = vmatpush2.msra.mxu1 %v259_v61 }
  0x3b   : > { %420 = vmatprep.subr.mxu1 %v624_v1 }
  0x3c   : > { %421 = vmatpush2.msra.mxu1 %v258_v62 }
  0x3d   : > { %423 = vmatmul.mubr.f32.vlgmr.msra.gmra.mxu1 %v204_v63 }
  0x3e   : > { %530 = vmatprep.mubr.msk.f32.mxu1 %vm276_vm0, %v209_v0 }
  0x41   : > { %428 = vmatmul.mubr.f32.gmra.mxu1 %v208_v2 }
  0x8a   : > { %v269_v6 = vpop.permute.xlu0 %268 }
  0x8e   : > { %v274_v10 = vpop.permute.xlu0 %273 }
  0xf2   : > { %v566_v3 = vpop.f32.mrf.mxu0 }
  0xf4   : > { %v567_v4 = vpop.f32.mrf.mxu0 }
  0xf5   : > { %v568_v7 = vadd.f32 %v567_v4, %v566_v3 }
  0xf6   : > { %v569_v5 = vpop.f32.mrf.mxu0 }
  0xf7   : > { %v350_v1 = vadd.f32 %v568_v7, %v269_v6 }
  0xf8   : > { %v570_v8 = vpop.f32.mrf.mxu0 }
  0xf9   : > { %v571_v9 = vadd.f32 %v570_v8, %v569_v5 }
  0xfb   : > { %v355_v14 = vadd.f32 %v571_v9, %v274_v10 }
  0xfd   : > { %v424_v11 = vpop.f32.mrf.mxu1 }
  0xfe   : > { %v425_v12 = vadd.f32 %v424_v11, %v350_v1 }
  0xff   : > { %v426_v13 = vpop.f32.mrf.mxu1 }
 0x100   : > { %v433_v15 = vmax.f32 %v425_v12, 0.0 }
 0x101   : > { %v429_v16 = vpop.f32.mrf.mxu1 }
 0x102   : > { %436 = vst.msk [vmem:[%s201_s20] sm:$0xff] %vm435_vm1, %v433_v15  ;;  %v430_v17 = vadd.f32 %v429_v16, %v355_v14 }
 0x103   : > { %v431_v18 = vpop.f32.mrf.mxu1 }
 0x104   : > { %v434_v19 = vmax.f32 %v430_v17, 0.0 }
 0x106   : > { %437 = vst.msk [vmem:[%s201_s20 + $0x8] sm:$0xff] %vm435_vm1, %v434_v19 }
 0x107 PF: > { %s13_s14 = sadd.s32 1, %s622_s14   ;;  %s797_s12 = smov %s618_s13 }
 0x108   : > { %p10_p5 = scmp.ge.s32.totalorder %s13_s14, 4   ;;  %s798_s13 = smov %s800_s15 }
 0x10a   :  { %12 = sbr.rel (!%p10_p5) target bundleno = 2 (0x2), region = 62 }

// kernel: transformer_forward.13
= control target key start
LH: loop header
LB: loop body
LE: loop exit
PB: predicated region body
PF: predicated region fallthrough
CT: control target
= control target key end

     0   :  { %s5737_s0 = inlined_call_operand.vmem [shape: f32[16,128], index: 0, kind: input, shape index: {}]   ;;  %s5738_s1 = inlined_call_operand.vmem [shape: f32[128,32], index: 1, kind: input, shape index: {}]   ;;  %s5739_s2 = inlined_call_operand.vmem [shape: f32[1,32], index: 2, kind: input, shape index: {}]   ;;  %s5740_s3 = inlined_call_operand.vmem [shape: f32[16,32], index: 3, kind: input, shape index: {}]   ;;  %s5741_s4 = inlined_call_operand.vmem [shape: f32[2,2,32], index: 4, kind: input, shape index: {}]   ;;  %s5742_s5 = inlined_call_operand.vmem [shape: f32[2,2,32], index: 5, kind: input, shape index: {}]   ;;  %s5743_s6 = inlined_call_operand.vmem [shape: f32[2,32,96], index: 6, kind: input, shape index: {}]   ;;  %s5744_s7 = inlined_call_operand.vmem [shape: f32[2,1,96], index: 7, kind: input, shape index: {}]   ;;  %s5745_s8 = inlined_call_operand.vmem [shape: f32[2,32,32], index: 8, kind: input, shape index: {}]   ;;  %s5746_s9 = inlined_call_operand.vmem [shape: f32[2,1,32], index: 9, kind: input, shape index: {}]   ;;  %s5747_s10 = inlined_call_operand.vmem [shape: f32[2,32,64], index: 10, kind: input, shape index: {}]   ;;  %s5748_s11 = inlined_call_operand.vmem [shape: f32[2,1,64], index: 11, kind: input, shape index: {}]   ;;  %s5749_s12 = inlined_call_operand.vmem [shape: f32[2,64,32], index: 12, kind: input, shape index: {}]   ;;  %s5750_s13 = inlined_call_operand.vmem [shape: f32[2,1,32], index: 13, kind: input, shape index: {}]   ;;  %s5751_s14 = inlined_call_operand.vmem [shape: f32[2,32], index: 14, kind: input, shape index: {}]   ;;  %s5752_s15 = inlined_call_operand.hbm [shape: f32[16,32], index: 15, kind: output, shape index: {}]  }
   0x1   :  { %v68_v0 = vld [vmem:[%s5738_s1 + $0x78] sm:$0xff]  ;;  %v67_v1 = vld [vmem:[%s5738_s1 + $0x70] sm:$0xff]  ;;  %v66_v2 = vld [vmem:[%s5738_s1 + $0x68] sm:$0xff] }
   0x2   :  { %4565 = vmatprep.subr.mxu0 %v68_v0  ;;  %v65_v3 = vld [vmem:[%s5738_s1 + $0x60] sm:$0xff]  ;;  %v64_v5 = vld [vmem:[%s5738_s1 + $0x58] sm:$0xff] }
   0x3   :  { %4566 = vmatpush3.msra.mxu0 %v68_v0  ;;  %v51_v4 = vld [vmem:[%s5737_s0] sm:$0xff] }
   0x4   :  { %4567 = vmatprep.subr.mxu0 %v67_v1  ;;  %4597 = vmatprep.mubr.f32.mxu0 %v51_v4 }
   0x5   :  { %4568 = vmatpush3.msra.mxu0 %v67_v1 }
   0x6   :  { %4569 = vmatprep.subr.mxu0 %v66_v2 }
   0x7   :  { %4570 = vmatpush3.msra.mxu0 %v66_v2 }
   0x8   :  { %20 = vsyncpa [#allocation3], 0  ;;  %4571 = vmatprep.subr.mxu0 %v65_v3  ;;  %v63_v6 = vld [vmem:[%s5738_s1 + $0x50] sm:$0xff]  ;;  %v62_v7 = vld [vmem:[%s5738_s1 + $0x48] sm:$0xff]  ;;  %vm156_vm0 = vcmask 261120   ;;  %v184_v48 = vlaneseq  ;;  %v5012_v0 = vmov 0.0  }
   0x9   :  { %4572 = vmatpush3.msra.mxu0 %v65_v3  ;;  %v61_v8 = vld [vmem:[%s5738_s1 + $0x40] sm:$0xff]  ;;  %v60_v9 = vld [vmem:[%s5738_s1 + $0x38] sm:$0xff]  ;;  %v59_v10 = vld [vmem:[%s5738_s1 + $0x30] sm:$0xff]  ;;  %vm5013_vm1 = vmmov 0   ;;  %s5014_s23 = smov 96   ;;  %vm295_vm2 = vcmask 64512  }
   0xa   :  { %4573 = vmatprep.subr.mxu0 %v64_v5  ;;  %v58_v11 = vld [vmem:[%s5738_s1 + $0x28] sm:$0xff]  ;;  %v57_v12 = vld [vmem:[%s5738_s1 + $0x20] sm:$0xff]  ;;  %v56_v13 = vld [vmem:[%s5738_s1 + $0x18] sm:$0xff]  ;;  %v185_v50 = vshrl.u32 %v184_v48, 7  ;;  %s5015_s24 = smov 64   ;;  %s5016_s25 = smov 88  }
   0xb   :  { %4574 = vmatpush3.msra.mxu0 %v64_v5  ;;  %v55_v14 = vld [vmem:[%s5738_s1 + $0x10] sm:$0xff]  ;;  %v54_v15 = vld [vmem:[%s5738_s1 + $0x8] sm:$0xff]  ;;  %v53_v16 = vld [vmem:[%s5738_s1] sm:$0xff]  ;;  %s5017_s26 = smov 120   ;;  %s5018_s27 = smov 56   ;;  %vm2114_vm3 = vcmask 523264  }
   0xc   :  { %4575 = vmatprep.subr.mxu0 %v63_v6  ;;  %v52_v17 = vld [vmem:[%s5737_s0 + $0x8] sm:$0xff]  ;;  %v4304_v19 = vld [vmem:[%s5739_s2] ss:$0 sm:$0xff]  ;;  %v199_v39 = vld [vmem:[%s5743_s6 + $0x18] sm:$0xff]  ;;  %v5195_v51 = vsub.s32 0, %v185_v50  ;;  %v5200_v53 = vsub.s32 1, %v185_v50 }
   0xd   :  { %4576 = vmatpush3.msra.mxu0 %v63_v6  ;;  %v151_v21 = vld [vmem:[%s5740_s3] sm:$0xff]  ;;  %v152_v24 = vld [vmem:[%s5740_s3 + $0x8] sm:$0xff]  ;;  %v198_v40 = vld [vmem:[%s5743_s6 + $0x10] sm:$0xff]  ;;  %4600 = vmatprep.subr.mxu1 %v199_v39  ;;  %s5019_s1 = smov 80   ;;  %s5020_s28 = smov 112  }
   0xe   :  { %4577 = vmatprep.subr.mxu0 %v62_v7  ;;  %4601 = vmatpush3.msra.mxu1 %v199_v39  ;;  %v197_v41 = vld [vmem:[%s5743_s6 + $0x8] sm:$0xff]  ;;  %v196_v42 = vld [vmem:[%s5743_s6] sm:$0xff]  ;;  %s5021_s30 = smov 48   ;;  %s5022_s16 = smov 72  }
   0xf   :  { %4578 = vmatpush3.msra.mxu0 %v62_v7  ;;  %4602 = vmatprep.subr.mxu1 %v198_v40  ;;  %v155_v52 = vld [vmem:[%s5741_s4] sm:$0x3]  ;;  %s5023_s17 = smov 104   ;;  %s5024_s20 = smov 40  }
  0x10   :  { %4579 = vmatprep.subr.mxu0 %v61_v8  ;;  %4603 = vmatpush3.msra.mxu1 %v198_v40  ;;  %v187_v54 = vrot.slane %v155_v52, %v5195_v51  ;;  %v193_v57 = vrot.slane %v155_v52, %v5200_v53  ;;  %v4305_v1 = vld [vmem:[%s5744_s7] ss:$0 sm:$0xff] }
  0x11   :  { %4580 = vmatpush3.msra.mxu0 %v61_v8  ;;  %4604 = vmatprep.subr.mxu1 %v197_v41 }
  0x12   :  { %4581 = vmatprep.subr.mxu0 %v60_v9  ;;  %4605 = vmatpush3.msra.mxu1 %v197_v41 }
  0x13   :  { %4582 = vmatpush3.msra.mxu0 %v60_v9  ;;  %4606 = vmatprep.subr.mxu1 %v196_v42 }
  0x14   :  { %4583 = vmatprep.subr.mxu0 %v59_v10  ;;  %4607 = vmatpush3.msra.mxu1 %v196_v42 }
  0x15   :  { %4584 = vmatpush3.msra.mxu0 %v59_v10  ;;  %4616 = vmatprep.subr.mxu1 %v5012_v0 }
  0x16   :  { %4585 = vmatprep.subr.mxu0 %v58_v11 }
  0x17   :  { %4586 = vmatpush3.msra.mxu0 %v58_v11 }
  0x18   :  { %4587 = vmatprep.subr.mxu0 %v57_v12 }
  0x19   :  { %4588 = vmatpush3.msra.mxu0 %v57_v12 }
  0x1a   :  { %4589 = vmatprep.subr.mxu0 %v56_v13 }
  0x1b   :  { %4590 = vmatpush3.msra.mxu0 %v56_v13 }
  0x1c   :  { %4591 = vmatprep.subr.mxu0 %v55_v14 }
  0x1d   :  { %4592 = vmatpush3.msra.mxu0 %v55_v14 }
  0x1e   :  { %4593 = vmatprep.subr.mxu0 %v54_v15 }
  0x1f   :  { %4594 = vmatpush3.msra.mxu0 %v54_v15 }
  0x20   :  { %4595 = vmatprep.subr.mxu0 %v53_v16 }
  0x21   :  { %4596 = vmatpush3.msra.mxu0 %v53_v16 }
  0x22   :  { %4598 = vmatmul.mubr.f32.vlgmr.msra.gmra.mxu0 %v52_v17  ;;  %4611 = vmatprep.subr.mxu0 %v5012_v0 }
  0x23   :  { %4613 = vmatprep.mubr.msk.f32.mxu0 %vm5013_vm1, %v5012_v0 }
  0xe2   :  { %v4599_v18 = vpop.f32.mrf.mxu0 }
  0xe3   :  { %v148_v22 = vadd.f32 %v4599_v18, %v4304_v19 }
  0xe4   :  { %v142_v20 = vpop.f32.mrf.mxu0 }
  0xe5   :  { %v143_v23 = vadd.f32 %v4304_v19, %v142_v20  ;;  %v5173_v26 = vadd.f32 %v152_v24, %v148_v22 }
  0xe7   :  { %v5171_v25 = vadd.f32 %v151_v21, %v143_v23  ;;  %v160_v28 = vsel %vm156_vm0, %v5173_v26, 0.0 }
  0xe9   :  { %v157_v27 = vsel %vm156_vm0, %v5171_v25, 0.0 }
  0xea   :  { %158 = vadd.xlane.f32.xlu0 %v157_v27 }
  0xee   :  { %161 = vadd.xlane.f32.xlu0 %v160_v28 }
 0x173   :  { %v159_v29 = vpop.xlane.xlu0 %158 }
 0x174   :  { %v164_v30 = vmul.f32 0.03125, %v159_v29 }
 0x176   :  { %v166_v31 = vsub.f32 %v5171_v25, %v164_v30 }
 0x177   :  { %v162_v32 = vpop.xlane.xlu0 %161 }
 0x178   :  { %v165_v33 = vmul.f32 0.03125, %v162_v32  ;;  %v168_v34 = vmul.f32 %v166_v31, %v166_v31 }
 0x17a   :  { %v167_v35 = vsub.f32 %v5173_v26, %v165_v33  ;;  %v170_v36 = vsel %vm156_vm0, %v168_v34, 0.0 }
 0x17b   :  { %171 = vadd.xlane.f32.xlu1 %v170_v36 }
 0x17c   :  { %v169_v37 = vmul.f32 %v167_v35, %v167_v35 }
 0x17e   :  { %v173_v38 = vsel %vm156_vm0, %v169_v37, 0.0 }
 0x17f   :  { %174 = vadd.xlane.f32.xlu1 %v173_v38 }
 0x204   :  { %v172_v43 = vpop.xlane.xlu1 %171 }
 0x205   :  { %v176_v44 = vmul.f32 0.03125, %v172_v43 }
 0x207   :  { %v178_v45 = vadd.f32 1e-06, %v176_v44 }
 0x208   :  { %v175_v46 = vpop.xlane.xlu1 %174 }
 0x209   :  { %4898 = vrsqrt.f32 %v178_v45  ;;  %v177_v47 = vmul.f32 0.03125, %v175_v46 }
 0x20b   :  { %v179_v49 = vadd.f32 1e-06, %v177_v47 }
 0x20d   :  { %4900 = vrsqrt.f32 %v179_v49 }
 0x216   :  { %v4899_v55 = vpop.eup %4898 }
 0x217   :  { %v182_v56 = vmul.f32 %v4899_v55, %v166_v31 }
 0x219   :  { %v188_v58 = vmul.f32 %v187_v54, %v182_v56 }
 0x21a   :  { %v4901_v59 = vpop.eup %4900 }
 0x21b   :  { %v183_v60 = vmul.f32 %v4901_v59, %v167_v35  ;;  %v194_v61 = vadd.f32 %v193_v57, %v188_v58 }
 0x21d   :  { %v189_v62 = vmul.f32 %v187_v54, %v183_v60  ;;  %4608 = vmatprep.mubr.msk.f32.mxu1 %vm156_vm0, %v194_v61 }
 0x21f   :  { %v195_v63 = vadd.f32 %v193_v57, %v189_v62 }
 0x221   :  { %4609 = vmatmul.mubr.msk.f32.vlgmr.msra.gmra.mxu1 %vm156_vm0, %v195_v63 }
 0x222   :  { %4618 = vmatprep.mubr.msk.f32.mxu1 %vm5013_vm1, %v5012_v0 }
 0x2e1   :  { %v4610_v2 = vpop.f32.mrf.mxu1 }
 0x2e2   :  { %v5215_v3 = vadd.f32 %v4610_v2, %v4305_v1  ;;  %v288_v2 = vld [vmem:[%s5745_s8] sm:$0xff] }
 0x2e3   :  { %v279_v4 = vpop.f32.mrf.mxu1 }
 0x2e4   :  { %v5217_v5 = vadd.f32 %v4305_v1, %v279_v4  ;;  %371 = vrot.lane.b32.xlu1 %v5215_v3, %s5014_s23 }
 0x2e6   :  { %293 = vrot.lane.b32.xlu0 %v5217_v5, %s5014_s23 }
 0x356   :  { %v372_v6 = vpop.permute.xlu1 %371 }
 0x357   :  { %4617 = vmatpush3.xpose.msk.msra.mxu1 %vm295_vm2, %v372_v6 }
 0x358   :  { %v294_v7 = vpop.permute.xlu0 %293  ;;  %4621 = vmatprep.subr.mxu1 %v5012_v0 }
 0x359   :  { %4612 = vmatpush3.xpose.msk.msra.mxu0 %vm295_vm2, %v294_v7 }
 0x35a   :  { %4619 = vmatmul.mubr.msk.f32.vlgmr.msra.gmra.mxu1 %vm295_vm2, %v5215_v3  ;;  %4641 = vmatprep.subr.mxu0 %v5012_v0 }
 0x35b   :  { %4623 = vmatprep.mubr.msk.f32.mxu1 %vm5013_vm1, %v5012_v0 }
 0x35c   :  { %4614 = vmatmul.mubr.msk.f32.vlgmr.msra.gmra.mxu0 %vm295_vm2, %v5217_v5 }
 0x35d   :  { %4643 = vmatprep.mubr.msk.f32.mxu0 %vm5013_vm1, %v5012_v0 }
 0x41a   :  { %v443_v8 = vpop.f32.mrf.mxu1 }
 0x41b   :  { %v448_v9 = vmul.f32 0.35355338, %v443_v8 }
 0x41c   :  { %v366_v10 = vpop.f32.mrf.mxu0  ;;  %v4620_v11 = vpop.f32.mrf.mxu1 }
 0x41d   :  { %v447_v12 = vmul.f32 0.35355338, %v366_v10  ;;  %v452_v13 = vsel %vm295_vm2, %v448_v9, -inf }
 0x41e   :  { %453 = vmax.xlane.f32.xlu0 %v452_v13  ;;  %v4615_v14 = vpop.f32.mrf.mxu0 }
 0x41f   :  { %v449_v15 = vsel %vm295_vm2, %v447_v12, -inf }
 0x420   :  { %450 = vmax.xlane.f32.xlu1 %v449_v15  ;;  %v289_v15 = vld [vmem:[%s5745_s8 + $0x8] sm:$0xff] }
 0x4a7   :  { %v454_v16 = vpop.xlane.xlu0 %453 }
 0x4a8   :  { %v456_v17 = vsub.f32 %v448_v9, %v454_v16 }
 0x4a9   :  { %v451_v18 = vpop.xlane.xlu1 %450 }
 0x4aa   :  { %v459_v19 = vmul.f32 1.442695, %v456_v17  ;;  %v455_v20 = vsub.f32 %v447_v12, %v451_v18 }
 0x4ac   :  { %4902 = vpow2.f32 %v459_v19  ;;  %v457_v21 = vmul.f32 1.442695, %v455_v20 }
 0x4ae   :  { %4904 = vpow2.f32 %v457_v21 }
 0x4b9   :  { %v4903_v22 = vpop.eup %4902 }
 0x4ba   :  { %v464_v23 = vsel %vm295_vm2, %v4903_v22, 0.0 }
 0x4bb   :  { %v4905_v24 = vpop.eup %4904  ;;  %465 = vadd.xlane.f32.xlu1 %v464_v23 }
 0x4bc   :  { %v461_v27 = vsel %vm295_vm2, %v4905_v24, 0.0 }
 0x4bd   :  { %462 = vadd.xlane.f32.xlu0 %v461_v27 }
 0x4cc   :  { %547 = vrot.lane.b32.xlu1 %v5215_v3, %s5015_s24 }
 0x4d0   :  { %625 = vrot.lane.b32.xlu1 %v5217_v5, %s5016_s25 }
 0x4d3   :  { %471 = vrot.lane.b32.xlu0 %v5217_v5, %s5015_s24 }
 0x4d4   :  { %623 = vrot.lane.b32.xlu1 %v5217_v5, %s5017_s26 }
 0x4d7   :  { %703 = vrot.lane.b32.xlu0 %v5215_v3, %s5016_s25 }
 0x4d8   :  { %701 = vrot.lane.b32.xlu1 %v5215_v3, %s5017_s26 }
 0x544   :  { %v466_v28 = vpop.xlane.xlu1 %465 }
 0x546   :  { %v463_v29 = vpop.xlane.xlu0 %462 }
 0x547   :  { %4906 = vrcp.f32 %v463_v29 }
 0x548   :  { %4908 = vrcp.f32 %v466_v28  ;;  %v548_v31 = vpop.permute.xlu1 %547 }
 0x54a   :  { %v472_v30 = vpop.permute.xlu0 %471 }
 0x54b   :  { %4622 = vmatpush3.msra.mxu1 %v472_v30 }
 0x54c   :  { %4626 = vmatprep.subr.mxu1 %v5012_v0  ;;  %v626_v35 = vpop.permute.xlu1 %625 }
 0x54e   :  { %v704_v38 = vpop.permute.xlu0 %703 }
 0x550   :  { %v624_v37 = vpop.permute.xlu1 %623 }
 0x554   :  { %v4907_v32 = vpop.eup %4906  ;;  %v702_v39 = vpop.permute.xlu1 %701 }
 0x555   :  { %v469_v33 = vmul.f32 %v4907_v32, %v4905_v24  ;;  %v4909_v34 = vpop.eup %4908 }
 0x556   :  { %v470_v36 = vmul.f32 %v4909_v34, %v4903_v22 }
 0x557   :  { %4624 = vmatmul.mubr.msk.f32.vlgmr.msra.gmra.mxu1 %vm295_vm2, %v469_v33 }
 0x558   :  { %4627 = vmatpush3.msra.mxu1 %v548_v31  ;;  %4628 = vmatprep.mubr.msk.f32.mxu1 %vm5013_vm1, %v5012_v0 }
 0x559   :  { %4631 = vmatprep.subr.mxu1 %v5012_v0 }
 0x55b   :  { %4629 = vmatmul.mubr.msk.f32.vlgmr.msra.gmra.mxu1 %vm295_vm2, %v470_v36 }
 0x55c   :  { %4632 = vmatpush3.xpose.msk.msra.mxu1 %vm295_vm2, %v626_v35  ;;  %4633 = vmatprep.mubr.msk.f32.mxu1 %vm5013_vm1, %v5012_v0 }
 0x55d   :  { %4636 = vmatprep.subr.mxu1 %v5012_v0 }
 0x55f   :  { %4634 = vmatmul.mubr.msk.f32.vlgmr.msra.gmra.mxu1 %vm295_vm2, %v624_v37 }
 0x560   :  { %4637 = vmatpush3.xpose.msk.msra.mxu1 %vm295_vm2, %v704_v38  ;;  %4638 = vmatprep.mubr.msk.f32.mxu1 %vm5013_vm1, %v5012_v0 }
 0x561   :  { %4646 = vmatprep.subr.mxu1 %v5012_v0 }
 0x563   :  { %4639 = vmatmul.mubr.msk.f32.vlgmr.msra.gmra.mxu1 %vm295_vm2, %v702_v39 }
 0x564   :  { %4648 = vmatprep.mubr.msk.f32.mxu1 %vm5013_vm1, %v5012_v0 }
 0x617   :  { %v543_v40 = vpop.f32.mrf.mxu1 }
 0x619   :  { %v4625_v41 = vpop.f32.mrf.mxu1 }
 0x61b   :  { %v619_v42 = vpop.f32.mrf.mxu1 }
 0x61d   :  { %v4630_v43 = vpop.f32.mrf.mxu1 }
 0x61f   :  { %v697_v44 = vpop.f32.mrf.mxu1 }
 0x620   :  { %v779_v45 = vmul.f32 0.35355338, %v697_v44 }
 0x621   :  { %v4635_v46 = vpop.f32.mrf.mxu1 }
 0x622   :  { %v781_v47 = vsel %vm295_vm2, %v779_v45, -inf }
 0x623   :  { %782 = vmax.xlane.f32.xlu0 %v781_v47  ;;  %v775_v48 = vpop.f32.mrf.mxu1 }
 0x624   :  { %v780_v49 = vmul.f32 0.35355338, %v775_v48 }
 0x625   :  { %v4640_v50 = vpop.f32.mrf.mxu1 }
 0x626   :  { %v784_v52 = vsel %vm295_vm2, %v780_v49, -inf }
 0x627   :  { %785 = vmax.xlane.f32.xlu1 %v784_v52 }
 0x638   :  { %879 = vrot.lane.b32.xlu1 %v5215_v3, %s5018_s27 }
 0x63c   :  { %1119 = vrot.lane.b32.xlu1 %v5217_v5, %s5019_s1 }
 0x640   :  { %1197 = vrot.lane.b32.xlu1 %v5215_v3, %s5019_s1 }
 0x644   :  { %1195 = vrot.lane.b32.xlu1 %v5215_v3, %s5020_s28 }
 0x6ac   :  { %v783_v54 = vpop.xlane.xlu0 %782 }
 0x6ad   :  { %v787_v55 = vsub.f32 %v779_v45, %v783_v54 }
 0x6af   :  { %v789_v56 = vmul.f32 1.442695, %v787_v55 }
 0x6b0   :  { %v786_v57 = vpop.xlane.xlu1 %785 }
 0x6b1   :  { %4910 = vpow2.f32 %v789_v56  ;;  %v788_v58 = vsub.f32 %v780_v49, %v786_v57 }
 0x6b3   :  { %v791_v59 = vmul.f32 1.442695, %v788_v58 }
 0x6b4   :  { %v880_v60 = vpop.permute.xlu1 %879 }
 0x6b5   :  { %4912 = vpow2.f32 %v791_v59  ;;  %4647 = vmatpush3.msra.mxu1 %v880_v60  ;;  %v290_v59 = vld [vmem:[%s5745_s8 + $0x10] sm:$0xff] }
 0x6b6   :  { %4656 = vmatprep.subr.mxu1 %v288_v2 }
 0x6b8   :  { %v1120_v10 = vpop.permute.xlu1 %1119 }
 0x6bc   :  { %v1198_v13 = vpop.permute.xlu1 %1197 }
 0x6be   :  { %v4911_v61 = vpop.eup %4910 }
 0x6bf   :  { %v793_v62 = vsel %vm295_vm2, %v4911_v61, 0.0 }
 0x6c0   :  { %794 = vadd.xlane.f32.xlu0 %v793_v62  ;;  %v1196_v14 = vpop.permute.xlu1 %1195 }
 0x6c2   :  { %v4913_v63 = vpop.eup %4912 }
 0x6c3   :  { %v796_v1 = vsel %vm295_vm2, %v4913_v63, 0.0 }
 0x6c4   :  { %797 = vadd.xlane.f32.xlu0 %v796_v1 }
 0x6da   :  { %803 = vrot.lane.b32.xlu0 %v5217_v5, %s5018_s27 }
 0x6de   :  { %1117 = vrot.lane.b32.xlu0 %v5217_v5, %s5020_s28 }
 0x749   :  { %v795_v4 = vpop.xlane.xlu0 %794 }
 0x74a   :  { %4914 = vrcp.f32 %v795_v4 }
 0x74d   :  { %v798_v6 = vpop.xlane.xlu0 %797 }
 0x74e   :  { %4916 = vrcp.f32 %v798_v6 }
 0x751   :  { %v804_v7 = vpop.permute.xlu0 %803 }
 0x752   :  { %4642 = vmatpush3.msra.mxu0 %v804_v7 }
 0x753   :  { %4651 = vmatprep.subr.mxu0 %v289_v15 }
 0x755   :  { %v1118_v20 = vpop.permute.xlu0 %1117 }
 0x757   :  { %v4915_v8 = vpop.eup %4914 }
 0x758   :  { %v801_v9 = vmul.f32 %v4915_v8, %v4911_v61 }
 0x75a   :  { %4644 = vmatmul.mubr.msk.f32.vlgmr.msra.gmra.mxu0 %vm295_vm2, %v801_v9 }
 0x75b   :  { %v4917_v11 = vpop.eup %4916  ;;  %4652 = vmatpush3.msra.mxu0 %v289_v15 }
 0x75c   :  { %v802_v12 = vmul.f32 %v4917_v11, %v4913_v63  ;;  %4661 = vmatprep.subr.mxu0 %v5012_v0 }
 0x75e   :  { %4649 = vmatmul.mubr.msk.f32.vlgmr.msra.gmra.mxu1 %vm295_vm2, %v802_v12 }
 0x75f   :  { %4658 = vmatprep.mubr.msk.f32.mxu1 %vm295_vm2, %v543_v40  ;;  %4657 = vmatpush3.msra.mxu1 %v288_v2 }
 0x760   :  { %4666 = vmatprep.subr.mxu1 %v5012_v0 }
 0x762   :  { %4659 = vmatmul.mubr.msk.f32.vlgmr.msra.gmra.mxu1 %vm295_vm2, %v619_v42 }
 0x763   :  { %4667 = vmatpush3.xpose.msk.msra.mxu1 %vm295_vm2, %v1198_v13  ;;  %4668 = vmatprep.mubr.msk.f32.mxu1 %vm5013_vm1, %v5012_v0 }
 0x764   :  { %4676 = vmatprep.subr.mxu1 %v5012_v0 }
 0x766   :  { %4669 = vmatmul.mubr.msk.f32.vlgmr.msra.gmra.mxu1 %vm295_vm2, %v1196_v14 }
 0x767   :  { %4678 = vmatprep.mubr.msk.f32.mxu1 %vm5013_vm1, %v5012_v0 }
 0x81a   :  { %v875_v16 = vpop.f32.mrf.mxu0 }
 0x81b   :  { %4653 = vmatprep.mubr.msk.f32.mxu0 %vm295_vm2, %v875_v16 }
 0x81c   :  { %v4645_v17 = vpop.f32.mrf.mxu0 }
 0x81e   :  { %v951_v18 = vpop.f32.mrf.mxu1 }
 0x81f   :  { %4654 = vmatmul.mubr.msk.f32.vlgmr.msra.gmra.mxu0 %vm295_vm2, %v951_v18 }
 0x820   :  { %4662 = vmatpush3.xpose.msk.msra.mxu0 %vm295_vm2, %v1120_v10  ;;  %v4650_v19 = vpop.f32.mrf.mxu1  ;;  %4663 = vmatprep.mubr.msk.f32.mxu0 %vm5013_vm1, %v5012_v0 }
 0x821   :  { %4671 = vmatprep.subr.mxu0 %v5012_v0 }
 0x822   :  { %v5310_v21 = vpop.f32.mrf.mxu1 }
 0x823   :  { %4664 = vmatmul.mubr.msk.f32.vlgmr.msra.gmra.mxu0 %vm295_vm2, %v1118_v20 }
 0x824   :  { %v5313_v22 = vpop.f32.mrf.mxu1  ;;  %4673 = vmatprep.mubr.msk.f32.mxu0 %vm5013_vm1, %v5012_v0 }
 0x826   :  { %v1269_v23 = vpop.f32.mrf.mxu1 }
 0x827   :  { %v1274_v24 = vmul.f32 0.35355338, %v1269_v23 }
 0x828   :  { %v4670_v27 = vpop.f32.mrf.mxu1 }
 0x829   :  { %v1278_v28 = vsel %vm295_vm2, %v1274_v24, -inf }
 0x82a   :  { %1279 = vmax.xlane.f32.xlu1 %v1278_v28 }
 0x83b   :  { %1373 = vrot.lane.b32.xlu1 %v5215_v3, %s5021_s30 }
 0x83f   :  { %1534 = vrot.lane.b32.xlu1 %v5217_v5, %s5022_s16 }
 0x843   :  { %1612 = vrot.lane.b32.xlu1 %v5215_v3, %s5022_s16 }
 0x847   :  { %1610 = vrot.lane.b32.xlu1 %v5215_v3, %s5023_s17 }
 0x8b3   :  { %v1280_v29 = vpop.xlane.xlu1 %1279 }
 0x8b4   :  { %v1282_v31 = vsub.f32 %v1274_v24, %v1280_v29 }
 0x8b6   :  { %v1285_v32 = vmul.f32 1.442695, %v1282_v31 }
 0x8b7   :  { %v1374_v30 = vpop.permute.xlu1 %1373 }
 0x8b8   :  { %4677 = vmatpush3.msra.mxu1 %v1374_v30  ;;  %4918 = vpow2.f32 %v1285_v32 }
 0x8b9   :  { %4686 = vmatprep.subr.mxu1 %v5012_v0 }
 0x8bb   :  { %v1535_v49 = vpop.permute.xlu1 %1534 }
 0x8bf   :  { %v1613_v1 = vpop.permute.xlu1 %1612 }
 0x8c3   :  { %v1611_v6 = vpop.permute.xlu1 %1610 }
 0x8c5   :  { %v4919_v39 = vpop.eup %4918 }
 0x8c6   :  { %v1290_v40 = vsel %vm295_vm2, %v4919_v39, 0.0 }
 0x8df   :  { %v5327_v33 = vpop.f32.mrf.mxu0 }
 0x8e0   :  { %v1114_v12 = vadd.f32 %v5310_v21, %v5327_v33 }
 0x8e1   :  { %v5329_v34 = vpop.f32.mrf.mxu0 }
 0x8e2   :  { %v1109_v14 = vadd.f32 %v5313_v22, %v5329_v34 }
 0x8e3   :  { %v1191_v35 = vpop.f32.mrf.mxu0 }
 0x8e4   :  { %v1273_v36 = vmul.f32 0.35355338, %v1191_v35 }
 0x8e5   :  { %v4665_v37 = vpop.f32.mrf.mxu0 }
 0x8e6   :  { %v1275_v38 = vsel %vm295_vm2, %v1273_v36, -inf }
 0x8e7   :  { %1276 = vmax.xlane.f32.xlu0 %v1275_v38 }
 0x8eb   :  { %1291 = vadd.xlane.f32.xlu0 %v1290_v40 }
 0x970   :  { %v1277_v41 = vpop.xlane.xlu0 %1276 }
 0x971   :  { %v1281_v42 = vsub.f32 %v1273_v36, %v1277_v41  ;;  %v291_v36 = vld [vmem:[%s5745_s8 + $0x18] sm:$0xff]  ;;  %v4340_v41 = vld [vmem:[%s5746_s9] ss:$0 sm:$0xff] }
 0x973   :  { %v1283_v43 = vmul.f32 1.442695, %v1281_v42 }
 0x974   :  { %v1292_v44 = vpop.xlane.xlu0 %1291 }
 0x975   :  { %4920 = vpow2.f32 %v1283_v43 }
 0x976   :  { %4922 = vrcp.f32 %v1292_v44 }
 0x982   :  { %v4921_v45 = vpop.eup %4920 }
 0x983   :  { %v4923_v46 = vpop.eup %4922  ;;  %v1287_v47 = vsel %vm295_vm2, %v4921_v45, 0.0 }
 0x984   :  { %1288 = vadd.xlane.f32.xlu0 %v1287_v47  ;;  %v1296_v48 = vmul.f32 %v4923_v46, %v4919_v39 }
 0x986   :  { %4679 = vmatmul.mubr.msk.f32.vlgmr.msra.gmra.mxu1 %vm295_vm2, %v1296_v48 }
 0x987   :  { %4687 = vmatpush3.xpose.msk.msra.mxu1 %vm295_vm2, %v1535_v49  ;;  %4688 = vmatprep.mubr.msk.f32.mxu1 %vm5013_vm1, %v5012_v0 }
 0x988   :  { %4696 = vmatprep.subr.mxu1 %v5012_v0 }
 0x99a   :  { %1297 = vrot.lane.b32.xlu0 %v5217_v5, %s5021_s30 }
 0x99e   :  { %1532 = vrot.lane.b32.xlu0 %v5217_v5, %s5023_s17 }
 0xa0d   :  { %v1289_v50 = vpop.xlane.xlu0 %1288 }
 0xa0e   :  { %4924 = vrcp.f32 %v1289_v50 }
 0xa11   :  { %v1298_v52 = vpop.permute.xlu0 %1297 }
 0xa12   :  { %4672 = vmatpush3.msra.mxu0 %v1298_v52 }
 0xa13   :  { %4681 = vmatprep.subr.mxu0 %v290_v59 }
 0xa15   :  { %v1533_v54 = vpop.permute.xlu0 %1532 }
 0xa16   :  { %4689 = vmatmul.mubr.msk.f32.vlgmr.msra.gmra.mxu1 %vm295_vm2, %v1533_v54 }
 0xa17   :  { %4698 = vmatprep.mubr.msk.f32.mxu1 %vm5013_vm1, %v5012_v0 }
 0xa1b   :  { %v4925_v55 = vpop.eup %4924 }
 0xa1c   :  { %v1295_v56 = vmul.f32 %v4925_v55, %v4921_v45 }
 0xa1e   :  { %4674 = vmatmul.mubr.msk.f32.vlgmr.msra.gmra.mxu0 %vm295_vm2, %v1295_v56 }
 0xa1f   :  { %4682 = vmatpush3.msra.mxu0 %v290_v59 }
 0xa20   :  { %4691 = vmatprep.subr.mxu0 %v5012_v0 }
 0xa46   :  { %v1445_v57 = vpop.f32.mrf.mxu1 }
 0xa48   :  { %v4680_v58 = vpop.f32.mrf.mxu1 }
 0xad6   :  { %v1606_v60 = vpop.f32.mrf.mxu1 }
 0xad7   :  { %v1688_v61 = vmul.f32 0.35355338, %v1606_v60 }
 0xad8   :  { %v4690_v62 = vpop.f32.mrf.mxu1 }
 0xad9   :  { %v1690_v63 = vsel %vm295_vm2, %v1688_v61, -inf  ;;  %v1999_v62 = vld [vmem:[%s5747_s10 + $0x10] sm:$0xff] }
 0xada   :  { %1691 = vmax.xlane.f32.xlu0 %v1690_v63  ;;  %v1998_v63 = vld [vmem:[%s5747_s10 + $0x8] sm:$0xff] }
 0xade   :  { %v1369_v2 = vpop.f32.mrf.mxu0 }
 0xadf   :  { %4683 = vmatprep.mubr.msk.f32.mxu0 %vm295_vm2, %v1369_v2 }
 0xae0   :  { %v4675_v4 = vpop.f32.mrf.mxu0  ;;  %4684 = vmatmul.mubr.msk.f32.vlgmr.msra.gmra.mxu0 %vm295_vm2, %v1445_v57 }
 0xae1   :  { %4692 = vmatpush3.xpose.msk.msra.mxu0 %vm295_vm2, %v1613_v1  ;;  %4693 = vmatprep.mubr.msk.f32.mxu0 %vm5013_vm1, %v5012_v0  ;;  %v1997_v1 = vld [vmem:[%s5747_s10] sm:$0xff] }
 0xae2   :  { %4701 = vmatprep.subr.mxu0 %v5012_v0 }
 0xae4   :  { %4694 = vmatmul.mubr.msk.f32.vlgmr.msra.gmra.mxu0 %vm295_vm2, %v1611_v6 }
 0xae5   :  { %4703 = vmatprep.mubr.msk.f32.mxu0 %vm5013_vm1, %v5012_v0 }
 0xb63   :  { %v1692_v7 = vpop.xlane.xlu0 %1691 }
 0xb64   :  { %v1696_v8 = vsub.f32 %v1688_v61, %v1692_v7  ;;  %v2000_v61 = vld [vmem:[%s5747_s10 + $0x18] sm:$0xff] }
 0xb66   :  { %v1698_v9 = vmul.f32 1.442695, %v1696_v8 }
 0xb68   :  { %4926 = vpow2.f32 %v1698_v9 }
 0xb75   :  { %v4927_v10 = vpop.eup %4926 }
 0xb76   :  { %v1702_v11 = vsel %vm295_vm2, %v4927_v10, 0.0 }
 0xb77   :  { %1703 = vadd.xlane.f32.xlu0 %v1702_v11 }
 0xba0   :  { %v4685_v13 = vpop.f32.mrf.mxu0 }
 0xba1   :  { %v1531_v15 = vadd.f32 %v4685_v13, %v1114_v12 }
 0xba2   :  { %v1521_v16 = vpop.f32.mrf.mxu0 }
 0xba3   :  { %v1530_v17 = vadd.f32 %v1521_v16, %v1109_v14 }
 0xba4   :  { %v1684_v18 = vpop.f32.mrf.mxu0 }
 0xba5   :  { %v1689_v19 = vmul.f32 0.35355338, %v1684_v18 }
 0xba6   :  { %v4695_v20 = vpop.f32.mrf.mxu0 }
 0xba7   :  { %v1693_v23 = vsel %vm295_vm2, %v1689_v19, -inf }
 0xba8   :  { %1694 = vmax.xlane.f32.xlu1 %v1693_v23  ;;  %v2106_v23 = vld [vmem:[%s5749_s12 + $0x38] sm:$0xff] }
 0xbb9   :  { %1788 = vrot.lane.b32.xlu1 %v5215_v3, %s5024_s20 }
 0xc00   :  { %v1704_v30 = vpop.xlane.xlu0 %1703 }
 0xc31   :  { %v1695_v24 = vpop.xlane.xlu1 %1694 }
 0xc32   :  { %v1697_v27 = vsub.f32 %v1689_v19, %v1695_v24  ;;  %v2105_v24 = vld [vmem:[%s5749_s12 + $0x30] sm:$0xff] }
 0xc34   :  { %v1700_v21 = vmul.f32 1.442695, %v1697_v27  ;;  %v2104_v27 = vld [vmem:[%s5749_s12 + $0x28] sm:$0xff] }
 0xc35   :  { %v1789_v28 = vpop.permute.xlu1 %1788 }
 0xc36   :  { %4928 = vpow2.f32 %v1700_v21  ;;  %4702 = vmatpush3.msra.mxu0 %v1789_v28  ;;  %v2103_v21 = vld [vmem:[%s5749_s12 + $0x20] sm:$0xff]  ;;  %v2102_v28 = vld [vmem:[%s5749_s12 + $0x18] sm:$0xff] }
 0xc37   :  { %4930 = vrcp.f32 %v1704_v30  ;;  %4711 = vmatprep.subr.mxu0 %v2000_v61  ;;  %v2099_v30 = vld [vmem:[%s5749_s12] sm:$0xff] }
 0xc43   :  { %v4929_v22 = vpop.eup %4928 }
 0xc44   :  { %v1705_v29 = vsel %vm295_vm2, %v4929_v22, 0.0  ;;  %v4931_v32 = vpop.eup %4930 }
 0xc45   :  { %1706 = vadd.xlane.f32.xlu0 %v1705_v29  ;;  %v1710_v3 = vmul.f32 %v4931_v32, %v4927_v10  ;;  %v1958_v10 = vld [vmem:[%s5742_s5] sm:$0x3]  ;;  %v2100_v29 = vld [vmem:[%s5749_s12 + $0x8] sm:$0xff] }
 0xc46   :  { %v1988_v12 = vrot.slane %v1958_v10, %v5195_v51 }
 0xc5b   :  { %1712 = vrot.lane.b32.xlu0 %v5217_v5, %s5024_s20 }
 0xcce   :  { %v1707_v31 = vpop.xlane.xlu0 %1706 }
 0xccf   :  { %4932 = vrcp.f32 %v1707_v31  ;;  %v4341_v31 = vld [vmem:[%s5748_s11] ss:$0 sm:$0xff] }
 0xcd2   :  { %v1713_v33 = vpop.permute.xlu0 %1712 }
 0xcd3   :  { %4697 = vmatpush3.msra.mxu1 %v1713_v33 }
 0xcd4   :  { %4699 = vmatmul.mubr.msk.f32.vlgmr.msra.gmra.mxu1 %vm295_vm2, %v1710_v3  ;;  %4706 = vmatprep.subr.mxu1 %v291_v36 }
 0xcd5   :  { %4707 = vmatpush3.msra.mxu1 %v291_v36 }
 0xcd6   :  { %4722 = vmatprep.subr.mxu1 %v2106_v23 }
 0xcdc   :  { %v4933_v34 = vpop.eup %4932 }
 0xcdd   :  { %v1711_v35 = vmul.f32 %v4933_v34, %v4929_v22  ;;  %v2101_v22 = vld [vmem:[%s5749_s12 + $0x10] sm:$0xff] }
 0xcdf   :  { %4704 = vmatmul.mubr.msk.f32.vlgmr.msra.gmra.mxu0 %vm295_vm2, %v1711_v35 }
 0xce0   :  { %4712 = vmatpush3.msra.mxu0 %v2000_v61 }
 0xce1   :  { %4713 = vmatprep.subr.mxu0 %v1999_v62 }
 0xce2   :  { %4714 = vmatpush3.msra.mxu0 %v1999_v62 }
 0xce3   :  { %4715 = vmatprep.subr.mxu0 %v1998_v63 }
 0xce4   :  { %4716 = vmatpush3.msra.mxu0 %v1998_v63  ;;  %v4351_v63 = vld [vmem:[%s5743_s6 + $0x38] sm:$0xff] }
 0xce5   :  { %4717 = vmatprep.subr.mxu0 %v1997_v1 }
 0xce6   :  { %4718 = vmatpush3.msra.mxu0 %v1997_v1  ;;  %v4350_v1 = vld [vmem:[%s5743_s6 + $0x30] sm:$0xff] }
 0xce7   :  { %4741 = vmatprep.subr.mxu0 %v4351_v63 }
 0xd94   :  { %v1784_v5 = vpop.f32.mrf.mxu1 }
 0xd95   :  { %4708 = vmatprep.mubr.msk.f32.mxu1 %vm295_vm2, %v1784_v5 }
 0xd96   :  { %v4700_v37 = vpop.f32.mrf.mxu1 }
 0xd9f   :  { %v1860_v38 = vpop.f32.mrf.mxu0 }
 0xda0   :  { %4709 = vmatmul.mubr.msk.f32.vlgmr.msra.gmra.mxu1 %vm295_vm2, %v1860_v38 }
 0xda1   :  { %v4705_v39 = vpop.f32.mrf.mxu0  ;;  %4723 = vmatpush3.msra.mxu1 %v2106_v23 }
 0xda2   :  { %4724 = vmatprep.subr.mxu1 %v2105_v24 }
 0xda3   :  { %4725 = vmatpush3.msra.mxu1 %v2105_v24 }
 0xda4   :  { %4726 = vmatprep.subr.mxu1 %v2104_v27 }
 0xda5   :  { %4727 = vmatpush3.msra.mxu1 %v2104_v27  ;;  %v4353_v27 = vld [vmem:[%s5744_s7 + $0x1] ss:$0 sm:$0xff] }
 0xda6   :  { %4728 = vmatprep.subr.mxu1 %v2103_v21 }
 0xda7   :  { %4729 = vmatpush3.msra.mxu1 %v2103_v21 }
 0xda8   :  { %4730 = vmatprep.subr.mxu1 %v2102_v28 }
 0xda9   :  { %4731 = vmatpush3.msra.mxu1 %v2102_v28 }
 0xdaa   :  { %4732 = vmatprep.subr.mxu1 %v2101_v22 }
 0xdab   :  { %4733 = vmatpush3.msra.mxu1 %v2101_v22 }
 0xdac   :  { %4734 = vmatprep.subr.mxu1 %v2100_v29 }
 0xdad   :  { %4735 = vmatpush3.msra.mxu1 %v2100_v29 }
 0xdae   :  { %4736 = vmatprep.subr.mxu1 %v2099_v30 }
 0xdaf   :  { %4737 = vmatpush3.msra.mxu1 %v2099_v30 }
 0xdb0   :  { %4757 = vmatprep.subr.mxu1 %v5012_v0 }
 0xe60   :  { %v4710_v40 = vpop.f32.mrf.mxu1 }
 0xe61   :  { %v1946_v42 = vadd.f32 %v4710_v40, %v1531_v15 }
 0xe62   :  { %v1936_v43 = vpop.f32.mrf.mxu1 }
 0xe63   :  { %v1955_v44 = vadd.f32 %v4340_v41, %v1946_v42  ;;  %v1945_v45 = vadd.f32 %v1936_v43, %v1530_v17  ;;  %v1994_v17 = vrot.slane %v1958_v10, %v5200_v53 }
 0xe65   :  { %v5383_v46 = vadd.f32 %v1955_v44, %v5173_v26  ;;  %v1954_v47 = vadd.f32 %v4340_v41, %v1945_v45  ;;  %v4344_v44 = vld [vmem:[%s5750_s13] ss:$0 sm:$0xff] }
 0xe67   :  { %v5386_v48 = vadd.f32 %v1954_v47, %v5171_v25  ;;  %v1962_v49 = vsel %vm156_vm0, %v5383_v46, 0.0 }
 0xe68   :  { %1963 = vadd.xlane.f32.xlu0 %v1962_v49 }
 0xe69   :  { %v1959_v50 = vsel %vm156_vm0, %v5386_v48, 0.0 }
 0xe6a   :  { %1960 = vadd.xlane.f32.xlu1 %v1959_v50 }
 0xef1   :  { %v1964_v52 = vpop.xlane.xlu0 %1963 }
 0xef2   :  { %v1966_v54 = vmul.f32 0.03125, %v1964_v52 }
 0xef3   :  { %v1961_v55 = vpop.xlane.xlu1 %1960 }
 0xef4   :  { %v1968_v56 = vsub.f32 %v5383_v46, %v1966_v54  ;;  %v1965_v57 = vmul.f32 0.03125, %v1961_v55 }
 0xef6   :  { %v1967_v26 = vsub.f32 %v5386_v48, %v1965_v57  ;;  %v1970_v58 = vmul.f32 %v1968_v56, %v1968_v56 }
 0xef8   :  { %v1974_v25 = vsel %vm156_vm0, %v1970_v58, 0.0  ;;  %v1969_v59 = vmul.f32 %v1967_v26, %v1967_v26 }
 0xef9   :  { %1975 = vadd.xlane.f32.xlu1 %v1974_v25 }
 0xefa   :  { %v1971_v60 = vsel %vm156_vm0, %v1969_v59, 0.0 }
 0xefb   :  { %1972 = vadd.xlane.f32.xlu0 %v1971_v60 }
 0xf82   :  { %v1976_v2 = vpop.xlane.xlu1 %1975 }
 0xf83   :  { %v1978_v4 = vmul.f32 0.03125, %v1976_v2  ;;  %v4349_v2 = vld [vmem:[%s5743_s6 + $0x28] sm:$0xff] }
 0xf84   :  { %v1973_v6 = vpop.xlane.xlu0 %1972 }
 0xf85   :  { %v1980_v7 = vadd.f32 1e-06, %v1978_v4  ;;  %v1977_v8 = vmul.f32 0.03125, %v1973_v6  ;;  %v4348_v4 = vld [vmem:[%s5743_s6 + $0x20] sm:$0xff] }
 0xf87   :  { %4934 = vrsqrt.f32 %v1980_v7  ;;  %v1979_v9 = vadd.f32 1e-06, %v1977_v8 }
 0xf89   :  { %4936 = vrsqrt.f32 %v1979_v9 }
 0xf94   :  { %v4935_v11 = vpop.eup %4934 }
 0xf95   :  { %v1984_v13 = vmul.f32 %v4935_v11, %v1968_v56 }
 0xf96   :  { %v4937_v14 = vpop.eup %4936 }
 0xf97   :  { %v1983_v15 = vmul.f32 %v4937_v14, %v1967_v26  ;;  %v1990_v16 = vmul.f32 %v1988_v12, %v1984_v13 }
 0xf99   :  { %v1989_v18 = vmul.f32 %v1988_v12, %v1983_v15  ;;  %v1996_v20 = vadd.f32 %v1994_v17, %v1990_v16  ;;  %v4347_v12 = vld [vmem:[%s5741_s4 + $0x2] sm:$0x3] }
 0xf9a   :  { %v2229_v14 = vrot.slane %v4347_v12, %v5195_v51 }
 0xf9b   :  { %v1995_v19 = vadd.f32 %v1994_v17, %v1989_v18 }
 0xf9d   :  { %4719 = vmatprep.mubr.msk.f32.mxu0 %vm156_vm0, %v1995_v19  ;;  %v2235_v19 = vrot.slane %v4347_v12, %v5200_v53 }
 0xf9e   :  { %4720 = vmatmul.mubr.msk.f32.vlgmr.msra.gmra.mxu0 %vm156_vm0, %v1996_v20 }
 0xf9f   :  { %4742 = vmatpush3.msra.mxu0 %v4351_v63 }
 0xfa0   :  { %4743 = vmatprep.subr.mxu0 %v4350_v1 }
 0xfa1   :  { %4744 = vmatpush3.msra.mxu0 %v4350_v1 }
 0xfa2   :  { %4745 = vmatprep.subr.mxu0 %v4349_v2 }
 0xfa3   :  { %4746 = vmatpush3.msra.mxu0 %v4349_v2 }
 0xfa4   :  { %4747 = vmatprep.subr.mxu0 %v4348_v4 }
 0xfa5   :  { %4748 = vmatpush3.msra.mxu0 %v4348_v4 }
 0xfa6   :  { %4752 = vmatprep.subr.mxu0 %v5012_v0 }
0x105e   :  { %v4721_v32 = vpop.f32.mrf.mxu0 }
0x105f   :  { %v2086_v33 = vadd.f32 %v4721_v32, %v4341_v31 }
0x1060   :  { %v2080_v3 = vpop.f32.mrf.mxu0 }
0x1061   :  { %v2092_v34 = vmul.f32 0.70710677, %v2086_v33  ;;  %v2081_v35 = vadd.f32 %v4341_v31, %v2080_v3  ;;  %v2090_v41 = vmul.f32 0.5, %v2086_v33 }
0x1063   :  { %4938 = verf.f32 %v2092_v34  ;;  %v2091_v36 = vmul.f32 0.70710677, %v2081_v35  ;;  %v2089_v39 = vmul.f32 0.5, %v2081_v35 }
0x1065   :  { %4940 = verf.f32 %v2091_v36 }
0x1070   :  { %v4939_v5 = vpop.eup %4938 }
0x1071   :  { %v2096_v38 = vadd.f32 1.0, %v4939_v5 }
0x1072   :  { %v4941_v37 = vpop.eup %4940 }
0x1073   :  { %v2095_v40 = vadd.f32 1.0, %v4941_v37  ;;  %v2098_v43 = vmul.f32 %v2096_v38, %v2090_v41 }
0x1075   :  { %v2097_v42 = vmul.f32 %v2095_v40, %v2089_v39 }
0x1077   :  { %4738 = vmatprep.mubr.msk.f32.mxu1 %vm2114_vm3, %v2097_v42 }
0x1078   :  { %4739 = vmatmul.mubr.msk.f32.vlgmr.msra.gmra.mxu1 %vm2114_vm3, %v2098_v43 }
0x1079   :  { %4759 = vmatprep.mubr.msk.f32.mxu1 %vm5013_vm1, %v5012_v0 }
0x1138   :  { %v4740_v45 = vpop.f32.mrf.mxu1 }
0x1139   :  { %v2193_v47 = vadd.f32 %v4740_v45, %v4344_v44 }
0x113a   :  { %v2187_v49 = vpop.f32.mrf.mxu1 }
0x113b   :  { %v5451_v50 = vadd.f32 %v2193_v47, %v5383_v46  ;;  %v2188_v52 = vadd.f32 %v4344_v44, %v2187_v49 }
0x113d   :  { %v5454_v54 = vadd.f32 %v2188_v52, %v5386_v48  ;;  %v2203_v55 = vsel %vm156_vm0, %v5451_v50, 0.0 }
0x113e   :  { %2204 = vadd.xlane.f32.xlu1 %v2203_v55 }
0x113f   :  { %v2200_v56 = vsel %vm156_vm0, %v5454_v54, 0.0 }
0x1140   :  { %2201 = vadd.xlane.f32.xlu0 %v2200_v56 }
0x11c7   :  { %v2205_v57 = vpop.xlane.xlu1 %2204 }
0x11c8   :  { %v2207_v26 = vmul.f32 0.03125, %v2205_v57 }
0x11c9   :  { %v2202_v58 = vpop.xlane.xlu0 %2201 }
0x11ca   :  { %v2209_v25 = vsub.f32 %v5451_v50, %v2207_v26  ;;  %v2206_v59 = vmul.f32 0.03125, %v2202_v58 }
0x11cc   :  { %v2208_v46 = vsub.f32 %v5454_v54, %v2206_v59  ;;  %v2211_v60 = vmul.f32 %v2209_v25, %v2209_v25 }
0x11ce   :  { %v2215_v48 = vsel %vm156_vm0, %v2211_v60, 0.0  ;;  %v2210_v61 = vmul.f32 %v2208_v46, %v2208_v46 }
0x11cf   :  { %2216 = vadd.xlane.f32.xlu1 %v2215_v48 }
0x11d0   :  { %v2212_v62 = vsel %vm156_vm0, %v2210_v61, 0.0 }
0x11d1   :  { %2213 = vadd.xlane.f32.xlu0 %v2212_v62 }
0x1258   :  { %v2217_v6 = vpop.xlane.xlu1 %2216 }
0x1259   :  { %v2219_v7 = vmul.f32 0.03125, %v2217_v6 }
0x125a   :  { %v2214_v8 = vpop.xlane.xlu0 %2213 }
0x125b   :  { %v2221_v9 = vadd.f32 1e-06, %v2219_v7  ;;  %v2218_v10 = vmul.f32 0.03125, %v2214_v8 }
0x125d   :  { %4942 = vrsqrt.f32 %v2221_v9  ;;  %v2220_v11 = vadd.f32 1e-06, %v2218_v10 }
0x125f   :  { %4944 = vrsqrt.f32 %v2220_v11 }
0x126a   :  { %v4943_v13 = vpop.eup %4942 }
0x126b   :  { %v2225_v15 = vmul.f32 %v4943_v13, %v2209_v25 }
0x126c   :  { %v4945_v16 = vpop.eup %4944 }
0x126d   :  { %v2224_v17 = vmul.f32 %v4945_v16, %v2208_v46  ;;  %v2231_v18 = vmul.f32 %v2229_v14, %v2225_v15 }
0x126f   :  { %v2230_v20 = vmul.f32 %v2229_v14, %v2224_v17  ;;  %v2237_v24 = vadd.f32 %v2235_v19, %v2231_v18 }
0x1271   :  { %v2236_v23 = vadd.f32 %v2235_v19, %v2230_v20 }
0x1273   :  { %4749 = vmatprep.mubr.msk.f32.mxu0 %vm156_vm0, %v2236_v23 }
0x1274   :  { %4750 = vmatmul.mubr.msk.f32.vlgmr.msra.gmra.mxu0 %vm156_vm0, %v2237_v24 }
0x1275   :  { %4754 = vmatprep.mubr.msk.f32.mxu0 %vm5013_vm1, %v5012_v0 }
0x1334   :  { %v4751_v21 = vpop.f32.mrf.mxu0 }
0x1335   :  { %v5489_v28 = vadd.f32 %v4751_v21, %v4353_v27  ;;  %v4356_v21 = vld [vmem:[%s5745_s8 + $0x20] sm:$0xff] }
0x1336   :  { %v2323_v22 = vpop.f32.mrf.mxu0 }
0x1337   :  { %v5491_v29 = vadd.f32 %v4353_v27, %v2323_v22  ;;  %2415 = vrot.lane.b32.xlu1 %v5489_v28, %s5014_s23 }
0x1339   :  { %2338 = vrot.lane.b32.xlu0 %v5491_v29, %s5014_s23 }
0x13a9   :  { %v2416_v30 = vpop.permute.xlu1 %2415 }
0x13aa   :  { %4758 = vmatpush3.xpose.msk.msra.mxu1 %vm295_vm2, %v2416_v30 }
0x13ab   :  { %v2339_v31 = vpop.permute.xlu0 %2338  ;;  %4767 = vmatprep.subr.mxu1 %v5012_v0 }
0x13ac   :  { %4753 = vmatpush3.xpose.msk.msra.mxu0 %vm295_vm2, %v2339_v31 }
0x13ad   :  { %4760 = vmatmul.mubr.msk.f32.vlgmr.msra.gmra.mxu1 %vm295_vm2, %v5489_v28  ;;  %4762 = vmatprep.subr.mxu0 %v5012_v0 }
0x13ae   :  { %4769 = vmatprep.mubr.msk.f32.mxu1 %vm5013_vm1, %v5012_v0 }
0x13af   :  { %4755 = vmatmul.mubr.msk.f32.vlgmr.msra.gmra.mxu0 %vm295_vm2, %v5491_v29 }
0x13b0   :  { %4764 = vmatprep.mubr.msk.f32.mxu0 %vm5013_vm1, %v5012_v0 }
0x146d   :  { %v2487_v32 = vpop.f32.mrf.mxu1 }
0x146e   :  { %v2492_v33 = vmul.f32 0.35355338, %v2487_v32 }
0x146f   :  { %v2410_v3 = vpop.f32.mrf.mxu0  ;;  %v4761_v34 = vpop.f32.mrf.mxu1 }
0x1470   :  { %v2491_v35 = vmul.f32 0.35355338, %v2410_v3  ;;  %v2496_v36 = vsel %vm295_vm2, %v2492_v33, -inf }
0x1471   :  { %2497 = vmax.xlane.f32.xlu0 %v2496_v36  ;;  %v4756_v5 = vpop.f32.mrf.mxu0 }
0x1472   :  { %v2493_v37 = vsel %vm295_vm2, %v2491_v35, -inf }
0x1473   :  { %2494 = vmax.xlane.f32.xlu1 %v2493_v37  ;;  %v4357_v37 = vld [vmem:[%s5745_s8 + $0x28] sm:$0xff] }
0x14fa   :  { %v2498_v38 = vpop.xlane.xlu0 %2497 }
0x14fb   :  { %v2500_v39 = vsub.f32 %v2492_v33, %v2498_v38 }
0x14fc   :  { %v2495_v40 = vpop.xlane.xlu1 %2494 }
0x14fd   :  { %v2503_v41 = vmul.f32 1.442695, %v2500_v39  ;;  %v2499_v42 = vsub.f32 %v2491_v35, %v2495_v40 }
0x14ff   :  { %4946 = vpow2.f32 %v2503_v41  ;;  %v2501_v43 = vmul.f32 1.442695, %v2499_v42 }
0x1501   :  { %4948 = vpow2.f32 %v2501_v43 }
0x150c   :  { %v4947_v44 = vpop.eup %4946 }
0x150d   :  { %v2508_v45 = vsel %vm295_vm2, %v4947_v44, 0.0 }
0x150e   :  { %v4949_v47 = vpop.eup %4948  ;;  %2509 = vadd.xlane.f32.xlu1 %v2508_v45 }
0x150f   :  { %v2505_v49 = vsel %vm295_vm2, %v4949_v47, 0.0 }
0x1510   :  { %2506 = vadd.xlane.f32.xlu0 %v2505_v49 }
0x151f   :  { %2591 = vrot.lane.b32.xlu1 %v5489_v28, %s5015_s24 }
0x1523   :  { %2669 = vrot.lane.b32.xlu1 %v5491_v29, %s5016_s25 }
0x1526   :  { %2515 = vrot.lane.b32.xlu0 %v5491_v29, %s5015_s24 }
0x1527   :  { %2747 = vrot.lane.b32.xlu1 %v5489_v28, %s5016_s25 }
0x152a   :  { %2667 = vrot.lane.b32.xlu0 %v5491_v29, %s5017_s26 }
0x152b   :  { %2745 = vrot.lane.b32.xlu1 %v5489_v28, %s5017_s26 }
0x1597   :  { %v2510_v52 = vpop.xlane.xlu1 %2509 }
0x1598   :  { %4950 = vrcp.f32 %v2510_v52 }
0x1599   :  { %v2507_v55 = vpop.xlane.xlu0 %2506 }
0x159a   :  { %4952 = vrcp.f32 %v2507_v55 }
0x159b   :  { %v2592_v56 = vpop.permute.xlu1 %2591 }
0x159c   :  { %4768 = vmatpush3.msra.mxu1 %v2592_v56 }
0x159d   :  { %v2516_v57 = vpop.permute.xlu0 %2515  ;;  %4777 = vmatprep.subr.mxu1 %v5012_v0 }
0x159e   :  { %4763 = vmatpush3.msra.mxu0 %v2516_v57 }
0x159f   :  { %v2670_v26 = vpop.permute.xlu1 %2669  ;;  %4772 = vmatprep.subr.mxu0 %v5012_v0 }
0x15a1   :  { %v2668_v61 = vpop.permute.xlu0 %2667 }
0x15a3   :  { %v2748_v25 = vpop.permute.xlu1 %2747 }
0x15a5   :  { %v4951_v58 = vpop.eup %4950 }
0x15a6   :  { %v2514_v59 = vmul.f32 %v4951_v58, %v4947_v44 }
0x15a7   :  { %v4953_v46 = vpop.eup %4952  ;;  %v2746_v48 = vpop.permute.xlu1 %2745 }
0x15a8   :  { %4770 = vmatmul.mubr.msk.f32.vlgmr.msra.gmra.mxu1 %vm295_vm2, %v2514_v59  ;;  %v2513_v60 = vmul.f32 %v4953_v46, %v4949_v47 }
0x15a9   :  { %4778 = vmatpush3.xpose.msk.msra.mxu1 %vm295_vm2, %v2748_v25  ;;  %4779 = vmatprep.mubr.msk.f32.mxu1 %vm5013_vm1, %v5012_v0 }
0x15aa   :  { %4765 = vmatmul.mubr.msk.f32.vlgmr.msra.gmra.mxu0 %vm295_vm2, %v2513_v60  ;;  %4787 = vmatprep.subr.mxu1 %v5012_v0 }
0x15ab   :  { %4773 = vmatpush3.xpose.msk.msra.mxu0 %vm295_vm2, %v2670_v26  ;;  %4774 = vmatprep.mubr.msk.f32.mxu0 %vm5013_vm1, %v5012_v0 }
0x15ac   :  { %4780 = vmatmul.mubr.msk.f32.vlgmr.msra.gmra.mxu1 %vm295_vm2, %v2746_v48  ;;  %4782 = vmatprep.subr.mxu0 %v5012_v0 }
0x15ad   :  { %4789 = vmatprep.mubr.msk.f32.mxu1 %vm5013_vm1, %v5012_v0 }
0x15ae   :  { %4775 = vmatmul.mubr.msk.f32.vlgmr.msra.gmra.mxu0 %vm295_vm2, %v2668_v61 }
0x15af   :  { %4784 = vmatprep.mubr.msk.f32.mxu0 %vm5013_vm1, %v5012_v0 }
0x1668   :  { %v2663_v62 = vpop.f32.mrf.mxu1 }
0x166a   :  { %v2587_v63 = vpop.f32.mrf.mxu0  ;;  %v4771_v1 = vpop.f32.mrf.mxu1 }
0x166c   :  { %v4766_v2 = vpop.f32.mrf.mxu0  ;;  %v2819_v4 = vpop.f32.mrf.mxu1 }
0x166d   :  { %v2824_v6 = vmul.f32 0.35355338, %v2819_v4 }
0x166e   :  { %v2741_v7 = vpop.f32.mrf.mxu0  ;;  %v4781_v8 = vpop.f32.mrf.mxu1 }
0x166f   :  { %v2823_v9 = vmul.f32 0.35355338, %v2741_v7  ;;  %v2828_v10 = vsel %vm295_vm2, %v2824_v6, -inf }
0x1670   :  { %2829 = vmax.xlane.f32.xlu1 %v2828_v10  ;;  %v4776_v11 = vpop.f32.mrf.mxu0 }
0x1671   :  { %v2825_v12 = vsel %vm295_vm2, %v2823_v9, -inf }
0x1672   :  { %2826 = vmax.xlane.f32.xlu0 %v2825_v12 }
0x1681   :  { %2923 = vrot.lane.b32.xlu1 %v5489_v28, %s5018_s27 }
0x1685   :  { %3163 = vrot.lane.b32.xlu1 %v5491_v29, %s5019_s1 }
0x1689   :  { %3241 = vrot.lane.b32.xlu1 %v5489_v28, %s5019_s1 }
0x168d   :  { %3239 = vrot.lane.b32.xlu1 %v5489_v28, %s5020_s28 }
0x16f9   :  { %v2830_v13 = vpop.xlane.xlu1 %2829 }
0x16fa   :  { %v2832_v14 = vsub.f32 %v2824_v6, %v2830_v13 }
0x16fb   :  { %v2827_v15 = vpop.xlane.xlu0 %2826 }
0x16fc   :  { %v2835_v16 = vmul.f32 1.442695, %v2832_v14  ;;  %v2831_v17 = vsub.f32 %v2823_v9, %v2827_v15 }
0x16fd   :  { %v2924_v18 = vpop.permute.xlu1 %2923 }
0x16fe   :  { %4954 = vpow2.f32 %v2835_v16  ;;  %v2833_v19 = vmul.f32 1.442695, %v2831_v17  ;;  %4788 = vmatpush3.msra.mxu1 %v2924_v18  ;;  %v4358_v18 = vld [vmem:[%s5745_s8 + $0x30] sm:$0xff] }
0x16ff   :  { %4797 = vmatprep.subr.mxu1 %v4356_v21 }
0x1700   :  { %4956 = vpow2.f32 %v2833_v19 }
0x1701   :  { %v3164_v32 = vpop.permute.xlu1 %3163 }
0x1705   :  { %v3242_v35 = vpop.permute.xlu1 %3241 }
0x1709   :  { %v3240_v5 = vpop.permute.xlu1 %3239 }
0x170b   :  { %v4955_v20 = vpop.eup %4954 }
0x170c   :  { %v2840_v23 = vsel %vm295_vm2, %v4955_v20, 0.0 }
0x170d   :  { %v4957_v24 = vpop.eup %4956  ;;  %2841 = vadd.xlane.f32.xlu0 %v2840_v23 }
0x170e   :  { %v2837_v27 = vsel %vm295_vm2, %v4957_v24, 0.0 }
0x1711   :  { %2838 = vadd.xlane.f32.xlu0 %v2837_v27 }
0x1727   :  { %2847 = vrot.lane.b32.xlu0 %v5491_v29, %s5018_s27 }
0x172b   :  { %3161 = vrot.lane.b32.xlu0 %v5491_v29, %s5020_s28 }
0x1796   :  { %v2842_v22 = vpop.xlane.xlu0 %2841 }
0x1797   :  { %4958 = vrcp.f32 %v2842_v22 }
0x179a   :  { %v2839_v30 = vpop.xlane.xlu0 %2838 }
0x179b   :  { %4960 = vrcp.f32 %v2839_v30 }
0x179e   :  { %v2848_v31 = vpop.permute.xlu0 %2847 }
0x179f   :  { %4783 = vmatpush3.msra.mxu0 %v2848_v31 }
0x17a0   :  { %4792 = vmatprep.subr.mxu0 %v4357_v37 }
0x17a2   :  { %v3162_v45 = vpop.permute.xlu0 %3161 }
0x17a4   :  { %v4959_v33 = vpop.eup %4958 }
0x17a5   :  { %v2846_v3 = vmul.f32 %v4959_v33, %v4955_v20 }
0x17a7   :  { %4790 = vmatmul.mubr.msk.f32.vlgmr.msra.gmra.mxu1 %vm295_vm2, %v2846_v3 }
0x17a8   :  { %v4961_v34 = vpop.eup %4960  ;;  %4799 = vmatprep.mubr.msk.f32.mxu1 %vm295_vm2, %v2587_v63  ;;  %4798 = vmatpush3.msra.mxu1 %v4356_v21 }
0x17a9   :  { %4807 = vmatprep.subr.mxu1 %v5012_v0  ;;  %v2845_v36 = vmul.f32 %v4961_v34, %v4957_v24 }
0x17ab   :  { %4785 = vmatmul.mubr.msk.f32.vlgmr.msra.gmra.mxu0 %vm295_vm2, %v2845_v36  ;;  %4800 = vmatmul.mubr.msk.f32.vlgmr.msra.gmra.mxu1 %vm295_vm2, %v2663_v62 }
0x17ac   :  { %4808 = vmatpush3.xpose.msk.msra.mxu1 %vm295_vm2, %v3242_v35  ;;  %4809 = vmatprep.mubr.msk.f32.mxu1 %vm5013_vm1, %v5012_v0 }
0x17ad   :  { %4817 = vmatprep.subr.mxu1 %v5012_v0  ;;  %4793 = vmatpush3.msra.mxu0 %v4357_v37 }
0x17ae   :  { %4802 = vmatprep.subr.mxu0 %v5012_v0 }
0x17af   :  { %4810 = vmatmul.mubr.msk.f32.vlgmr.msra.gmra.mxu1 %vm295_vm2, %v3240_v5 }
0x17b0   :  { %4819 = vmatprep.mubr.msk.f32.mxu1 %vm5013_vm1, %v5012_v0 }
0x1867   :  { %v2995_v38 = vpop.f32.mrf.mxu1 }
0x1869   :  { %v4791_v39 = vpop.f32.mrf.mxu1 }
0x186b   :  { %v2919_v40 = vpop.f32.mrf.mxu0  ;;  %v5578_v41 = vpop.f32.mrf.mxu1 }
0x186c   :  { %4794 = vmatprep.mubr.msk.f32.mxu0 %vm295_vm2, %v2919_v40 }
0x186d   :  { %v4786_v42 = vpop.f32.mrf.mxu0  ;;  %4795 = vmatmul.mubr.msk.f32.vlgmr.msra.gmra.mxu0 %vm295_vm2, %v2995_v38  ;;  %v5582_v43 = vpop.f32.mrf.mxu1 }
0x186e   :  { %4803 = vmatpush3.xpose.msk.msra.mxu0 %vm295_vm2, %v3164_v32  ;;  %4804 = vmatprep.mubr.msk.f32.mxu0 %vm5013_vm1, %v5012_v0 }
0x186f   :  { %v3313_v44 = vpop.f32.mrf.mxu1  ;;  %4812 = vmatprep.subr.mxu0 %v5012_v0 }
0x1870   :  { %v3318_v47 = vmul.f32 0.35355338, %v3313_v44 }
0x1871   :  { %4805 = vmatmul.mubr.msk.f32.vlgmr.msra.gmra.mxu0 %vm295_vm2, %v3162_v45  ;;  %v4811_v49 = vpop.f32.mrf.mxu1 }
0x1872   :  { %v3322_v52 = vsel %vm295_vm2, %v3318_v47, -inf  ;;  %4814 = vmatprep.mubr.msk.f32.mxu0 %vm5013_vm1, %v5012_v0 }
0x1873   :  { %3323 = vmax.xlane.f32.xlu1 %v3322_v52 }
0x1884   :  { %3417 = vrot.lane.b32.xlu1 %v5489_v28, %s5021_s30 }
0x1888   :  { %3578 = vrot.lane.b32.xlu1 %v5491_v29, %s5022_s16 }
0x188c   :  { %3656 = vrot.lane.b32.xlu1 %v5489_v28, %s5022_s16 }
0x1890   :  { %3654 = vrot.lane.b32.xlu1 %v5489_v28, %s5023_s17 }
0x18fc   :  { %v3324_v55 = vpop.xlane.xlu1 %3323 }
0x18fd   :  { %v3326_v57 = vsub.f32 %v3318_v47, %v3324_v55 }
0x18ff   :  { %v3329_v26 = vmul.f32 1.442695, %v3326_v57 }
0x1900   :  { %v3418_v56 = vpop.permute.xlu1 %3417 }
0x1901   :  { %4818 = vmatpush3.msra.mxu1 %v3418_v56  ;;  %4962 = vpow2.f32 %v3329_v26 }
0x1902   :  { %4827 = vmatprep.subr.mxu1 %v5012_v0 }
0x1904   :  { %v3579_v10 = vpop.permute.xlu1 %3578 }
0x1908   :  { %v3657_v27 = vpop.permute.xlu1 %3656 }
0x190c   :  { %v3655_v30 = vpop.permute.xlu1 %3654 }
0x190e   :  { %v4963_v61 = vpop.eup %4962 }
0x190f   :  { %v3334_v62 = vsel %vm295_vm2, %v4963_v61, 0.0 }
0x192d   :  { %v5601_v58 = vpop.f32.mrf.mxu0 }
0x192e   :  { %v3158_v35 = vadd.f32 %v5578_v41, %v5601_v58 }
0x192f   :  { %v5603_v25 = vpop.f32.mrf.mxu0 }
0x1930   :  { %v3153_v5 = vadd.f32 %v5582_v43, %v5603_v25 }
0x1931   :  { %v3235_v59 = vpop.f32.mrf.mxu0 }
0x1932   :  { %v3317_v46 = vmul.f32 0.35355338, %v3235_v59  ;;  %v4359_v59 = vld [vmem:[%s5745_s8 + $0x38] sm:$0xff] }
0x1933   :  { %v4806_v60 = vpop.f32.mrf.mxu0 }
0x1934   :  { %v3319_v48 = vsel %vm295_vm2, %v3317_v46, -inf }
0x1935   :  { %3320 = vmax.xlane.f32.xlu0 %v3319_v48 }
0x1939   :  { %3335 = vadd.xlane.f32.xlu0 %v3334_v62  ;;  %v4393_v62 = vld [vmem:[%s5746_s9 + $0x1] ss:$0 sm:$0xff] }
0x19be   :  { %v3321_v63 = vpop.xlane.xlu0 %3320 }
0x19bf   :  { %v3325_v1 = vsub.f32 %v3317_v46, %v3321_v63 }
0x19c1   :  { %v3327_v2 = vmul.f32 1.442695, %v3325_v1 }
0x19c2   :  { %v3336_v4 = vpop.xlane.xlu0 %3335 }
0x19c3   :  { %4964 = vpow2.f32 %v3327_v2 }
0x19c4   :  { %4966 = vrcp.f32 %v3336_v4 }
0x19d0   :  { %v4965_v6 = vpop.eup %4964 }
0x19d1   :  { %v4967_v7 = vpop.eup %4966  ;;  %v3331_v8 = vsel %vm295_vm2, %v4965_v6, 0.0 }
0x19d2   :  { %3332 = vadd.xlane.f32.xlu0 %v3331_v8  ;;  %v3340_v9 = vmul.f32 %v4967_v7, %v4963_v61 }
0x19d4   :  { %4820 = vmatmul.mubr.msk.f32.vlgmr.msra.gmra.mxu1 %vm295_vm2, %v3340_v9 }
0x19d5   :  { %4828 = vmatpush3.xpose.msk.msra.mxu1 %vm295_vm2, %v3579_v10  ;;  %4829 = vmatprep.mubr.msk.f32.mxu1 %vm5013_vm1, %v5012_v0 }
0x19d6   :  { %4837 = vmatprep.subr.mxu1 %v5012_v0 }
0x19e8   :  { %3341 = vrot.lane.b32.xlu0 %v5491_v29, %s5021_s30 }
0x19ec   :  { %3576 = vrot.lane.b32.xlu0 %v5491_v29, %s5023_s17 }
0x1a5b   :  { %v3333_v11 = vpop.xlane.xlu0 %3332 }
0x1a5c   :  { %4968 = vrcp.f32 %v3333_v11 }
0x1a5f   :  { %v3342_v12 = vpop.permute.xlu0 %3341 }
0x1a60   :  { %4813 = vmatpush3.msra.mxu0 %v3342_v12 }
0x1a61   :  { %4822 = vmatprep.subr.mxu0 %v4358_v18 }
0x1a63   :  { %v3577_v13 = vpop.permute.xlu0 %3576 }
0x1a64   :  { %4830 = vmatmul.mubr.msk.f32.vlgmr.msra.gmra.mxu1 %vm295_vm2, %v3577_v13 }
0x1a65   :  { %4839 = vmatprep.mubr.msk.f32.mxu1 %vm5013_vm1, %v5012_v0 }
0x1a69   :  { %v4969_v14 = vpop.eup %4968 }
0x1a6a   :  { %v3339_v15 = vmul.f32 %v4969_v14, %v4965_v6 }
0x1a6c   :  { %4815 = vmatmul.mubr.msk.f32.vlgmr.msra.gmra.mxu0 %vm295_vm2, %v3339_v15 }
0x1a6d   :  { %4823 = vmatpush3.msra.mxu0 %v4358_v18 }
0x1a6e   :  { %4832 = vmatprep.subr.mxu0 %v5012_v0 }
0x1a94   :  { %v3489_v16 = vpop.f32.mrf.mxu1 }
0x1a96   :  { %v4821_v17 = vpop.f32.mrf.mxu1 }
0x1b24   :  { %v3650_v19 = vpop.f32.mrf.mxu1 }
0x1b25   :  { %v3732_v20 = vmul.f32 0.35355338, %v3650_v19  ;;  %v4398_v19 = vld [vmem:[%s5747_s10 + $0x38] sm:$0xff] }
0x1b26   :  { %v4831_v23 = vpop.f32.mrf.mxu1 }
0x1b27   :  { %v3734_v24 = vsel %vm295_vm2, %v3732_v20, -inf  ;;  %v4396_v23 = vld [vmem:[%s5747_s10 + $0x28] sm:$0xff] }
0x1b28   :  { %3735 = vmax.xlane.f32.xlu0 %v3734_v24  ;;  %v4395_v24 = vld [vmem:[%s5747_s10 + $0x20] sm:$0xff] }
0x1b2c   :  { %v3413_v21 = vpop.f32.mrf.mxu0 }
0x1b2d   :  { %4824 = vmatprep.mubr.msk.f32.mxu0 %vm295_vm2, %v3413_v21 }
0x1b2e   :  { %v4816_v22 = vpop.f32.mrf.mxu0  ;;  %4825 = vmatmul.mubr.msk.f32.vlgmr.msra.gmra.mxu0 %vm295_vm2, %v3489_v16 }
0x1b2f   :  { %4833 = vmatpush3.xpose.msk.msra.mxu0 %vm295_vm2, %v3657_v27  ;;  %4834 = vmatprep.mubr.msk.f32.mxu0 %vm5013_vm1, %v5012_v0 }
0x1b30   :  { %4842 = vmatprep.subr.mxu0 %v5012_v0 }
0x1b32   :  { %4835 = vmatmul.mubr.msk.f32.vlgmr.msra.gmra.mxu0 %vm295_vm2, %v3655_v30 }
0x1b33   :  { %4844 = vmatprep.mubr.msk.f32.mxu0 %vm5013_vm1, %v5012_v0 }
0x1bb1   :  { %v3736_v31 = vpop.xlane.xlu0 %3735 }
0x1bb2   :  { %v3740_v32 = vsub.f32 %v3732_v20, %v3736_v31  ;;  %v4397_v20 = vld [vmem:[%s5747_s10 + $0x30] sm:$0xff] }
0x1bb4   :  { %v3742_v33 = vmul.f32 1.442695, %v3740_v32 }
0x1bb6   :  { %4970 = vpow2.f32 %v3742_v33  ;;  %v4394_v33 = vld [vmem:[%s5742_s5 + $0x2] sm:$0x3] }
0x1bc3   :  { %v4971_v3 = vpop.eup %4970 }
0x1bc4   :  { %v3746_v34 = vsel %vm295_vm2, %v4971_v3, 0.0 }
0x1bc5   :  { %3747 = vadd.xlane.f32.xlu0 %v3746_v34  ;;  %v4034_v34 = vrot.slane %v4394_v33, %v5195_v51 }
0x1bee   :  { %v4826_v36 = vpop.f32.mrf.mxu0 }
0x1bef   :  { %v3575_v37 = vadd.f32 %v4826_v36, %v3158_v35 }
0x1bf0   :  { %v3565_v38 = vpop.f32.mrf.mxu0 }
0x1bf1   :  { %v3574_v39 = vadd.f32 %v3565_v38, %v3153_v5  ;;  %v4040_v38 = vrot.slane %v4394_v33, %v5200_v53 }
0x1bf2   :  { %v3728_v40 = vpop.f32.mrf.mxu0 }
0x1bf3   :  { %v3733_v0 = vmul.f32 0.35355338, %v3728_v40 }
0x1bf4   :  { %v4836_v42 = vpop.f32.mrf.mxu0 }
0x1bf5   :  { %v3737_v44 = vsel %vm295_vm2, %v3733_v0, -inf  ;;  %v4410_v42 = vld [vmem:[%s5749_s12 + $0x78] sm:$0xff] }
0x1bf6   :  { %3738 = vmax.xlane.f32.xlu1 %v3737_v44  ;;  %v4409_v44 = vld [vmem:[%s5749_s12 + $0x70] sm:$0xff] }
0x1c07   :  { %3832 = vrot.lane.b32.xlu1 %v5489_v28, %s5024_s20 }
0x1c4e   :  { %v3748_v55 = vpop.xlane.xlu0 %3747 }
0x1c7f   :  { %v3739_v45 = vpop.xlane.xlu1 %3738 }
0x1c80   :  { %v3741_v47 = vsub.f32 %v3733_v0, %v3739_v45  ;;  %v4408_v45 = vld [vmem:[%s5749_s12 + $0x68] sm:$0xff] }
0x1c82   :  { %v3744_v49 = vmul.f32 1.442695, %v3741_v47  ;;  %v4407_v47 = vld [vmem:[%s5749_s12 + $0x60] sm:$0xff] }
0x1c83   :  { %v3833_v41 = vpop.permute.xlu1 %3832 }
0x1c84   :  { %4972 = vpow2.f32 %v3744_v49  ;;  %4843 = vmatpush3.msra.mxu0 %v3833_v41  ;;  %v4406_v49 = vld [vmem:[%s5749_s12 + $0x58] sm:$0xff]  ;;  %v4405_v41 = vld [vmem:[%s5749_s12 + $0x50] sm:$0xff] }
0x1c85   :  { %4974 = vrcp.f32 %v3748_v55  ;;  %4852 = vmatprep.subr.mxu0 %v4398_v19  ;;  %v4400_v55 = vld [vmem:[%s5748_s11 + $0x1] ss:$0 sm:$0xff] }
0x1c91   :  { %v4973_v52 = vpop.eup %4972 }
0x1c92   :  { %v3749_v43 = vsel %vm295_vm2, %v4973_v52, 0.0  ;;  %v4975_v57 = vpop.eup %4974 }
0x1c93   :  { %3750 = vadd.xlane.f32.xlu0 %v3749_v43  ;;  %v3754_v28 = vmul.f32 %v4975_v57, %v4971_v3  ;;  %v4403_v43 = vld [vmem:[%s5749_s12 + $0x40] sm:$0xff] }
0x1ca9   :  { %3756 = vrot.lane.b32.xlu0 %v5491_v29, %s5024_s20  ;;  %s5025_s20 = smov [#allocation2]  }
0x1caa   :  { %s4293_s3 = sshll.u32 %s5025_s20, 4  ;;  %s4294_s3 = int_to_ptr.vmem [resolvable:$true] %s4293_s3 }
0x1cab   :  { %p4995_p1 = scmp.lt.s32.totalorder %s4294_s3, %s4294_s3 }
0x1d1c   :  { %v3751_v56 = vpop.xlane.xlu0 %3750 }
0x1d1d   :  { %4976 = vrcp.f32 %v3751_v56 }
0x1d20   :  { %v3757_v26 = vpop.permute.xlu0 %3756 }
0x1d21   :  { %4838 = vmatpush3.msra.mxu1 %v3757_v26 }
0x1d22   :  { %4840 = vmatmul.mubr.msk.f32.vlgmr.msra.gmra.mxu1 %vm295_vm2, %v3754_v28  ;;  %4847 = vmatprep.subr.mxu1 %v4359_v59 }
0x1d23   :  { %4848 = vmatpush3.msra.mxu1 %v4359_v59 }
0x1d24   :  { %4863 = vmatprep.subr.mxu1 %v4410_v42 }
0x1d2a   :  { %v4977_v58 = vpop.eup %4976 }
0x1d2b   :  { %v3755_v25 = vmul.f32 %v4977_v58, %v4973_v52  ;;  %v4404_v52 = vld [vmem:[%s5749_s12 + $0x48] sm:$0xff] }
0x1d2d   :  { %4845 = vmatmul.mubr.msk.f32.vlgmr.msra.gmra.mxu0 %vm295_vm2, %v3755_v25 }
0x1d2e   :  { %4853 = vmatpush3.msra.mxu0 %v4398_v19 }
0x1d2f   :  { %4854 = vmatprep.subr.mxu0 %v4397_v20 }
0x1d30   :  { %4855 = vmatpush3.msra.mxu0 %v4397_v20 }
0x1d31   :  { %4856 = vmatprep.subr.mxu0 %v4396_v23 }
0x1d32   :  { %4857 = vmatpush3.msra.mxu0 %v4396_v23 }
0x1d33   :  { %4858 = vmatprep.subr.mxu0 %v4395_v24 }
0x1d34   :  { %4859 = vmatpush3.msra.mxu0 %v4395_v24 }
0x1de2   :  { %v3828_v29 = vpop.f32.mrf.mxu1 }
0x1de3   :  { %4849 = vmatprep.mubr.msk.f32.mxu1 %vm295_vm2, %v3828_v29 }
0x1de4   :  { %v4841_v46 = vpop.f32.mrf.mxu1 }
0x1ded   :  { %v3904_v60 = vpop.f32.mrf.mxu0 }
0x1dee   :  { %4850 = vmatmul.mubr.msk.f32.vlgmr.msra.gmra.mxu1 %vm295_vm2, %v3904_v60 }
0x1def   :  { %v4846_v48 = vpop.f32.mrf.mxu0  ;;  %4864 = vmatpush3.msra.mxu1 %v4410_v42 }
0x1df0   :  { %4865 = vmatprep.subr.mxu1 %v4409_v44 }
0x1df1   :  { %4866 = vmatpush3.msra.mxu1 %v4409_v44 }
0x1df2   :  { %4867 = vmatprep.subr.mxu1 %v4408_v45 }
0x1df3   :  { %4868 = vmatpush3.msra.mxu1 %v4408_v45 }
0x1df4   :  { %4869 = vmatprep.subr.mxu1 %v4407_v47 }
0x1df5   :  { %4870 = vmatpush3.msra.mxu1 %v4407_v47 }
0x1df6   :  { %4871 = vmatprep.subr.mxu1 %v4406_v49 }
0x1df7   :  { %4872 = vmatpush3.msra.mxu1 %v4406_v49 }
0x1df8   :  { %4873 = vmatprep.subr.mxu1 %v4405_v41 }
0x1df9   :  { %4874 = vmatpush3.msra.mxu1 %v4405_v41 }
0x1dfa   :  { %4875 = vmatprep.subr.mxu1 %v4404_v52 }
0x1dfb   :  { %4876 = vmatpush3.msra.mxu1 %v4404_v52 }
0x1dfc   :  { %4877 = vmatprep.subr.mxu1 %v4403_v43 }
0x1dfd   :  { %4878 = vmatpush3.msra.mxu1 %v4403_v43 }
0x1eae   :  { %v4851_v61 = vpop.f32.mrf.mxu1 }
0x1eaf   :  { %v3990_v63 = vadd.f32 %v4851_v61, %v3575_v37 }
0x1eb0   :  { %v3980_v1 = vpop.f32.mrf.mxu1 }
0x1eb1   :  { %v4000_v2 = vadd.f32 %v4393_v62, %v3990_v63  ;;  %v3989_v4 = vadd.f32 %v3980_v1, %v3574_v39  ;;  %v4412_v1 = vld [vmem:[%s5750_s13 + $0x1] ss:$0 sm:$0xff] }
0x1eb3   :  { %v5657_v6 = vadd.f32 %v4000_v2, %v5451_v50  ;;  %v3999_v7 = vadd.f32 %v4393_v62, %v3989_v4 }
0x1eb5   :  { %v5660_v8 = vadd.f32 %v3999_v7, %v5454_v54  ;;  %v4008_v9 = vsel %vm156_vm0, %v5657_v6, 0.0 }
0x1eb6   :  { %4009 = vadd.xlane.f32.xlu0 %v4008_v9 }
0x1eb7   :  { %v4005_v10 = vsel %vm156_vm0, %v5660_v8, 0.0 }
0x1eb8   :  { %4006 = vadd.xlane.f32.xlu1 %v4005_v10 }
0x1f3f   :  { %v4010_v11 = vpop.xlane.xlu0 %4009 }
0x1f40   :  { %v4012_v12 = vmul.f32 0.03125, %v4010_v11 }
0x1f41   :  { %v4007_v13 = vpop.xlane.xlu1 %4006 }
0x1f42   :  { %v4014_v14 = vsub.f32 %v5657_v6, %v4012_v12  ;;  %v4011_v15 = vmul.f32 0.03125, %v4007_v13 }
0x1f44   :  { %v4013_v50 = vsub.f32 %v5660_v8, %v4011_v15  ;;  %v4016_v16 = vmul.f32 %v4014_v14, %v4014_v14 }
0x1f46   :  { %v4020_v54 = vsel %vm156_vm0, %v4016_v16, 0.0  ;;  %v4015_v17 = vmul.f32 %v4013_v50, %v4013_v50 }
0x1f47   :  { %4021 = vadd.xlane.f32.xlu1 %v4020_v54 }
0x1f48   :  { %v4017_v18 = vsel %vm156_vm0, %v4015_v17, 0.0 }
0x1f49   :  { %4018 = vadd.xlane.f32.xlu0 %v4017_v18 }
0x1fd0   :  { %v4022_v27 = vpop.xlane.xlu1 %4021 }
0x1fd1   :  { %v4024_v21 = vmul.f32 0.03125, %v4022_v27 }
0x1fd2   :  { %v4019_v22 = vpop.xlane.xlu0 %4018 }
0x1fd3   :  { %v4026_v30 = vadd.f32 1e-06, %v4024_v21  ;;  %v4023_v31 = vmul.f32 0.03125, %v4019_v22 }
0x1fd5   :  { %4978 = vrsqrt.f32 %v4026_v30  ;;  %v4025_v32 = vadd.f32 1e-06, %v4023_v31  ;;  %v4247_v30 = vld [vmem:[%s5751_s14] sm:$0x3]  ;;  %s4990_s14 = scalar_lea.vmem %s4294_s3, 256 }
0x1fd6   :  { %v4277_v31 = vrot.slane %v4247_v30, %v5195_v51  ;;  %p4991_p0 = scmp.ne.s32.totalorder %s4294_s3, %s4990_s14  ;;  %p4996_p2 = scmp.lt.s32.totalorder %s4990_s14, %s4990_s14 }
0x1fd7   :  { %4980 = vrsqrt.f32 %v4025_v32 }
0x1fd8   :  { %p4997_p3 = por %p4996_p2, %p4995_p1 }
0x1fda   :  { %p4998_p4 = pnand %p4997_p3, %p4991_p0 }
0x1fe2   :  { %v4979_v3 = vpop.eup %4978 }
0x1fe3   :  { %v4030_v35 = vmul.f32 %v4979_v3, %v4014_v14  ;;  %v4283_v3 = vrot.slane %v4247_v30, %v5200_v53 }
0x1fe4   :  { %v4981_v36 = vpop.eup %4980 }
0x1fe5   :  { %v4029_v5 = vmul.f32 %v4981_v36, %v4013_v50  ;;  %v4036_v37 = vmul.f32 %v4034_v34, %v4030_v35 }
0x1fe7   :  { %v4035_v39 = vmul.f32 %v4034_v34, %v4029_v5  ;;  %v4042_v0 = vadd.f32 %v4040_v38, %v4036_v37 }
0x1fe9   :  { %v4041_v40 = vadd.f32 %v4040_v38, %v4035_v39 }
0x1feb   :  { %4860 = vmatprep.mubr.msk.f32.mxu0 %vm156_vm0, %v4041_v40 }
0x1fec   :  { %4861 = vmatmul.mubr.msk.f32.vlgmr.msra.gmra.mxu0 %vm156_vm0, %v4042_v0 }
0x20ac   :  { %v4862_v56 = vpop.f32.mrf.mxu0 }
0x20ad   :  { %v4134_v57 = vadd.f32 %v4862_v56, %v4400_v55 }
0x20ae   :  { %v4128_v26 = vpop.f32.mrf.mxu0 }
0x20af   :  { %v4140_v28 = vmul.f32 0.70710677, %v4134_v57  ;;  %v4129_v58 = vadd.f32 %v4400_v55, %v4128_v26  ;;  %v4138_v61 = vmul.f32 0.5, %v4134_v57 }
0x20b1   :  { %4982 = verf.f32 %v4140_v28  ;;  %v4139_v25 = vmul.f32 0.70710677, %v4129_v58  ;;  %v4137_v60 = vmul.f32 0.5, %v4129_v58 }
0x20b3   :  { %4984 = verf.f32 %v4139_v25 }
0x20be   :  { %v4983_v59 = vpop.eup %4982 }
0x20bf   :  { %v4144_v46 = vadd.f32 1.0, %v4983_v59 }
0x20c0   :  { %v4985_v29 = vpop.eup %4984 }
0x20c1   :  { %v4143_v48 = vadd.f32 1.0, %v4985_v29  ;;  %v4146_v63 = vmul.f32 %v4144_v46, %v4138_v61 }
0x20c3   :  { %v4145_v62 = vmul.f32 %v4143_v48, %v4137_v60 }
0x20c5   :  { %4879 = vmatprep.mubr.msk.f32.mxu1 %vm2114_vm3, %v4145_v62 }
0x20c6   :  { %4880 = vmatmul.mubr.msk.f32.vlgmr.msra.gmra.mxu1 %vm2114_vm3, %v4146_v63 }
0x2186   :  { %v4881_v2 = vpop.f32.mrf.mxu1 }
0x2187   :  { %v4242_v4 = vadd.f32 %v4881_v2, %v4412_v1 }
0x2188   :  { %v4236_v7 = vpop.f32.mrf.mxu1 }
0x2189   :  { %v4237_v9 = vadd.f32 %v4412_v1, %v4236_v7  ;;  %v4246_v10 = vadd.f32 %v4242_v4, %v5657_v6 }
0x218b   :  { %v4251_v11 = vsel %vm156_vm0, %v4246_v10, 0.0  ;;  %v4245_v12 = vadd.f32 %v4237_v9, %v5660_v8 }
0x218c   :  { %4252 = vadd.xlane.f32.xlu1 %v4251_v11 }
0x218d   :  { %v4248_v13 = vsel %vm156_vm0, %v4245_v12, 0.0 }
0x218e   :  { %4249 = vadd.xlane.f32.xlu0 %v4248_v13 }
0x2215   :  { %v4253_v14 = vpop.xlane.xlu1 %4252 }
0x2216   :  { %v4255_v15 = vmul.f32 0.03125, %v4253_v14 }
0x2217   :  { %v4250_v50 = vpop.xlane.xlu0 %4249 }
0x2218   :  { %v4257_v16 = vsub.f32 %v4246_v10, %v4255_v15  ;;  %v4254_v54 = vmul.f32 0.03125, %v4250_v50 }
0x221a   :  { %v4256_v17 = vsub.f32 %v4245_v12, %v4254_v54  ;;  %v4259_v18 = vmul.f32 %v4257_v16, %v4257_v16 }
0x221c   :  { %v4263_v19 = vsel %vm156_vm0, %v4259_v18, 0.0  ;;  %v4258_v20 = vmul.f32 %v4256_v17, %v4256_v17 }
0x221d   :  { %4264 = vadd.xlane.f32.xlu1 %v4263_v19 }
0x221e   :  { %v4260_v6 = vsel %vm156_vm0, %v4258_v20, 0.0 }
0x221f   :  { %4261 = vadd.xlane.f32.xlu0 %v4260_v6 }
0x22a6   :  { %v4265_v23 = vpop.xlane.xlu1 %4264 }
0x22a7   :  { %v4267_v8 = vmul.f32 0.03125, %v4265_v23 }
0x22a8   :  { %v4262_v24 = vpop.xlane.xlu0 %4261 }
0x22a9   :  { %v4269_v27 = vadd.f32 1e-06, %v4267_v8  ;;  %v4266_v21 = vmul.f32 0.03125, %v4262_v24 }
0x22ab   :  { %4986 = vrsqrt.f32 %v4269_v27  ;;  %v4268_v22 = vadd.f32 1e-06, %v4266_v21 }
0x22ad   :  { %4988 = vrsqrt.f32 %v4268_v22 }
0x22b8   :  { %v4987_v32 = vpop.eup %4986 }
0x22b9   :  { %v4273_v33 = vmul.f32 %v4987_v32, %v4257_v16 }
0x22ba   :  { %v4989_v34 = vpop.eup %4988 }
0x22bb   :  { %v4272_v35 = vmul.f32 %v4989_v34, %v4256_v17  ;;  %v4279_v36 = vmul.f32 %v4277_v31, %v4273_v33 }
0x22bd   :  { %v4278_v5 = vmul.f32 %v4277_v31, %v4272_v35  ;;  %v4285_v37 = vadd.f32 %v4283_v3, %v4279_v36 }
0x22bf   :  { %v4284_v38 = vadd.f32 %v4283_v3, %v4278_v5  ;;  %4287 = vst.msk [vmem:[#allocation2 + $0x8] sm:$0xff] %vm156_vm0, %v4285_v37 }
0x22c1   :  { %4286 = vst.msk [vmem:[#allocation2] sm:$0xff] %vm156_vm0, %v4284_v38 }
0x22c2   :  { %5001 = shalt.err (!%p4998_p4)
}
0x22c3   :  { %s5026_s29 = smov 128   ;;  %s5027_s18 = smov 8  }
0x22c4   :  { %4299 = dma.vmem_to_hbm [thread:$0]  %s4294_s3, 256, %s5752_s15, [#allocation3], %s5026_s29, %s5026_s29, %s5027_s18  }
0x22c5   :  { %5010 = dma.done.wait [#allocation3], 256  }
0x22c6   :  { %5011 = vsyncadd [#allocation3], 4294967040 }
0x22c7   :  { %4303 = vsyncpa [#allocation3], 1 }

</bundles_post_ra>
